<compile_context>
chip_gen: v6e
topology: v6e:2x2x1
jax: 0.10.0
libtpu: 0.0.40
codegen_flags: <defaults>
</compile_context>

<pallas_src>
import functools

import jax
import jax.numpy as jnp
from jax import lax
from jax.experimental import pallas as pl
from jax.experimental.pallas import tpu as pltpu

KSIZE = 7
PAD = 3                 # conv padding for kernel_size=7
MAX_BLOCK_N = 4         # vreg-pressure cap for the unrolled 98-tap conv
CHAN_UNROLL_MAX = 32    # statically unroll the channel reduction up to this C


def _round_up(v, m):
    return -(-v // m) * m


def spatial_attention_kernel(w_ref, x_ref, o_ref, *, Nb, C, H, W):
    # w_ref : SMEM (2*KSIZE*KSIZE,) f32  -- conv weights, flattened [c, kh, kw]
    # x_ref : VMEM (Nb, C, HW)           -- lane-dense input block
    # o_ref : VMEM (Nb, 1, HW)           -- lane-dense attention map
    HW = H * W
    LPAD = _round_up(PAD * W + PAD, 128)   # lane-aligned zero extension width

    # ---- channel mean / max, streamed & lane-dense (no (C, HW) slab) ---------
    if C <= CHAN_UNROLL_MAX:
        def chan(c):
            return x_ref[:, c, :].astype(jnp.float32)          # (Nb, HW)
        s0 = chan(0)
        m0 = s0
        s1 = m1 = None
        for c in range(1, C):                                  # 2 acc pairs (ILP)
            v = chan(c)
            if c & 1:
                s1 = v if s1 is None else s1 + v
                m1 = v if m1 is None else jnp.maximum(m1, v)
            else:
                s0 = s0 + v
                m0 = jnp.maximum(m0, v)
        if s1 is None:
            s, mx = s0, m0
        else:
            s, mx = s0 + s1, jnp.maximum(m0, m1)
    else:
        # Stream sublane-tile-aligned chunks of 8 channels.
        n_chunks = C // 8
        tail = C - n_chunks * 8

        def body(i, carry):
            acc_s, acc_m = carry
            off = pl.multiple_of(i * 8, 8)
            ch = x_ref[:, pl.ds(off, 8), :].astype(jnp.float32)   # (Nb, 8, HW)
            return (acc_s + jnp.sum(ch, axis=1),
                    jnp.maximum(acc_m, jnp.max(ch, axis=1)))

        s = jnp.zeros((Nb, HW), jnp.float32)
        mx = jnp.full((Nb, HW), -jnp.inf, jnp.float32)
        s, mx = lax.fori_loop(0, n_chunks, body, (s, mx))
        for c in range(C - tail, C):                              # static tail
            v = x_ref[:, c, :].astype(jnp.float32)
            s = s + v
            mx = jnp.maximum(mx, v)

    avg = s * jnp.float32(1.0 / C)

    # ---- 7x7 conv (2 -> 1 channel, zero padding 3) on the flat layout --------
    # Tap (kh, kw) for flat output index p = h*W + w reads the flat feature at
    # p + (kh-3)*W + (kw-3).  Rows out of [0, H) land in the zero extension;
    # columns out of [0, W) are killed by a per-kw column mask (independent of
    # kh/c, so it is factored out of the kh sum).
    zpad = jnp.zeros((Nb, LPAD), jnp.float32)
    lane = lax.broadcasted_iota(jnp.int32, (1, HW), 1)
    if W & (W - 1) == 0:
        col = lane & (W - 1)          # in-row column index (power-of-two W)
    else:
        col = lane % W                # TODO(synk): verify vector remsi lowering for non-pow2 W

    acc_per_c = []
    for c, feat in enumerate((avg, mx)):       # c=0: mean plane, c=1: max plane
        fpad = jnp.concatenate([zpad, feat, zpad], axis=1)   # (Nb, HW + 2*LPAD)
        acc = jnp.zeros((Nb, HW), jnp.float32)
        for kw in range(KSIZE):
            dw = kw - PAD
            valid = jnp.logical_and(col + dw >= 0, col + dw < W)   # (1, HW)
            part = None
            for kh in range(KSIZE):
                dh = kh - PAD
                off = LPAD + dh * W + dw
                w_s = w_ref[c * KSIZE * KSIZE + kh * KSIZE + kw]
                term = fpad[:, off:off + HW] * w_s
                part = term if part is None else part + term
            acc = acc + jnp.where(valid, part, jnp.float32(0.0))
        acc_per_c.append(acc)

    res = jax.nn.sigmoid(acc_per_c[0] + acc_per_c[1]).astype(o_ref.dtype)  # (Nb, HW)
    for i in range(Nb):                        # lane-dense per-image stores
        o_ref[pl.ds(i, 1), 0, :] = res[i:i + 1, :]


def _chip_profile():
    """Returns (two_tensorcores_per_chip, big_vmem). Conservative when unknown."""
    kind = ""
    try:
        kind = jax.devices()[0].device_kind.lower()
    except Exception:
        pass
    single_tc_128mb = ("v5" in kind) or ("v6" in kind)   # v5e/v6e: 1 TC, 128 MiB VMEM
    return (not single_tc_128mb), single_tc_128mb


def _pick_block_n(N, C, HW, itemsize, *, two_tc, big_vmem):
    """Images per grid step: amortize per-step overhead, stay inside VMEM
    (double-buffered) and the conv's vreg budget; on 2-TC chips keep >= 2 grid
    steps with an even step count so both TensorCores get balanced work."""
    per_img = _round_up(C, 8) * _round_up(HW, 128) * itemsize
    budget = (16 << 20) if big_vmem else (6 << 20)   # per double-buffered input buffer
    nb = max(1, min(N, budget // max(1, per_img), MAX_BLOCK_N))
    if two_tc and N > 1:
        nb = min(nb, pl.cdiv(N, 2))                  # >= 2 steps
        for cand in range(nb, 0, -1):                # prefer an even step count
            if pl.cdiv(N, cand) % 2 == 0:
                nb = cand
                break
    return int(nb)


def spatial_attention(x, w, *, block_n=None):
    """x: (N, C, H, W); w: (1, 2, 7, 7) OIHW conv weight. Returns (N, 1, H, W)."""
    N, C, H, W = x.shape
    assert w.shape == (1, 2, KSIZE, KSIZE)
    HW = H * W

    two_tc, big_vmem = _chip_profile()
    if block_n is None:
        block_n = _pick_block_n(N, C, HW, x.dtype.itemsize,
                                two_tc=two_tc, big_vmem=big_vmem)

    x_flat = x.reshape(N, C, HW)                       # free metadata reshape
    w_flat = w.reshape(-1).astype(jnp.float32)         # (2*7*7,), [c, kh, kw]

    kernel = functools.partial(spatial_attention_kernel, Nb=block_n, C=C, H=H, W=W)

    in_blk = block_n * _round_up(C, 8) * _round_up(HW, 128) * x.dtype.itemsize
    out_blk = block_n * 8 * _round_up(HW, 128) * x.dtype.itemsize
    cap = (100 << 20) if big_vmem else (48 << 20)      # headroom on v7x's 64 MiB VMEM
    vmem_limit = int(min(cap, max(32 << 20, 2 * (in_blk + out_blk) + (8 << 20))))

    out_flat = pl.pallas_call(
        kernel,
        out_shape=jax.ShapeDtypeStruct((N, 1, HW), x.dtype),
        grid=(pl.cdiv(N, block_n),),                   # ragged last block is OK
        in_specs=[
            pl.BlockSpec(memory_space=pltpu.MemorySpace.SMEM),        # weights
            pl.BlockSpec((block_n, C, HW), lambda n: (n, 0, 0)),      # input
        ],
        out_specs=pl.BlockSpec((block_n, 1, HW), lambda n: (n, 0, 0)),
        compiler_params=pltpu.CompilerParams(
            dimension_semantics=("parallel",),
            vmem_limit_bytes=vmem_limit,
        ),
    )(w_flat, x_flat)

    return out_flat.reshape(N, 1, H, W)


def spatial_attention_reference(x, w):
    avg = jnp.mean(x, axis=1, keepdims=True)
    mx = jnp.max(x, axis=1, keepdims=True)
    feat = jnp.concatenate([avg, mx], axis=1)
    conv = lax.conv_general_dilated(
        feat, w, window_strides=(1, 1),
        padding=((PAD, PAD), (PAD, PAD)),
        dimension_numbers=("NCHW", "OIHW", "NCHW"))
    return jax.nn.sigmoid(conv)


if __name__ == "__main__":
    key = jax.random.PRNGKey(0)
    kx, kw = jax.random.split(key)

    N, C, H, W = 2, 4, 16, 16
    x = jax.random.normal(kx, (N, C, H, W), dtype=jnp.float32)

    # Deterministic conv1 weight (nn.Conv2d(2, 1, 7, bias=False) shape: (1, 2, 7, 7)).
    fan_in = 2 * KSIZE * KSIZE
    w = jax.random.normal(kw, (1, 2, KSIZE, KSIZE), dtype=jnp.float32) / jnp.sqrt(
        jnp.float32(fan_in))

    out = jax.block_until_ready(spatial_attention(x, w))

    ref = spatial_attention_reference(x, w)
    assert out.shape == (N, 1, H, W), out.shape
    assert jnp.allclose(out, ref, atol=1e-5, rtol=1e-5), (
        float(jnp.max(jnp.abs(out - ref))))

    print("KERNEL_OK")
</pallas_src>

<mosaic_0001>
module attributes {stable_mosaic.version = 11 : i64} {
  func.func @spatial_attention_kernel(%arg0: i32, %arg1: memref<98xf32, #tpu.memory_space<smem>>, %arg2: memref<1x4x256xf32, #tpu.memory_space<vmem>>, %arg3: memref<1x1x256xf32, #tpu.memory_space<vmem>>) attributes {dimension_semantics = [#tpu.dimension_semantics<parallel>], iteration_bounds = array<i64: 2>, scalar_prefetch = 0 : i64, scratch_operands = 0 : i64, tpu.core_type = #tpu.core_type<tc>, window_params = [{transform_indices = @transform_0, window_bounds = array<i64: 98>}, {transform_indices = @transform_1, window_bounds = array<i64: 1, 4, 256>}, {transform_indices = @transform_2, window_bounds = array<i64: 1, 1, 256>}]} {
    %c0 = arith.constant 0 : index
    %c0_0 = arith.constant 0 : index
    %c0_1 = arith.constant 0 : index
    %0 = vector.load %arg2[%c0, %c0_0, %c0_1] : memref<1x4x256xf32, #tpu.memory_space<vmem>>, vector<1x1x256xf32>
    %1 = vector.shape_cast %0 : vector<1x1x256xf32> to vector<1x256xf32>
    %c0_2 = arith.constant 0 : index
    %c1 = arith.constant 1 : index
    %c0_3 = arith.constant 0 : index
    %2 = vector.load %arg2[%c0_2, %c1, %c0_3] : memref<1x4x256xf32, #tpu.memory_space<vmem>>, vector<1x1x256xf32>
    %3 = vector.shape_cast %2 : vector<1x1x256xf32> to vector<1x256xf32>
    %c0_4 = arith.constant 0 : index
    %c2 = arith.constant 2 : index
    %c0_5 = arith.constant 0 : index
    %4 = vector.load %arg2[%c0_4, %c2, %c0_5] : memref<1x4x256xf32, #tpu.memory_space<vmem>>, vector<1x1x256xf32>
    %5 = vector.shape_cast %4 : vector<1x1x256xf32> to vector<1x256xf32>
    %6 = arith.addf %1, %5 : vector<1x256xf32>
    %7 = arith.maximumf %1, %5 : vector<1x256xf32>
    %c0_6 = arith.constant 0 : index
    %c3 = arith.constant 3 : index
    %c0_7 = arith.constant 0 : index
    %8 = vector.load %arg2[%c0_6, %c3, %c0_7] : memref<1x4x256xf32, #tpu.memory_space<vmem>>, vector<1x1x256xf32>
    %9 = vector.shape_cast %8 : vector<1x1x256xf32> to vector<1x256xf32>
    %10 = arith.addf %3, %9 : vector<1x256xf32>
    %11 = arith.maximumf %3, %9 : vector<1x256xf32>
    %12 = arith.addf %6, %10 : vector<1x256xf32>
    %13 = arith.maximumf %7, %11 : vector<1x256xf32>
    %cst = arith.constant 2.500000e-01 : f32
    %14 = vector.broadcast %cst : f32 to vector<1x256xf32>
    %15 = arith.mulf %12, %14 : vector<1x256xf32>
    %cst_8 = arith.constant 0.000000e+00 : f32
    %16 = vector.broadcast %cst_8 : f32 to vector<1x128xf32>
    %17 = tpu.iota {dimensions = array<i32: 1>} : vector<1x256xi32>
    %c15_i32 = arith.constant 15 : i32
    %18 = vector.broadcast %c15_i32 : i32 to vector<1x256xi32>
    %19 = arith.andi %17, %18 : vector<1x256xi32>
    %20 = tpu.concatenate %16, %15, %16 in 1 : vector<1x128xf32>, vector<1x256xf32>, vector<1x128xf32> -> vector<1x512xf32>
    %cst_9 = arith.constant 0.000000e+00 : f32
    %21 = vector.broadcast %cst_9 : f32 to vector<1x256xf32>
    %c-3_i32 = arith.constant -3 : i32
    %22 = vector.broadcast %c-3_i32 : i32 to vector<1x256xi32>
    %23 = arith.addi %19, %22 : vector<1x256xi32>
    %c0_i32 = arith.constant 0 : i32
    %24 = vector.broadcast %c0_i32 : i32 to vector<1x256xi32>
    %25 = arith.cmpi sge, %23, %24 : vector<1x256xi32>
    %c-3_i32_10 = arith.constant -3 : i32
    %26 = vector.broadcast %c-3_i32_10 : i32 to vector<1x256xi32>
    %27 = arith.addi %19, %26 : vector<1x256xi32>
    %c16_i32 = arith.constant 16 : i32
    %28 = vector.broadcast %c16_i32 : i32 to vector<1x256xi32>
    %29 = arith.cmpi slt, %27, %28 : vector<1x256xi32>
    %30 = arith.andi %25, %29 : vector<1x256xi1>
    %c0_11 = arith.constant 0 : index
    %31 = memref.load %arg1[%c0_11] : memref<98xf32, #tpu.memory_space<smem>>
    %32 = vector.extract_strided_slice %20 {offsets = [0, 77], sizes = [1, 256], strides = [1, 1]} : vector<1x512xf32> to vector<1x256xf32>
    %33 = vector.broadcast %31 : f32 to vector<1x256xf32>
    %34 = arith.mulf %32, %33 : vector<1x256xf32>
    %c7 = arith.constant 7 : index
    %35 = memref.load %arg1[%c7] : memref<98xf32, #tpu.memory_space<smem>>
    %36 = vector.extract_strided_slice %20 {offsets = [0, 93], sizes = [1, 256], strides = [1, 1]} : vector<1x512xf32> to vector<1x256xf32>
    %37 = vector.broadcast %35 : f32 to vector<1x256xf32>
    %38 = arith.mulf %36, %37 : vector<1x256xf32>
    %39 = arith.addf %34, %38 : vector<1x256xf32>
    %c14 = arith.constant 14 : index
    %40 = memref.load %arg1[%c14] : memref<98xf32, #tpu.memory_space<smem>>
    %41 = vector.extract_strided_slice %20 {offsets = [0, 109], sizes = [1, 256], strides = [1, 1]} : vector<1x512xf32> to vector<1x256xf32>
    %42 = vector.broadcast %40 : f32 to vector<1x256xf32>
    %43 = arith.mulf %41, %42 : vector<1x256xf32>
    %44 = arith.addf %39, %43 : vector<1x256xf32>
    %c21 = arith.constant 21 : index
    %45 = memref.load %arg1[%c21] : memref<98xf32, #tpu.memory_space<smem>>
    %46 = vector.extract_strided_slice %20 {offsets = [0, 125], sizes = [1, 256], strides = [1, 1]} : vector<1x512xf32> to vector<1x256xf32>
    %47 = vector.broadcast %45 : f32 to vector<1x256xf32>
    %48 = arith.mulf %46, %47 : vector<1x256xf32>
    %49 = arith.addf %44, %48 : vector<1x256xf32>
    %c28 = arith.constant 28 : index
    %50 = memref.load %arg1[%c28] : memref<98xf32, #tpu.memory_space<smem>>
    %51 = vector.extract_strided_slice %20 {offsets = [0, 141], sizes = [1, 256], strides = [1, 1]} : vector<1x512xf32> to vector<1x256xf32>
    %52 = vector.broadcast %50 : f32 to vector<1x256xf32>
    %53 = arith.mulf %51, %52 : vector<1x256xf32>
    %54 = arith.addf %49, %53 : vector<1x256xf32>
    %c35 = arith.constant 35 : index
    %55 = memref.load %arg1[%c35] : memref<98xf32, #tpu.memory_space<smem>>
    %56 = vector.extract_strided_slice %20 {offsets = [0, 157], sizes = [1, 256], strides = [1, 1]} : vector<1x512xf32> to vector<1x256xf32>
    %57 = vector.broadcast %55 : f32 to vector<1x256xf32>
    %58 = arith.mulf %56, %57 : vector<1x256xf32>
    %59 = arith.addf %54, %58 : vector<1x256xf32>
    %c42 = arith.constant 42 : index
    %60 = memref.load %arg1[%c42] : memref<98xf32, #tpu.memory_space<smem>>
    %61 = vector.extract_strided_slice %20 {offsets = [0, 173], sizes = [1, 256], strides = [1, 1]} : vector<1x512xf32> to vector<1x256xf32>
    %62 = vector.broadcast %60 : f32 to vector<1x256xf32>
    %63 = arith.mulf %61, %62 : vector<1x256xf32>
    %64 = arith.addf %59, %63 : vector<1x256xf32>
    %cst_12 = arith.constant 0.000000e+00 : f32
    %65 = vector.broadcast %cst_12 : f32 to vector<1x256xf32>
    %66 = arith.select %30, %64, %65 : vector<1x256xi1>, vector<1x256xf32>
    %67 = arith.addf %21, %66 : vector<1x256xf32>
    %c-2_i32 = arith.constant -2 : i32
    %68 = vector.broadcast %c-2_i32 : i32 to vector<1x256xi32>
    %69 = arith.addi %19, %68 : vector<1x256xi32>
    %c0_i32_13 = arith.constant 0 : i32
    %70 = vector.broadcast %c0_i32_13 : i32 to vector<1x256xi32>
    %71 = arith.cmpi sge, %69, %70 : vector<1x256xi32>
    %c-2_i32_14 = arith.constant -2 : i32
    %72 = vector.broadcast %c-2_i32_14 : i32 to vector<1x256xi32>
    %73 = arith.addi %19, %72 : vector<1x256xi32>
    %c16_i32_15 = arith.constant 16 : i32
    %74 = vector.broadcast %c16_i32_15 : i32 to vector<1x256xi32>
    %75 = arith.cmpi slt, %73, %74 : vector<1x256xi32>
    %76 = arith.andi %71, %75 : vector<1x256xi1>
    %c1_16 = arith.constant 1 : index
    %77 = memref.load %arg1[%c1_16] : memref<98xf32, #tpu.memory_space<smem>>
    %78 = vector.extract_strided_slice %20 {offsets = [0, 78], sizes = [1, 256], strides = [1, 1]} : vector<1x512xf32> to vector<1x256xf32>
    %79 = vector.broadcast %77 : f32 to vector<1x256xf32>
    %80 = arith.mulf %78, %79 : vector<1x256xf32>
    %c8 = arith.constant 8 : index
    %81 = memref.load %arg1[%c8] : memref<98xf32, #tpu.memory_space<smem>>
    %82 = vector.extract_strided_slice %20 {offsets = [0, 94], sizes = [1, 256], strides = [1, 1]} : vector<1x512xf32> to vector<1x256xf32>
    %83 = vector.broadcast %81 : f32 to vector<1x256xf32>
    %84 = arith.mulf %82, %83 : vector<1x256xf32>
    %85 = arith.addf %80, %84 : vector<1x256xf32>
    %c15 = arith.constant 15 : index
    %86 = memref.load %arg1[%c15] : memref<98xf32, #tpu.memory_space<smem>>
    %87 = vector.extract_strided_slice %20 {offsets = [0, 110], sizes = [1, 256], strides = [1, 1]} : vector<1x512xf32> to vector<1x256xf32>
    %88 = vector.broadcast %86 : f32 to vector<1x256xf32>
    %89 = arith.mulf %87, %88 : vector<1x256xf32>
    %90 = arith.addf %85, %89 : vector<1x256xf32>
    %c22 = arith.constant 22 : index
    %91 = memref.load %arg1[%c22] : memref<98xf32, #tpu.memory_space<smem>>
    %92 = vector.extract_strided_slice %20 {offsets = [0, 126], sizes = [1, 256], strides = [1, 1]} : vector<1x512xf32> to vector<1x256xf32>
    %93 = vector.broadcast %91 : f32 to vector<1x256xf32>
    %94 = arith.mulf %92, %93 : vector<1x256xf32>
    %95 = arith.addf %90, %94 : vector<1x256xf32>
    %c29 = arith.constant 29 : index
    %96 = memref.load %arg1[%c29] : memref<98xf32, #tpu.memory_space<smem>>
    %97 = vector.extract_strided_slice %20 {offsets = [0, 142], sizes = [1, 256], strides = [1, 1]} : vector<1x512xf32> to vector<1x256xf32>
    %98 = vector.broadcast %96 : f32 to vector<1x256xf32>
    %99 = arith.mulf %97, %98 : vector<1x256xf32>
    %100 = arith.addf %95, %99 : vector<1x256xf32>
    %c36 = arith.constant 36 : index
    %101 = memref.load %arg1[%c36] : memref<98xf32, #tpu.memory_space<smem>>
    %102 = vector.extract_strided_slice %20 {offsets = [0, 158], sizes = [1, 256], strides = [1, 1]} : vector<1x512xf32> to vector<1x256xf32>
    %103 = vector.broadcast %101 : f32 to vector<1x256xf32>
    %104 = arith.mulf %102, %103 : vector<1x256xf32>
    %105 = arith.addf %100, %104 : vector<1x256xf32>
    %c43 = arith.constant 43 : index
    %106 = memref.load %arg1[%c43] : memref<98xf32, #tpu.memory_space<smem>>
    %107 = vector.extract_strided_slice %20 {offsets = [0, 174], sizes = [1, 256], strides = [1, 1]} : vector<1x512xf32> to vector<1x256xf32>
    %108 = vector.broadcast %106 : f32 to vector<1x256xf32>
    %109 = arith.mulf %107, %108 : vector<1x256xf32>
    %110 = arith.addf %105, %109 : vector<1x256xf32>
    %cst_17 = arith.constant 0.000000e+00 : f32
    %111 = vector.broadcast %cst_17 : f32 to vector<1x256xf32>
    %112 = arith.select %76, %110, %111 : vector<1x256xi1>, vector<1x256xf32>
    %113 = arith.addf %67, %112 : vector<1x256xf32>
    %c-1_i32 = arith.constant -1 : i32
    %114 = vector.broadcast %c-1_i32 : i32 to vector<1x256xi32>
    %115 = arith.addi %19, %114 : vector<1x256xi32>
    %c0_i32_18 = arith.constant 0 : i32
    %116 = vector.broadcast %c0_i32_18 : i32 to vector<1x256xi32>
    %117 = arith.cmpi sge, %115, %116 : vector<1x256xi32>
    %c-1_i32_19 = arith.constant -1 : i32
    %118 = vector.broadcast %c-1_i32_19 : i32 to vector<1x256xi32>
    %119 = arith.addi %19, %118 : vector<1x256xi32>
    %c16_i32_20 = arith.constant 16 : i32
    %120 = vector.broadcast %c16_i32_20 : i32 to vector<1x256xi32>
    %121 = arith.cmpi slt, %119, %120 : vector<1x256xi32>
    %122 = arith.andi %117, %121 : vector<1x256xi1>
    %c2_21 = arith.constant 2 : index
    %123 = memref.load %arg1[%c2_21] : memref<98xf32, #tpu.memory_space<smem>>
    %124 = vector.extract_strided_slice %20 {offsets = [0, 79], sizes = [1, 256], strides = [1, 1]} : vector<1x512xf32> to vector<1x256xf32>
    %125 = vector.broadcast %123 : f32 to vector<1x256xf32>
    %126 = arith.mulf %124, %125 : vector<1x256xf32>
    %c9 = arith.constant 9 : index
    %127 = memref.load %arg1[%c9] : memref<98xf32, #tpu.memory_space<smem>>
    %128 = vector.extract_strided_slice %20 {offsets = [0, 95], sizes = [1, 256], strides = [1, 1]} : vector<1x512xf32> to vector<1x256xf32>
    %129 = vector.broadcast %127 : f32 to vector<1x256xf32>
    %130 = arith.mulf %128, %129 : vector<1x256xf32>
    %131 = arith.addf %126, %130 : vector<1x256xf32>
    %c16 = arith.constant 16 : index
    %132 = memref.load %arg1[%c16] : memref<98xf32, #tpu.memory_space<smem>>
    %133 = vector.extract_strided_slice %20 {offsets = [0, 111], sizes = [1, 256], strides = [1, 1]} : vector<1x512xf32> to vector<1x256xf32>
    %134 = vector.broadcast %132 : f32 to vector<1x256xf32>
    %135 = arith.mulf %133, %134 : vector<1x256xf32>
    %136 = arith.addf %131, %135 : vector<1x256xf32>
    %c23 = arith.constant 23 : index
    %137 = memref.load %arg1[%c23] : memref<98xf32, #tpu.memory_space<smem>>
    %138 = vector.extract_strided_slice %20 {offsets = [0, 127], sizes = [1, 256], strides = [1, 1]} : vector<1x512xf32> to vector<1x256xf32>
    %139 = vector.broadcast %137 : f32 to vector<1x256xf32>
    %140 = arith.mulf %138, %139 : vector<1x256xf32>
    %141 = arith.addf %136, %140 : vector<1x256xf32>
    %c30 = arith.constant 30 : index
    %142 = memref.load %arg1[%c30] : memref<98xf32, #tpu.memory_space<smem>>
    %143 = vector.extract_strided_slice %20 {offsets = [0, 143], sizes = [1, 256], strides = [1, 1]} : vector<1x512xf32> to vector<1x256xf32>
    %144 = vector.broadcast %142 : f32 to vector<1x256xf32>
    %145 = arith.mulf %143, %144 : vector<1x256xf32>
    %146 = arith.addf %141, %145 : vector<1x256xf32>
    %c37 = arith.constant 37 : index
    %147 = memref.load %arg1[%c37] : memref<98xf32, #tpu.memory_space<smem>>
    %148 = vector.extract_strided_slice %20 {offsets = [0, 159], sizes = [1, 256], strides = [1, 1]} : vector<1x512xf32> to vector<1x256xf32>
    %149 = vector.broadcast %147 : f32 to vector<1x256xf32>
    %150 = arith.mulf %148, %149 : vector<1x256xf32>
    %151 = arith.addf %146, %150 : vector<1x256xf32>
    %c44 = arith.constant 44 : index
    %152 = memref.load %arg1[%c44] : memref<98xf32, #tpu.memory_space<smem>>
    %153 = vector.extract_strided_slice %20 {offsets = [0, 175], sizes = [1, 256], strides = [1, 1]} : vector<1x512xf32> to vector<1x256xf32>
    %154 = vector.broadcast %152 : f32 to vector<1x256xf32>
    %155 = arith.mulf %153, %154 : vector<1x256xf32>
    %156 = arith.addf %151, %155 : vector<1x256xf32>
    %cst_22 = arith.constant 0.000000e+00 : f32
    %157 = vector.broadcast %cst_22 : f32 to vector<1x256xf32>
    %158 = arith.select %122, %156, %157 : vector<1x256xi1>, vector<1x256xf32>
    %159 = arith.addf %113, %158 : vector<1x256xf32>
    %c0_i32_23 = arith.constant 0 : i32
    %160 = vector.broadcast %c0_i32_23 : i32 to vector<1x256xi32>
    %161 = arith.addi %19, %160 : vector<1x256xi32>
    %c0_i32_24 = arith.constant 0 : i32
    %162 = vector.broadcast %c0_i32_24 : i32 to vector<1x256xi32>
    %163 = arith.cmpi sge, %161, %162 : vector<1x256xi32>
    %c0_i32_25 = arith.constant 0 : i32
    %164 = vector.broadcast %c0_i32_25 : i32 to vector<1x256xi32>
    %165 = arith.addi %19, %164 : vector<1x256xi32>
    %c16_i32_26 = arith.constant 16 : i32
    %166 = vector.broadcast %c16_i32_26 : i32 to vector<1x256xi32>
    %167 = arith.cmpi slt, %165, %166 : vector<1x256xi32>
    %168 = arith.andi %163, %167 : vector<1x256xi1>
    %c3_27 = arith.constant 3 : index
    %169 = memref.load %arg1[%c3_27] : memref<98xf32, #tpu.memory_space<smem>>
    %170 = vector.extract_strided_slice %20 {offsets = [0, 80], sizes = [1, 256], strides = [1, 1]} : vector<1x512xf32> to vector<1x256xf32>
    %171 = vector.broadcast %169 : f32 to vector<1x256xf32>
    %172 = arith.mulf %170, %171 : vector<1x256xf32>
    %c10 = arith.constant 10 : index
    %173 = memref.load %arg1[%c10] : memref<98xf32, #tpu.memory_space<smem>>
    %174 = vector.extract_strided_slice %20 {offsets = [0, 96], sizes = [1, 256], strides = [1, 1]} : vector<1x512xf32> to vector<1x256xf32>
    %175 = vector.broadcast %173 : f32 to vector<1x256xf32>
    %176 = arith.mulf %174, %175 : vector<1x256xf32>
    %177 = arith.addf %172, %176 : vector<1x256xf32>
    %c17 = arith.constant 17 : index
    %178 = memref.load %arg1[%c17] : memref<98xf32, #tpu.memory_space<smem>>
    %179 = vector.extract_strided_slice %20 {offsets = [0, 112], sizes = [1, 256], strides = [1, 1]} : vector<1x512xf32> to vector<1x256xf32>
    %180 = vector.broadcast %178 : f32 to vector<1x256xf32>
    %181 = arith.mulf %179, %180 : vector<1x256xf32>
    %182 = arith.addf %177, %181 : vector<1x256xf32>
    %c24 = arith.constant 24 : index
    %183 = memref.load %arg1[%c24] : memref<98xf32, #tpu.memory_space<smem>>
    %184 = vector.extract_strided_slice %20 {offsets = [0, 128], sizes = [1, 256], strides = [1, 1]} : vector<1x512xf32> to vector<1x256xf32>
    %185 = vector.broadcast %183 : f32 to vector<1x256xf32>
    %186 = arith.mulf %184, %185 : vector<1x256xf32>
    %187 = arith.addf %182, %186 : vector<1x256xf32>
    %c31 = arith.constant 31 : index
    %188 = memref.load %arg1[%c31] : memref<98xf32, #tpu.memory_space<smem>>
    %189 = vector.extract_strided_slice %20 {offsets = [0, 144], sizes = [1, 256], strides = [1, 1]} : vector<1x512xf32> to vector<1x256xf32>
    %190 = vector.broadcast %188 : f32 to vector<1x256xf32>
    %191 = arith.mulf %189, %190 : vector<1x256xf32>
    %192 = arith.addf %187, %191 : vector<1x256xf32>
    %c38 = arith.constant 38 : index
    %193 = memref.load %arg1[%c38] : memref<98xf32, #tpu.memory_space<smem>>
    %194 = vector.extract_strided_slice %20 {offsets = [0, 160], sizes = [1, 256], strides = [1, 1]} : vector<1x512xf32> to vector<1x256xf32>
    %195 = vector.broadcast %193 : f32 to vector<1x256xf32>
    %196 = arith.mulf %194, %195 : vector<1x256xf32>
    %197 = arith.addf %192, %196 : vector<1x256xf32>
    %c45 = arith.constant 45 : index
    %198 = memref.load %arg1[%c45] : memref<98xf32, #tpu.memory_space<smem>>
    %199 = vector.extract_strided_slice %20 {offsets = [0, 176], sizes = [1, 256], strides = [1, 1]} : vector<1x512xf32> to vector<1x256xf32>
    %200 = vector.broadcast %198 : f32 to vector<1x256xf32>
    %201 = arith.mulf %199, %200 : vector<1x256xf32>
    %202 = arith.addf %197, %201 : vector<1x256xf32>
    %cst_28 = arith.constant 0.000000e+00 : f32
    %203 = vector.broadcast %cst_28 : f32 to vector<1x256xf32>
    %204 = arith.select %168, %202, %203 : vector<1x256xi1>, vector<1x256xf32>
    %205 = arith.addf %159, %204 : vector<1x256xf32>
    %c1_i32 = arith.constant 1 : i32
    %206 = vector.broadcast %c1_i32 : i32 to vector<1x256xi32>
    %207 = arith.addi %19, %206 : vector<1x256xi32>
    %c0_i32_29 = arith.constant 0 : i32
    %208 = vector.broadcast %c0_i32_29 : i32 to vector<1x256xi32>
    %209 = arith.cmpi sge, %207, %208 : vector<1x256xi32>
    %c1_i32_30 = arith.constant 1 : i32
    %210 = vector.broadcast %c1_i32_30 : i32 to vector<1x256xi32>
    %211 = arith.addi %19, %210 : vector<1x256xi32>
    %c16_i32_31 = arith.constant 16 : i32
    %212 = vector.broadcast %c16_i32_31 : i32 to vector<1x256xi32>
    %213 = arith.cmpi slt, %211, %212 : vector<1x256xi32>
    %214 = arith.andi %209, %213 : vector<1x256xi1>
    %c4 = arith.constant 4 : index
    %215 = memref.load %arg1[%c4] : memref<98xf32, #tpu.memory_space<smem>>
    %216 = vector.extract_strided_slice %20 {offsets = [0, 81], sizes = [1, 256], strides = [1, 1]} : vector<1x512xf32> to vector<1x256xf32>
    %217 = vector.broadcast %215 : f32 to vector<1x256xf32>
    %218 = arith.mulf %216, %217 : vector<1x256xf32>
    %c11 = arith.constant 11 : index
    %219 = memref.load %arg1[%c11] : memref<98xf32, #tpu.memory_space<smem>>
    %220 = vector.extract_strided_slice %20 {offsets = [0, 97], sizes = [1, 256], strides = [1, 1]} : vector<1x512xf32> to vector<1x256xf32>
    %221 = vector.broadcast %219 : f32 to vector<1x256xf32>
    %222 = arith.mulf %220, %221 : vector<1x256xf32>
    %223 = arith.addf %218, %222 : vector<1x256xf32>
    %c18 = arith.constant 18 : index
    %224 = memref.load %arg1[%c18] : memref<98xf32, #tpu.memory_space<smem>>
    %225 = vector.extract_strided_slice %20 {offsets = [0, 113], sizes = [1, 256], strides = [1, 1]} : vector<1x512xf32> to vector<1x256xf32>
    %226 = vector.broadcast %224 : f32 to vector<1x256xf32>
    %227 = arith.mulf %225, %226 : vector<1x256xf32>
    %228 = arith.addf %223, %227 : vector<1x256xf32>
    %c25 = arith.constant 25 : index
    %229 = memref.load %arg1[%c25] : memref<98xf32, #tpu.memory_space<smem>>
    %230 = vector.extract_strided_slice %20 {offsets = [0, 129], sizes = [1, 256], strides = [1, 1]} : vector<1x512xf32> to vector<1x256xf32>
    %231 = vector.broadcast %229 : f32 to vector<1x256xf32>
    %232 = arith.mulf %230, %231 : vector<1x256xf32>
    %233 = arith.addf %228, %232 : vector<1x256xf32>
    %c32 = arith.constant 32 : index
    %234 = memref.load %arg1[%c32] : memref<98xf32, #tpu.memory_space<smem>>
    %235 = vector.extract_strided_slice %20 {offsets = [0, 145], sizes = [1, 256], strides = [1, 1]} : vector<1x512xf32> to vector<1x256xf32>
    %236 = vector.broadcast %234 : f32 to vector<1x256xf32>
    %237 = arith.mulf %235, %236 : vector<1x256xf32>
    %238 = arith.addf %233, %237 : vector<1x256xf32>
    %c39 = arith.constant 39 : index
    %239 = memref.load %arg1[%c39] : memref<98xf32, #tpu.memory_space<smem>>
    %240 = vector.extract_strided_slice %20 {offsets = [0, 161], sizes = [1, 256], strides = [1, 1]} : vector<1x512xf32> to vector<1x256xf32>
    %241 = vector.broadcast %239 : f32 to vector<1x256xf32>
    %242 = arith.mulf %240, %241 : vector<1x256xf32>
    %243 = arith.addf %238, %242 : vector<1x256xf32>
    %c46 = arith.constant 46 : index
    %244 = memref.load %arg1[%c46] : memref<98xf32, #tpu.memory_space<smem>>
    %245 = vector.extract_strided_slice %20 {offsets = [0, 177], sizes = [1, 256], strides = [1, 1]} : vector<1x512xf32> to vector<1x256xf32>
    %246 = vector.broadcast %244 : f32 to vector<1x256xf32>
    %247 = arith.mulf %245, %246 : vector<1x256xf32>
    %248 = arith.addf %243, %247 : vector<1x256xf32>
    %cst_32 = arith.constant 0.000000e+00 : f32
    %249 = vector.broadcast %cst_32 : f32 to vector<1x256xf32>
    %250 = arith.select %214, %248, %249 : vector<1x256xi1>, vector<1x256xf32>
    %251 = arith.addf %205, %250 : vector<1x256xf32>
    %c2_i32 = arith.constant 2 : i32
    %252 = vector.broadcast %c2_i32 : i32 to vector<1x256xi32>
    %253 = arith.addi %19, %252 : vector<1x256xi32>
    %c0_i32_33 = arith.constant 0 : i32
    %254 = vector.broadcast %c0_i32_33 : i32 to vector<1x256xi32>
    %255 = arith.cmpi sge, %253, %254 : vector<1x256xi32>
    %c2_i32_34 = arith.constant 2 : i32
    %256 = vector.broadcast %c2_i32_34 : i32 to vector<1x256xi32>
    %257 = arith.addi %19, %256 : vector<1x256xi32>
    %c16_i32_35 = arith.constant 16 : i32
    %258 = vector.broadcast %c16_i32_35 : i32 to vector<1x256xi32>
    %259 = arith.cmpi slt, %257, %258 : vector<1x256xi32>
    %260 = arith.andi %255, %259 : vector<1x256xi1>
    %c5 = arith.constant 5 : index
    %261 = memref.load %arg1[%c5] : memref<98xf32, #tpu.memory_space<smem>>
    %262 = vector.extract_strided_slice %20 {offsets = [0, 82], sizes = [1, 256], strides = [1, 1]} : vector<1x512xf32> to vector<1x256xf32>
    %263 = vector.broadcast %261 : f32 to vector<1x256xf32>
    %264 = arith.mulf %262, %263 : vector<1x256xf32>
    %c12 = arith.constant 12 : index
    %265 = memref.load %arg1[%c12] : memref<98xf32, #tpu.memory_space<smem>>
    %266 = vector.extract_strided_slice %20 {offsets = [0, 98], sizes = [1, 256], strides = [1, 1]} : vector<1x512xf32> to vector<1x256xf32>
    %267 = vector.broadcast %265 : f32 to vector<1x256xf32>
    %268 = arith.mulf %266, %267 : vector<1x256xf32>
    %269 = arith.addf %264, %268 : vector<1x256xf32>
    %c19 = arith.constant 19 : index
    %270 = memref.load %arg1[%c19] : memref<98xf32, #tpu.memory_space<smem>>
    %271 = vector.extract_strided_slice %20 {offsets = [0, 114], sizes = [1, 256], strides = [1, 1]} : vector<1x512xf32> to vector<1x256xf32>
    %272 = vector.broadcast %270 : f32 to vector<1x256xf32>
    %273 = arith.mulf %271, %272 : vector<1x256xf32>
    %274 = arith.addf %269, %273 : vector<1x256xf32>
    %c26 = arith.constant 26 : index
    %275 = memref.load %arg1[%c26] : memref<98xf32, #tpu.memory_space<smem>>
    %276 = vector.extract_strided_slice %20 {offsets = [0, 130], sizes = [1, 256], strides = [1, 1]} : vector<1x512xf32> to vector<1x256xf32>
    %277 = vector.broadcast %275 : f32 to vector<1x256xf32>
    %278 = arith.mulf %276, %277 : vector<1x256xf32>
    %279 = arith.addf %274, %278 : vector<1x256xf32>
    %c33 = arith.constant 33 : index
    %280 = memref.load %arg1[%c33] : memref<98xf32, #tpu.memory_space<smem>>
    %281 = vector.extract_strided_slice %20 {offsets = [0, 146], sizes = [1, 256], strides = [1, 1]} : vector<1x512xf32> to vector<1x256xf32>
    %282 = vector.broadcast %280 : f32 to vector<1x256xf32>
    %283 = arith.mulf %281, %282 : vector<1x256xf32>
    %284 = arith.addf %279, %283 : vector<1x256xf32>
    %c40 = arith.constant 40 : index
    %285 = memref.load %arg1[%c40] : memref<98xf32, #tpu.memory_space<smem>>
    %286 = vector.extract_strided_slice %20 {offsets = [0, 162], sizes = [1, 256], strides = [1, 1]} : vector<1x512xf32> to vector<1x256xf32>
    %287 = vector.broadcast %285 : f32 to vector<1x256xf32>
    %288 = arith.mulf %286, %287 : vector<1x256xf32>
    %289 = arith.addf %284, %288 : vector<1x256xf32>
    %c47 = arith.constant 47 : index
    %290 = memref.load %arg1[%c47] : memref<98xf32, #tpu.memory_space<smem>>
    %291 = vector.extract_strided_slice %20 {offsets = [0, 178], sizes = [1, 256], strides = [1, 1]} : vector<1x512xf32> to vector<1x256xf32>
    %292 = vector.broadcast %290 : f32 to vector<1x256xf32>
    %293 = arith.mulf %291, %292 : vector<1x256xf32>
    %294 = arith.addf %289, %293 : vector<1x256xf32>
    %cst_36 = arith.constant 0.000000e+00 : f32
    %295 = vector.broadcast %cst_36 : f32 to vector<1x256xf32>
    %296 = arith.select %260, %294, %295 : vector<1x256xi1>, vector<1x256xf32>
    %297 = arith.addf %251, %296 : vector<1x256xf32>
    %c3_i32 = arith.constant 3 : i32
    %298 = vector.broadcast %c3_i32 : i32 to vector<1x256xi32>
    %299 = arith.addi %19, %298 : vector<1x256xi32>
    %c0_i32_37 = arith.constant 0 : i32
    %300 = vector.broadcast %c0_i32_37 : i32 to vector<1x256xi32>
    %301 = arith.cmpi sge, %299, %300 : vector<1x256xi32>
    %c3_i32_38 = arith.constant 3 : i32
    %302 = vector.broadcast %c3_i32_38 : i32 to vector<1x256xi32>
    %303 = arith.addi %19, %302 : vector<1x256xi32>
    %c16_i32_39 = arith.constant 16 : i32
    %304 = vector.broadcast %c16_i32_39 : i32 to vector<1x256xi32>
    %305 = arith.cmpi slt, %303, %304 : vector<1x256xi32>
    %306 = arith.andi %301, %305 : vector<1x256xi1>
    %c6 = arith.constant 6 : index
    %307 = memref.load %arg1[%c6] : memref<98xf32, #tpu.memory_space<smem>>
    %308 = vector.extract_strided_slice %20 {offsets = [0, 83], sizes = [1, 256], strides = [1, 1]} : vector<1x512xf32> to vector<1x256xf32>
    %309 = vector.broadcast %307 : f32 to vector<1x256xf32>
    %310 = arith.mulf %308, %309 : vector<1x256xf32>
    %c13 = arith.constant 13 : index
    %311 = memref.load %arg1[%c13] : memref<98xf32, #tpu.memory_space<smem>>
    %312 = vector.extract_strided_slice %20 {offsets = [0, 99], sizes = [1, 256], strides = [1, 1]} : vector<1x512xf32> to vector<1x256xf32>
    %313 = vector.broadcast %311 : f32 to vector<1x256xf32>
    %314 = arith.mulf %312, %313 : vector<1x256xf32>
    %315 = arith.addf %310, %314 : vector<1x256xf32>
    %c20 = arith.constant 20 : index
    %316 = memref.load %arg1[%c20] : memref<98xf32, #tpu.memory_space<smem>>
    %317 = vector.extract_strided_slice %20 {offsets = [0, 115], sizes = [1, 256], strides = [1, 1]} : vector<1x512xf32> to vector<1x256xf32>
    %318 = vector.broadcast %316 : f32 to vector<1x256xf32>
    %319 = arith.mulf %317, %318 : vector<1x256xf32>
    %320 = arith.addf %315, %319 : vector<1x256xf32>
    %c27 = arith.constant 27 : index
    %321 = memref.load %arg1[%c27] : memref<98xf32, #tpu.memory_space<smem>>
    %322 = vector.extract_strided_slice %20 {offsets = [0, 131], sizes = [1, 256], strides = [1, 1]} : vector<1x512xf32> to vector<1x256xf32>
    %323 = vector.broadcast %321 : f32 to vector<1x256xf32>
    %324 = arith.mulf %322, %323 : vector<1x256xf32>
    %325 = arith.addf %320, %324 : vector<1x256xf32>
    %c34 = arith.constant 34 : index
    %326 = memref.load %arg1[%c34] : memref<98xf32, #tpu.memory_space<smem>>
    %327 = vector.extract_strided_slice %20 {offsets = [0, 147], sizes = [1, 256], strides = [1, 1]} : vector<1x512xf32> to vector<1x256xf32>
    %328 = vector.broadcast %326 : f32 to vector<1x256xf32>
    %329 = arith.mulf %327, %328 : vector<1x256xf32>
    %330 = arith.addf %325, %329 : vector<1x256xf32>
    %c41 = arith.constant 41 : index
    %331 = memref.load %arg1[%c41] : memref<98xf32, #tpu.memory_space<smem>>
    %332 = vector.extract_strided_slice %20 {offsets = [0, 163], sizes = [1, 256], strides = [1, 1]} : vector<1x512xf32> to vector<1x256xf32>
    %333 = vector.broadcast %331 : f32 to vector<1x256xf32>
    %334 = arith.mulf %332, %333 : vector<1x256xf32>
    %335 = arith.addf %330, %334 : vector<1x256xf32>
    %c48 = arith.constant 48 : index
    %336 = memref.load %arg1[%c48] : memref<98xf32, #tpu.memory_space<smem>>
    %337 = vector.extract_strided_slice %20 {offsets = [0, 179], sizes = [1, 256], strides = [1, 1]} : vector<1x512xf32> to vector<1x256xf32>
    %338 = vector.broadcast %336 : f32 to vector<1x256xf32>
    %339 = arith.mulf %337, %338 : vector<1x256xf32>
    %340 = arith.addf %335, %339 : vector<1x256xf32>
    %cst_40 = arith.constant 0.000000e+00 : f32
    %341 = vector.broadcast %cst_40 : f32 to vector<1x256xf32>
    %342 = arith.select %306, %340, %341 : vector<1x256xi1>, vector<1x256xf32>
    %343 = arith.addf %297, %342 : vector<1x256xf32>
    %344 = tpu.concatenate %16, %13, %16 in 1 : vector<1x128xf32>, vector<1x256xf32>, vector<1x128xf32> -> vector<1x512xf32>
    %cst_41 = arith.constant 0.000000e+00 : f32
    %345 = vector.broadcast %cst_41 : f32 to vector<1x256xf32>
    %c-3_i32_42 = arith.constant -3 : i32
    %346 = vector.broadcast %c-3_i32_42 : i32 to vector<1x256xi32>
    %347 = arith.addi %19, %346 : vector<1x256xi32>
    %c0_i32_43 = arith.constant 0 : i32
    %348 = vector.broadcast %c0_i32_43 : i32 to vector<1x256xi32>
    %349 = arith.cmpi sge, %347, %348 : vector<1x256xi32>
    %c-3_i32_44 = arith.constant -3 : i32
    %350 = vector.broadcast %c-3_i32_44 : i32 to vector<1x256xi32>
    %351 = arith.addi %19, %350 : vector<1x256xi32>
    %c16_i32_45 = arith.constant 16 : i32
    %352 = vector.broadcast %c16_i32_45 : i32 to vector<1x256xi32>
    %353 = arith.cmpi slt, %351, %352 : vector<1x256xi32>
    %354 = arith.andi %349, %353 : vector<1x256xi1>
    %c49 = arith.constant 49 : index
    %355 = memref.load %arg1[%c49] : memref<98xf32, #tpu.memory_space<smem>>
    %356 = vector.extract_strided_slice %344 {offsets = [0, 77], sizes = [1, 256], strides = [1, 1]} : vector<1x512xf32> to vector<1x256xf32>
    %357 = vector.broadcast %355 : f32 to vector<1x256xf32>
    %358 = arith.mulf %356, %357 : vector<1x256xf32>
    %c56 = arith.constant 56 : index
    %359 = memref.load %arg1[%c56] : memref<98xf32, #tpu.memory_space<smem>>
    %360 = vector.extract_strided_slice %344 {offsets = [0, 93], sizes = [1, 256], strides = [1, 1]} : vector<1x512xf32> to vector<1x256xf32>
    %361 = vector.broadcast %359 : f32 to vector<1x256xf32>
    %362 = arith.mulf %360, %361 : vector<1x256xf32>
    %363 = arith.addf %358, %362 : vector<1x256xf32>
    %c63 = arith.constant 63 : index
    %364 = memref.load %arg1[%c63] : memref<98xf32, #tpu.memory_space<smem>>
    %365 = vector.extract_strided_slice %344 {offsets = [0, 109], sizes = [1, 256], strides = [1, 1]} : vector<1x512xf32> to vector<1x256xf32>
    %366 = vector.broadcast %364 : f32 to vector<1x256xf32>
    %367 = arith.mulf %365, %366 : vector<1x256xf32>
    %368 = arith.addf %363, %367 : vector<1x256xf32>
    %c70 = arith.constant 70 : index
    %369 = memref.load %arg1[%c70] : memref<98xf32, #tpu.memory_space<smem>>
    %370 = vector.extract_strided_slice %344 {offsets = [0, 125], sizes = [1, 256], strides = [1, 1]} : vector<1x512xf32> to vector<1x256xf32>
    %371 = vector.broadcast %369 : f32 to vector<1x256xf32>
    %372 = arith.mulf %370, %371 : vector<1x256xf32>
    %373 = arith.addf %368, %372 : vector<1x256xf32>
    %c77 = arith.constant 77 : index
    %374 = memref.load %arg1[%c77] : memref<98xf32, #tpu.memory_space<smem>>
    %375 = vector.extract_strided_slice %344 {offsets = [0, 141], sizes = [1, 256], strides = [1, 1]} : vector<1x512xf32> to vector<1x256xf32>
    %376 = vector.broadcast %374 : f32 to vector<1x256xf32>
    %377 = arith.mulf %375, %376 : vector<1x256xf32>
    %378 = arith.addf %373, %377 : vector<1x256xf32>
    %c84 = arith.constant 84 : index
    %379 = memref.load %arg1[%c84] : memref<98xf32, #tpu.memory_space<smem>>
    %380 = vector.extract_strided_slice %344 {offsets = [0, 157], sizes = [1, 256], strides = [1, 1]} : vector<1x512xf32> to vector<1x256xf32>
    %381 = vector.broadcast %379 : f32 to vector<1x256xf32>
    %382 = arith.mulf %380, %381 : vector<1x256xf32>
    %383 = arith.addf %378, %382 : vector<1x256xf32>
    %c91 = arith.constant 91 : index
    %384 = memref.load %arg1[%c91] : memref<98xf32, #tpu.memory_space<smem>>
    %385 = vector.extract_strided_slice %344 {offsets = [0, 173], sizes = [1, 256], strides = [1, 1]} : vector<1x512xf32> to vector<1x256xf32>
    %386 = vector.broadcast %384 : f32 to vector<1x256xf32>
    %387 = arith.mulf %385, %386 : vector<1x256xf32>
    %388 = arith.addf %383, %387 : vector<1x256xf32>
    %cst_46 = arith.constant 0.000000e+00 : f32
    %389 = vector.broadcast %cst_46 : f32 to vector<1x256xf32>
    %390 = arith.select %354, %388, %389 : vector<1x256xi1>, vector<1x256xf32>
    %391 = arith.addf %345, %390 : vector<1x256xf32>
    %c-2_i32_47 = arith.constant -2 : i32
    %392 = vector.broadcast %c-2_i32_47 : i32 to vector<1x256xi32>
    %393 = arith.addi %19, %392 : vector<1x256xi32>
    %c0_i32_48 = arith.constant 0 : i32
    %394 = vector.broadcast %c0_i32_48 : i32 to vector<1x256xi32>
    %395 = arith.cmpi sge, %393, %394 : vector<1x256xi32>
    %c-2_i32_49 = arith.constant -2 : i32
    %396 = vector.broadcast %c-2_i32_49 : i32 to vector<1x256xi32>
    %397 = arith.addi %19, %396 : vector<1x256xi32>
    %c16_i32_50 = arith.constant 16 : i32
    %398 = vector.broadcast %c16_i32_50 : i32 to vector<1x256xi32>
    %399 = arith.cmpi slt, %397, %398 : vector<1x256xi32>
    %400 = arith.andi %395, %399 : vector<1x256xi1>
    %c50 = arith.constant 50 : index
    %401 = memref.load %arg1[%c50] : memref<98xf32, #tpu.memory_space<smem>>
    %402 = vector.extract_strided_slice %344 {offsets = [0, 78], sizes = [1, 256], strides = [1, 1]} : vector<1x512xf32> to vector<1x256xf32>
    %403 = vector.broadcast %401 : f32 to vector<1x256xf32>
    %404 = arith.mulf %402, %403 : vector<1x256xf32>
    %c57 = arith.constant 57 : index
    %405 = memref.load %arg1[%c57] : memref<98xf32, #tpu.memory_space<smem>>
    %406 = vector.extract_strided_slice %344 {offsets = [0, 94], sizes = [1, 256], strides = [1, 1]} : vector<1x512xf32> to vector<1x256xf32>
    %407 = vector.broadcast %405 : f32 to vector<1x256xf32>
    %408 = arith.mulf %406, %407 : vector<1x256xf32>
    %409 = arith.addf %404, %408 : vector<1x256xf32>
    %c64 = arith.constant 64 : index
    %410 = memref.load %arg1[%c64] : memref<98xf32, #tpu.memory_space<smem>>
    %411 = vector.extract_strided_slice %344 {offsets = [0, 110], sizes = [1, 256], strides = [1, 1]} : vector<1x512xf32> to vector<1x256xf32>
    %412 = vector.broadcast %410 : f32 to vector<1x256xf32>
    %413 = arith.mulf %411, %412 : vector<1x256xf32>
    %414 = arith.addf %409, %413 : vector<1x256xf32>
    %c71 = arith.constant 71 : index
    %415 = memref.load %arg1[%c71] : memref<98xf32, #tpu.memory_space<smem>>
    %416 = vector.extract_strided_slice %344 {offsets = [0, 126], sizes = [1, 256], strides = [1, 1]} : vector<1x512xf32> to vector<1x256xf32>
    %417 = vector.broadcast %415 : f32 to vector<1x256xf32>
    %418 = arith.mulf %416, %417 : vector<1x256xf32>
    %419 = arith.addf %414, %418 : vector<1x256xf32>
    %c78 = arith.constant 78 : index
    %420 = memref.load %arg1[%c78] : memref<98xf32, #tpu.memory_space<smem>>
    %421 = vector.extract_strided_slice %344 {offsets = [0, 142], sizes = [1, 256], strides = [1, 1]} : vector<1x512xf32> to vector<1x256xf32>
    %422 = vector.broadcast %420 : f32 to vector<1x256xf32>
    %423 = arith.mulf %421, %422 : vector<1x256xf32>
    %424 = arith.addf %419, %423 : vector<1x256xf32>
    %c85 = arith.constant 85 : index
    %425 = memref.load %arg1[%c85] : memref<98xf32, #tpu.memory_space<smem>>
    %426 = vector.extract_strided_slice %344 {offsets = [0, 158], sizes = [1, 256], strides = [1, 1]} : vector<1x512xf32> to vector<1x256xf32>
    %427 = vector.broadcast %425 : f32 to vector<1x256xf32>
    %428 = arith.mulf %426, %427 : vector<1x256xf32>
    %429 = arith.addf %424, %428 : vector<1x256xf32>
    %c92 = arith.constant 92 : index
    %430 = memref.load %arg1[%c92] : memref<98xf32, #tpu.memory_space<smem>>
    %431 = vector.extract_strided_slice %344 {offsets = [0, 174], sizes = [1, 256], strides = [1, 1]} : vector<1x512xf32> to vector<1x256xf32>
    %432 = vector.broadcast %430 : f32 to vector<1x256xf32>
    %433 = arith.mulf %431, %432 : vector<1x256xf32>
    %434 = arith.addf %429, %433 : vector<1x256xf32>
    %cst_51 = arith.constant 0.000000e+00 : f32
    %435 = vector.broadcast %cst_51 : f32 to vector<1x256xf32>
    %436 = arith.select %400, %434, %435 : vector<1x256xi1>, vector<1x256xf32>
    %437 = arith.addf %391, %436 : vector<1x256xf32>
    %c-1_i32_52 = arith.constant -1 : i32
    %438 = vector.broadcast %c-1_i32_52 : i32 to vector<1x256xi32>
    %439 = arith.addi %19, %438 : vector<1x256xi32>
    %c0_i32_53 = arith.constant 0 : i32
    %440 = vector.broadcast %c0_i32_53 : i32 to vector<1x256xi32>
    %441 = arith.cmpi sge, %439, %440 : vector<1x256xi32>
    %c-1_i32_54 = arith.constant -1 : i32
    %442 = vector.broadcast %c-1_i32_54 : i32 to vector<1x256xi32>
    %443 = arith.addi %19, %442 : vector<1x256xi32>
    %c16_i32_55 = arith.constant 16 : i32
    %444 = vector.broadcast %c16_i32_55 : i32 to vector<1x256xi32>
    %445 = arith.cmpi slt, %443, %444 : vector<1x256xi32>
    %446 = arith.andi %441, %445 : vector<1x256xi1>
    %c51 = arith.constant 51 : index
    %447 = memref.load %arg1[%c51] : memref<98xf32, #tpu.memory_space<smem>>
    %448 = vector.extract_strided_slice %344 {offsets = [0, 79], sizes = [1, 256], strides = [1, 1]} : vector<1x512xf32> to vector<1x256xf32>
    %449 = vector.broadcast %447 : f32 to vector<1x256xf32>
    %450 = arith.mulf %448, %449 : vector<1x256xf32>
    %c58 = arith.constant 58 : index
    %451 = memref.load %arg1[%c58] : memref<98xf32, #tpu.memory_space<smem>>
    %452 = vector.extract_strided_slice %344 {offsets = [0, 95], sizes = [1, 256], strides = [1, 1]} : vector<1x512xf32> to vector<1x256xf32>
    %453 = vector.broadcast %451 : f32 to vector<1x256xf32>
    %454 = arith.mulf %452, %453 : vector<1x256xf32>
    %455 = arith.addf %450, %454 : vector<1x256xf32>
    %c65 = arith.constant 65 : index
    %456 = memref.load %arg1[%c65] : memref<98xf32, #tpu.memory_space<smem>>
    %457 = vector.extract_strided_slice %344 {offsets = [0, 111], sizes = [1, 256], strides = [1, 1]} : vector<1x512xf32> to vector<1x256xf32>
    %458 = vector.broadcast %456 : f32 to vector<1x256xf32>
    %459 = arith.mulf %457, %458 : vector<1x256xf32>
    %460 = arith.addf %455, %459 : vector<1x256xf32>
    %c72 = arith.constant 72 : index
    %461 = memref.load %arg1[%c72] : memref<98xf32, #tpu.memory_space<smem>>
    %462 = vector.extract_strided_slice %344 {offsets = [0, 127], sizes = [1, 256], strides = [1, 1]} : vector<1x512xf32> to vector<1x256xf32>
    %463 = vector.broadcast %461 : f32 to vector<1x256xf32>
    %464 = arith.mulf %462, %463 : vector<1x256xf32>
    %465 = arith.addf %460, %464 : vector<1x256xf32>
    %c79 = arith.constant 79 : index
    %466 = memref.load %arg1[%c79] : memref<98xf32, #tpu.memory_space<smem>>
    %467 = vector.extract_strided_slice %344 {offsets = [0, 143], sizes = [1, 256], strides = [1, 1]} : vector<1x512xf32> to vector<1x256xf32>
    %468 = vector.broadcast %466 : f32 to vector<1x256xf32>
    %469 = arith.mulf %467, %468 : vector<1x256xf32>
    %470 = arith.addf %465, %469 : vector<1x256xf32>
    %c86 = arith.constant 86 : index
    %471 = memref.load %arg1[%c86] : memref<98xf32, #tpu.memory_space<smem>>
    %472 = vector.extract_strided_slice %344 {offsets = [0, 159], sizes = [1, 256], strides = [1, 1]} : vector<1x512xf32> to vector<1x256xf32>
    %473 = vector.broadcast %471 : f32 to vector<1x256xf32>
    %474 = arith.mulf %472, %473 : vector<1x256xf32>
    %475 = arith.addf %470, %474 : vector<1x256xf32>
    %c93 = arith.constant 93 : index
    %476 = memref.load %arg1[%c93] : memref<98xf32, #tpu.memory_space<smem>>
    %477 = vector.extract_strided_slice %344 {offsets = [0, 175], sizes = [1, 256], strides = [1, 1]} : vector<1x512xf32> to vector<1x256xf32>
    %478 = vector.broadcast %476 : f32 to vector<1x256xf32>
    %479 = arith.mulf %477, %478 : vector<1x256xf32>
    %480 = arith.addf %475, %479 : vector<1x256xf32>
    %cst_56 = arith.constant 0.000000e+00 : f32
    %481 = vector.broadcast %cst_56 : f32 to vector<1x256xf32>
    %482 = arith.select %446, %480, %481 : vector<1x256xi1>, vector<1x256xf32>
    %483 = arith.addf %437, %482 : vector<1x256xf32>
    %c0_i32_57 = arith.constant 0 : i32
    %484 = vector.broadcast %c0_i32_57 : i32 to vector<1x256xi32>
    %485 = arith.addi %19, %484 : vector<1x256xi32>
    %c0_i32_58 = arith.constant 0 : i32
    %486 = vector.broadcast %c0_i32_58 : i32 to vector<1x256xi32>
    %487 = arith.cmpi sge, %485, %486 : vector<1x256xi32>
    %c0_i32_59 = arith.constant 0 : i32
    %488 = vector.broadcast %c0_i32_59 : i32 to vector<1x256xi32>
    %489 = arith.addi %19, %488 : vector<1x256xi32>
    %c16_i32_60 = arith.constant 16 : i32
    %490 = vector.broadcast %c16_i32_60 : i32 to vector<1x256xi32>
    %491 = arith.cmpi slt, %489, %490 : vector<1x256xi32>
    %492 = arith.andi %487, %491 : vector<1x256xi1>
    %c52 = arith.constant 52 : index
    %493 = memref.load %arg1[%c52] : memref<98xf32, #tpu.memory_space<smem>>
    %494 = vector.extract_strided_slice %344 {offsets = [0, 80], sizes = [1, 256], strides = [1, 1]} : vector<1x512xf32> to vector<1x256xf32>
    %495 = vector.broadcast %493 : f32 to vector<1x256xf32>
    %496 = arith.mulf %494, %495 : vector<1x256xf32>
    %c59 = arith.constant 59 : index
    %497 = memref.load %arg1[%c59] : memref<98xf32, #tpu.memory_space<smem>>
    %498 = vector.extract_strided_slice %344 {offsets = [0, 96], sizes = [1, 256], strides = [1, 1]} : vector<1x512xf32> to vector<1x256xf32>
    %499 = vector.broadcast %497 : f32 to vector<1x256xf32>
    %500 = arith.mulf %498, %499 : vector<1x256xf32>
    %501 = arith.addf %496, %500 : vector<1x256xf32>
    %c66 = arith.constant 66 : index
    %502 = memref.load %arg1[%c66] : memref<98xf32, #tpu.memory_space<smem>>
    %503 = vector.extract_strided_slice %344 {offsets = [0, 112], sizes = [1, 256], strides = [1, 1]} : vector<1x512xf32> to vector<1x256xf32>
    %504 = vector.broadcast %502 : f32 to vector<1x256xf32>
    %505 = arith.mulf %503, %504 : vector<1x256xf32>
    %506 = arith.addf %501, %505 : vector<1x256xf32>
    %c73 = arith.constant 73 : index
    %507 = memref.load %arg1[%c73] : memref<98xf32, #tpu.memory_space<smem>>
    %508 = vector.extract_strided_slice %344 {offsets = [0, 128], sizes = [1, 256], strides = [1, 1]} : vector<1x512xf32> to vector<1x256xf32>
    %509 = vector.broadcast %507 : f32 to vector<1x256xf32>
    %510 = arith.mulf %508, %509 : vector<1x256xf32>
    %511 = arith.addf %506, %510 : vector<1x256xf32>
    %c80 = arith.constant 80 : index
    %512 = memref.load %arg1[%c80] : memref<98xf32, #tpu.memory_space<smem>>
    %513 = vector.extract_strided_slice %344 {offsets = [0, 144], sizes = [1, 256], strides = [1, 1]} : vector<1x512xf32> to vector<1x256xf32>
    %514 = vector.broadcast %512 : f32 to vector<1x256xf32>
    %515 = arith.mulf %513, %514 : vector<1x256xf32>
    %516 = arith.addf %511, %515 : vector<1x256xf32>
    %c87 = arith.constant 87 : index
    %517 = memref.load %arg1[%c87] : memref<98xf32, #tpu.memory_space<smem>>
    %518 = vector.extract_strided_slice %344 {offsets = [0, 160], sizes = [1, 256], strides = [1, 1]} : vector<1x512xf32> to vector<1x256xf32>
    %519 = vector.broadcast %517 : f32 to vector<1x256xf32>
    %520 = arith.mulf %518, %519 : vector<1x256xf32>
    %521 = arith.addf %516, %520 : vector<1x256xf32>
    %c94 = arith.constant 94 : index
    %522 = memref.load %arg1[%c94] : memref<98xf32, #tpu.memory_space<smem>>
    %523 = vector.extract_strided_slice %344 {offsets = [0, 176], sizes = [1, 256], strides = [1, 1]} : vector<1x512xf32> to vector<1x256xf32>
    %524 = vector.broadcast %522 : f32 to vector<1x256xf32>
    %525 = arith.mulf %523, %524 : vector<1x256xf32>
    %526 = arith.addf %521, %525 : vector<1x256xf32>
    %cst_61 = arith.constant 0.000000e+00 : f32
    %527 = vector.broadcast %cst_61 : f32 to vector<1x256xf32>
    %528 = arith.select %492, %526, %527 : vector<1x256xi1>, vector<1x256xf32>
    %529 = arith.addf %483, %528 : vector<1x256xf32>
    %c1_i32_62 = arith.constant 1 : i32
    %530 = vector.broadcast %c1_i32_62 : i32 to vector<1x256xi32>
    %531 = arith.addi %19, %530 : vector<1x256xi32>
    %c0_i32_63 = arith.constant 0 : i32
    %532 = vector.broadcast %c0_i32_63 : i32 to vector<1x256xi32>
    %533 = arith.cmpi sge, %531, %532 : vector<1x256xi32>
    %c1_i32_64 = arith.constant 1 : i32
    %534 = vector.broadcast %c1_i32_64 : i32 to vector<1x256xi32>
    %535 = arith.addi %19, %534 : vector<1x256xi32>
    %c16_i32_65 = arith.constant 16 : i32
    %536 = vector.broadcast %c16_i32_65 : i32 to vector<1x256xi32>
    %537 = arith.cmpi slt, %535, %536 : vector<1x256xi32>
    %538 = arith.andi %533, %537 : vector<1x256xi1>
    %c53 = arith.constant 53 : index
    %539 = memref.load %arg1[%c53] : memref<98xf32, #tpu.memory_space<smem>>
    %540 = vector.extract_strided_slice %344 {offsets = [0, 81], sizes = [1, 256], strides = [1, 1]} : vector<1x512xf32> to vector<1x256xf32>
    %541 = vector.broadcast %539 : f32 to vector<1x256xf32>
    %542 = arith.mulf %540, %541 : vector<1x256xf32>
    %c60 = arith.constant 60 : index
    %543 = memref.load %arg1[%c60] : memref<98xf32, #tpu.memory_space<smem>>
    %544 = vector.extract_strided_slice %344 {offsets = [0, 97], sizes = [1, 256], strides = [1, 1]} : vector<1x512xf32> to vector<1x256xf32>
    %545 = vector.broadcast %543 : f32 to vector<1x256xf32>
    %546 = arith.mulf %544, %545 : vector<1x256xf32>
    %547 = arith.addf %542, %546 : vector<1x256xf32>
    %c67 = arith.constant 67 : index
    %548 = memref.load %arg1[%c67] : memref<98xf32, #tpu.memory_space<smem>>
    %549 = vector.extract_strided_slice %344 {offsets = [0, 113], sizes = [1, 256], strides = [1, 1]} : vector<1x512xf32> to vector<1x256xf32>
    %550 = vector.broadcast %548 : f32 to vector<1x256xf32>
    %551 = arith.mulf %549, %550 : vector<1x256xf32>
    %552 = arith.addf %547, %551 : vector<1x256xf32>
    %c74 = arith.constant 74 : index
    %553 = memref.load %arg1[%c74] : memref<98xf32, #tpu.memory_space<smem>>
    %554 = vector.extract_strided_slice %344 {offsets = [0, 129], sizes = [1, 256], strides = [1, 1]} : vector<1x512xf32> to vector<1x256xf32>
    %555 = vector.broadcast %553 : f32 to vector<1x256xf32>
    %556 = arith.mulf %554, %555 : vector<1x256xf32>
    %557 = arith.addf %552, %556 : vector<1x256xf32>
    %c81 = arith.constant 81 : index
    %558 = memref.load %arg1[%c81] : memref<98xf32, #tpu.memory_space<smem>>
    %559 = vector.extract_strided_slice %344 {offsets = [0, 145], sizes = [1, 256], strides = [1, 1]} : vector<1x512xf32> to vector<1x256xf32>
    %560 = vector.broadcast %558 : f32 to vector<1x256xf32>
    %561 = arith.mulf %559, %560 : vector<1x256xf32>
    %562 = arith.addf %557, %561 : vector<1x256xf32>
    %c88 = arith.constant 88 : index
    %563 = memref.load %arg1[%c88] : memref<98xf32, #tpu.memory_space<smem>>
    %564 = vector.extract_strided_slice %344 {offsets = [0, 161], sizes = [1, 256], strides = [1, 1]} : vector<1x512xf32> to vector<1x256xf32>
    %565 = vector.broadcast %563 : f32 to vector<1x256xf32>
    %566 = arith.mulf %564, %565 : vector<1x256xf32>
    %567 = arith.addf %562, %566 : vector<1x256xf32>
    %c95 = arith.constant 95 : index
    %568 = memref.load %arg1[%c95] : memref<98xf32, #tpu.memory_space<smem>>
    %569 = vector.extract_strided_slice %344 {offsets = [0, 177], sizes = [1, 256], strides = [1, 1]} : vector<1x512xf32> to vector<1x256xf32>
    %570 = vector.broadcast %568 : f32 to vector<1x256xf32>
    %571 = arith.mulf %569, %570 : vector<1x256xf32>
    %572 = arith.addf %567, %571 : vector<1x256xf32>
    %cst_66 = arith.constant 0.000000e+00 : f32
    %573 = vector.broadcast %cst_66 : f32 to vector<1x256xf32>
    %574 = arith.select %538, %572, %573 : vector<1x256xi1>, vector<1x256xf32>
    %575 = arith.addf %529, %574 : vector<1x256xf32>
    %c2_i32_67 = arith.constant 2 : i32
    %576 = vector.broadcast %c2_i32_67 : i32 to vector<1x256xi32>
    %577 = arith.addi %19, %576 : vector<1x256xi32>
    %c0_i32_68 = arith.constant 0 : i32
    %578 = vector.broadcast %c0_i32_68 : i32 to vector<1x256xi32>
    %579 = arith.cmpi sge, %577, %578 : vector<1x256xi32>
    %c2_i32_69 = arith.constant 2 : i32
    %580 = vector.broadcast %c2_i32_69 : i32 to vector<1x256xi32>
    %581 = arith.addi %19, %580 : vector<1x256xi32>
    %c16_i32_70 = arith.constant 16 : i32
    %582 = vector.broadcast %c16_i32_70 : i32 to vector<1x256xi32>
    %583 = arith.cmpi slt, %581, %582 : vector<1x256xi32>
    %584 = arith.andi %579, %583 : vector<1x256xi1>
    %c54 = arith.constant 54 : index
    %585 = memref.load %arg1[%c54] : memref<98xf32, #tpu.memory_space<smem>>
    %586 = vector.extract_strided_slice %344 {offsets = [0, 82], sizes = [1, 256], strides = [1, 1]} : vector<1x512xf32> to vector<1x256xf32>
    %587 = vector.broadcast %585 : f32 to vector<1x256xf32>
    %588 = arith.mulf %586, %587 : vector<1x256xf32>
    %c61 = arith.constant 61 : index
    %589 = memref.load %arg1[%c61] : memref<98xf32, #tpu.memory_space<smem>>
    %590 = vector.extract_strided_slice %344 {offsets = [0, 98], sizes = [1, 256], strides = [1, 1]} : vector<1x512xf32> to vector<1x256xf32>
    %591 = vector.broadcast %589 : f32 to vector<1x256xf32>
    %592 = arith.mulf %590, %591 : vector<1x256xf32>
    %593 = arith.addf %588, %592 : vector<1x256xf32>
    %c68 = arith.constant 68 : index
    %594 = memref.load %arg1[%c68] : memref<98xf32, #tpu.memory_space<smem>>
    %595 = vector.extract_strided_slice %344 {offsets = [0, 114], sizes = [1, 256], strides = [1, 1]} : vector<1x512xf32> to vector<1x256xf32>
    %596 = vector.broadcast %594 : f32 to vector<1x256xf32>
    %597 = arith.mulf %595, %596 : vector<1x256xf32>
    %598 = arith.addf %593, %597 : vector<1x256xf32>
    %c75 = arith.constant 75 : index
    %599 = memref.load %arg1[%c75] : memref<98xf32, #tpu.memory_space<smem>>
    %600 = vector.extract_strided_slice %344 {offsets = [0, 130], sizes = [1, 256], strides = [1, 1]} : vector<1x512xf32> to vector<1x256xf32>
    %601 = vector.broadcast %599 : f32 to vector<1x256xf32>
    %602 = arith.mulf %600, %601 : vector<1x256xf32>
    %603 = arith.addf %598, %602 : vector<1x256xf32>
    %c82 = arith.constant 82 : index
    %604 = memref.load %arg1[%c82] : memref<98xf32, #tpu.memory_space<smem>>
    %605 = vector.extract_strided_slice %344 {offsets = [0, 146], sizes = [1, 256], strides = [1, 1]} : vector<1x512xf32> to vector<1x256xf32>
    %606 = vector.broadcast %604 : f32 to vector<1x256xf32>
    %607 = arith.mulf %605, %606 : vector<1x256xf32>
    %608 = arith.addf %603, %607 : vector<1x256xf32>
    %c89 = arith.constant 89 : index
    %609 = memref.load %arg1[%c89] : memref<98xf32, #tpu.memory_space<smem>>
    %610 = vector.extract_strided_slice %344 {offsets = [0, 162], sizes = [1, 256], strides = [1, 1]} : vector<1x512xf32> to vector<1x256xf32>
    %611 = vector.broadcast %609 : f32 to vector<1x256xf32>
    %612 = arith.mulf %610, %611 : vector<1x256xf32>
    %613 = arith.addf %608, %612 : vector<1x256xf32>
    %c96 = arith.constant 96 : index
    %614 = memref.load %arg1[%c96] : memref<98xf32, #tpu.memory_space<smem>>
    %615 = vector.extract_strided_slice %344 {offsets = [0, 178], sizes = [1, 256], strides = [1, 1]} : vector<1x512xf32> to vector<1x256xf32>
    %616 = vector.broadcast %614 : f32 to vector<1x256xf32>
    %617 = arith.mulf %615, %616 : vector<1x256xf32>
    %618 = arith.addf %613, %617 : vector<1x256xf32>
    %cst_71 = arith.constant 0.000000e+00 : f32
    %619 = vector.broadcast %cst_71 : f32 to vector<1x256xf32>
    %620 = arith.select %584, %618, %619 : vector<1x256xi1>, vector<1x256xf32>
    %621 = arith.addf %575, %620 : vector<1x256xf32>
    %c3_i32_72 = arith.constant 3 : i32
    %622 = vector.broadcast %c3_i32_72 : i32 to vector<1x256xi32>
    %623 = arith.addi %19, %622 : vector<1x256xi32>
    %c0_i32_73 = arith.constant 0 : i32
    %624 = vector.broadcast %c0_i32_73 : i32 to vector<1x256xi32>
    %625 = arith.cmpi sge, %623, %624 : vector<1x256xi32>
    %c3_i32_74 = arith.constant 3 : i32
    %626 = vector.broadcast %c3_i32_74 : i32 to vector<1x256xi32>
    %627 = arith.addi %19, %626 : vector<1x256xi32>
    %c16_i32_75 = arith.constant 16 : i32
    %628 = vector.broadcast %c16_i32_75 : i32 to vector<1x256xi32>
    %629 = arith.cmpi slt, %627, %628 : vector<1x256xi32>
    %630 = arith.andi %625, %629 : vector<1x256xi1>
    %c55 = arith.constant 55 : index
    %631 = memref.load %arg1[%c55] : memref<98xf32, #tpu.memory_space<smem>>
    %632 = vector.extract_strided_slice %344 {offsets = [0, 83], sizes = [1, 256], strides = [1, 1]} : vector<1x512xf32> to vector<1x256xf32>
    %633 = vector.broadcast %631 : f32 to vector<1x256xf32>
    %634 = arith.mulf %632, %633 : vector<1x256xf32>
    %c62 = arith.constant 62 : index
    %635 = memref.load %arg1[%c62] : memref<98xf32, #tpu.memory_space<smem>>
    %636 = vector.extract_strided_slice %344 {offsets = [0, 99], sizes = [1, 256], strides = [1, 1]} : vector<1x512xf32> to vector<1x256xf32>
    %637 = vector.broadcast %635 : f32 to vector<1x256xf32>
    %638 = arith.mulf %636, %637 : vector<1x256xf32>
    %639 = arith.addf %634, %638 : vector<1x256xf32>
    %c69 = arith.constant 69 : index
    %640 = memref.load %arg1[%c69] : memref<98xf32, #tpu.memory_space<smem>>
    %641 = vector.extract_strided_slice %344 {offsets = [0, 115], sizes = [1, 256], strides = [1, 1]} : vector<1x512xf32> to vector<1x256xf32>
    %642 = vector.broadcast %640 : f32 to vector<1x256xf32>
    %643 = arith.mulf %641, %642 : vector<1x256xf32>
    %644 = arith.addf %639, %643 : vector<1x256xf32>
    %c76 = arith.constant 76 : index
    %645 = memref.load %arg1[%c76] : memref<98xf32, #tpu.memory_space<smem>>
    %646 = vector.extract_strided_slice %344 {offsets = [0, 131], sizes = [1, 256], strides = [1, 1]} : vector<1x512xf32> to vector<1x256xf32>
    %647 = vector.broadcast %645 : f32 to vector<1x256xf32>
    %648 = arith.mulf %646, %647 : vector<1x256xf32>
    %649 = arith.addf %644, %648 : vector<1x256xf32>
    %c83 = arith.constant 83 : index
    %650 = memref.load %arg1[%c83] : memref<98xf32, #tpu.memory_space<smem>>
    %651 = vector.extract_strided_slice %344 {offsets = [0, 147], sizes = [1, 256], strides = [1, 1]} : vector<1x512xf32> to vector<1x256xf32>
    %652 = vector.broadcast %650 : f32 to vector<1x256xf32>
    %653 = arith.mulf %651, %652 : vector<1x256xf32>
    %654 = arith.addf %649, %653 : vector<1x256xf32>
    %c90 = arith.constant 90 : index
    %655 = memref.load %arg1[%c90] : memref<98xf32, #tpu.memory_space<smem>>
    %656 = vector.extract_strided_slice %344 {offsets = [0, 163], sizes = [1, 256], strides = [1, 1]} : vector<1x512xf32> to vector<1x256xf32>
    %657 = vector.broadcast %655 : f32 to vector<1x256xf32>
    %658 = arith.mulf %656, %657 : vector<1x256xf32>
    %659 = arith.addf %654, %658 : vector<1x256xf32>
    %c97 = arith.constant 97 : index
    %660 = memref.load %arg1[%c97] : memref<98xf32, #tpu.memory_space<smem>>
    %661 = vector.extract_strided_slice %344 {offsets = [0, 179], sizes = [1, 256], strides = [1, 1]} : vector<1x512xf32> to vector<1x256xf32>
    %662 = vector.broadcast %660 : f32 to vector<1x256xf32>
    %663 = arith.mulf %661, %662 : vector<1x256xf32>
    %664 = arith.addf %659, %663 : vector<1x256xf32>
    %cst_76 = arith.constant 0.000000e+00 : f32
    %665 = vector.broadcast %cst_76 : f32 to vector<1x256xf32>
    %666 = arith.select %630, %664, %665 : vector<1x256xi1>, vector<1x256xf32>
    %667 = arith.addf %621, %666 : vector<1x256xf32>
    %668 = arith.addf %343, %667 : vector<1x256xf32>
    %669 = arith.negf %668 : vector<1x256xf32>
    %670 = math.exp %669 : vector<1x256xf32>
    %cst_77 = arith.constant 1.000000e+00 : f32
    %671 = vector.broadcast %cst_77 : f32 to vector<1x256xf32>
    %672 = arith.addf %671, %670 : vector<1x256xf32>
    %673 = arith.divf %671, %672 : vector<1x256xf32>
    %c0_78 = arith.constant 0 : index
    %c0_79 = arith.constant 0 : index
    %c0_80 = arith.constant 0 : index
    %674 = vector.load %arg3[%c0_78, %c0_79, %c0_80] : memref<1x1x256xf32, #tpu.memory_space<vmem>>, vector<1x1x256xf32>
    %675 = vector.shape_cast %674 : vector<1x1x256xf32> to vector<1x256xf32>
    %676 = vector.shape_cast %673 : vector<1x256xf32> to vector<1x1x256xf32>
    tpu.vector_store %arg3[%c0_78, %c0_79, %c0_80], %676 {strides = array<i32>} : memref<1x1x256xf32, #tpu.memory_space<vmem>>, vector<1x1x256xf32>,
    return
  }
  func.func @transform_0(%arg0: i32) -> i32 {
    %c0_i32 = arith.constant 0 : i32
    %c0_i32_0 = arith.constant 0 : i32
    return %c0_i32 : i32
  }
  func.func @transform_1(%arg0: i32) -> (i32, i32, i32) {
    %c0_i32 = arith.constant 0 : i32
    %c0_i32_0 = arith.constant 0 : i32
    %c0_i32_1 = arith.constant 0 : i32
    return %arg0, %c0_i32, %c0_i32_0 : i32, i32, i32
  }
  func.func @transform_2(%arg0: i32) -> (i32, i32, i32) {
    %c0_i32 = arith.constant 0 : i32
    %c0_i32_0 = arith.constant 0 : i32
    %c0_i32_1 = arith.constant 0 : i32
    return %arg0, %c0_i32, %c0_i32_0 : i32, i32, i32
  }
}

</mosaic_0001>

<bundles_post_ra>
// kernel: tpu_custom_call.1
= control target key start
LH: loop header
LB: loop body
LE: loop exit
PB: predicated region body
PF: predicated region fallthrough
CT: control target
= control target key end

     0   :  { %7 = vsyncpa [#allocation5], 0  ;;  %s4143_s0 = inlined_call_operand.hbm [shape: f32[98], index: 0, kind: input, shape index: {}]   ;;  %s4144_s1 = inlined_call_operand.hbm [shape: f32[2,4,256], index: 1, kind: input, shape index: {}]   ;;  %s4145_s2 = inlined_call_operand.hbm [shape: f32[2,1,256], index: 2, kind: output, shape index: {}]  }
   0x1   :  { %8 = vsyncpa [#allocation3], 0 }
   0x2   :  { %10 = vsyncpa [#allocation3 + $0x1], 0 }
   0x3   :  { %11 = vsyncpa [#allocation4], 0 }
   0x4   :  { %13 = vsyncpa [#allocation4 + $0x1], 0  ;;  %s2897_s9 = smov 0   ;;  %s2899_s10 = smov 0  }
   0x5   :  { %s2901_s11 = smov 0   ;;  %s2903_s12 = smov 0  }
   0x6 LB: > { %s2918_s13 = sadd.s32 4294967295, %s2864_s12   ;;  %s2559_s14 = sadd.s32 4294967294, %s2864_s12   ;;  %s2864_s12 = sphi %s2903_s12, %s4206_s12   ;;  %s2860_s11 = sphi %s2901_s11, %s4205_s11   ;;  %s2856_s10 = sphi %s2899_s10, %s4204_s10   ;;  %s2852_s9 = sphi %s2897_s9, %s4203_s9  }
   0x7   : > { %p60_p0 = scmp.ne.s32.totalorder %s2856_s10, %s2852_s9  ;;  %p4146_p1 = scmp.eq.s32.totalorder %s2918_s13, 0 }
   0x8   : > { %p84_p2 = scmp.eq.s32.totalorder %s2918_s13, 1  ;;  %p90_p3 = scmp.eq.s32.totalorder %s2559_s14, 1 }
   0x9   : > { %p2927_p4 = por %p4146_p1, %p60_p0  ;;  %p2560_p5 = scmp.ge.s32.totalorder %s2864_s12, 1 }
   0xa   : > { %p2932_p6 = por %p90_p3, %p60_p0  ;;  %p97_p7 = scmp.lt.s32.totalorder %s2864_s12, 3 }
   0xb   : > { %s4158_s15 = scalar_select %p2927_p4, 1, 0 }
   0xc   : > { %s4159_s16 = scalar_select %p2932_p6, 1, 0 }
   0xd   : > { %p2937_p8 = pnand %p2560_p5, %p97_p7  ;;  %s2943_s18 = sadd.s32 1, %s2864_s12  }
   0xe   : > { %s44_s19 = ssub.s32 %s2864_s12, %s2943_s18  ;;  %s47_s20 = sadd.s32 1, %s2860_s11 }
   0xf   : > { %s4160_s17 = scalar_select %p2937_p8, 1, 0 }
  0x10   : > { %p2687_p10 = pneg %p2937_p8  ;;  %p45_p12 = scmp.eq.s32.totalorder %s44_s19, 0 }
  0x11   : > { %p54_p13 = scmp.ne.s32.totalorder %s2860_s11, %s2856_s10  ;;  %p55_p0 = scmp.eq.s32.totalorder %s2864_s12, 0 }
  0x12   : > { %p2688_p11 = pnand %p2687_p10, %p4146_p1  ;;  %p2700_p3 = scmp.lt.s32.totalorder %s2864_s12, 2 }
  0x13   : > { %s2866_s21 = smov [#allocation2]   ;;  %p56_p5 = por %p55_p0, %p54_p13 }
  0x14   : > { %2690 = dma.hbm_to_smem (!%p2688_p11), %s4143_s0, 16, %s2866_s21, [#allocation5]  }
  0x15   : > { %s2960_s24 = scalar_select %p45_p12, %s2860_s11, %s47_s20  }
  0x16   : > { %p2964_p7 = por %p84_p2, %p54_p13  ;;  %s119_s26 = sand.u32 1, %s2860_s11  }
  0x17   : > { %s2677_s27 = sshll.u32 %s2864_s12, 7  ;;  %s2563_s28 = sshll.u32 %s119_s26, 3 }
  0x18   : > { %s4161_s25 = scalar_select %p2964_p7, 1, 0 }
  0x19   : > { %s2973_s3 = scalar_lea.hbm %s4144_s1, %s2677_s27  ;;  %s123_s4 = scalar_lea.vmem [#allocation6], %s2563_s28 }
  0x1a   : > { %s131_s5 = sshll.u32 %s123_s4, 4  ;;  %p2975_p10 = pnand %p2700_p3, %p56_p5  ;;  %s132_s5 = int_to_ptr.vmem [resolvable:$true] %s131_s5 }
  0x1b   : > { %s120_s7 = scalar_lea.sflag [#allocation3], %s119_s26  ;;  %s2768_s8 = scalar_lea.hbm %s2973_s3, 128 }
  0x1c   : > { %p2769_p2 = scmp.ne.s32.totalorder %s2973_s3, %s2768_s8  ;;  %p2770_p11 = pneg %p2975_p10 }
  0x1d   : > { %s2773_s20 = scalar_lea.hbm %s4144_s1, 256  ;;  %p2774_p0 = scmp.lt.s32.totalorder %s2973_s3, %s4144_s1 }
  0x1e   : > { %p2771_p12 = pnand %p2770_p11, %p2769_p2  ;;  %p2775_p3 = scmp.lt.s32.totalorder %s2773_s20, %s2768_s8 }
  0x20   : > { %p2772_p13 = pneg %p2771_p12  ;;  %p2776_p5 = por %p2775_p3, %p2774_p0 }
  0x22   : > { %p2777_p9 = pnand %p2776_p5, %p2772_p13 }
  0x24   : > { %2780 = shalt.err (!%p2777_p9)
}
  0x25   : > { %s2781_s23 = scalar_lea.vmem %s132_s5, 128  ;;  %s2867_s26 = smov [#allocation6]  }
  0x26   : > { %p2782_p1 = scmp.ne.s32.totalorder %s132_s5, %s2781_s23  ;;  %s2786_s27 = sshll.u32 %s2867_s26, 4  ;;  %s2787_s27 = int_to_ptr.vmem [resolvable:$false] %s2786_s27 }
  0x27   : > { %s2788_s28 = scalar_lea.vmem %s2787_s27, 256  ;;  %p2789_p2 = scmp.lt.s32.totalorder %s132_s5, %s2787_s27 }
  0x28   : > { %p2784_p6 = pnand %p2782_p1, %p2770_p11  ;;  %p2790_p12 = scmp.lt.s32.totalorder %s2788_s28, %s2781_s23 }
  0x2a   : > { %p2785_p7 = pneg %p2784_p6  ;;  %p2791_p4 = por %p2790_p12, %p2789_p2 }
  0x2c   : > { %p2792_p8 = pnand %p2791_p4, %p2785_p7 }
  0x2e   : > { %2795 = shalt.err (!%p2792_p8)
}
  0x2f   : > { %2694 = dma.hbm_to_vmem [thread:$0]  (!%p2975_p10), %s2973_s3, 128, %s132_s5, %s120_s7  }
  0x30   : > { %p4163_p13 = scmp.ne.s32.totalorder %s4160_s17, 0 }
  0x32   : > { %140 = sbr.rel (%p4163_p13) target bundleno = 1686 (0x696), region = 28 }
  0x37   : > { %p4164_p9 = scmp.eq.s32.totalorder %s2918_s13, 0 }
  0x39   : > { %2839 = dma.done.wait (%p4164_p9), [#allocation5], 16   ;;  %p4165_p1 = pmov %p4164_p9 }
  0x3a   : > { %s3000_s29 = sand.u32 1, %s2856_s10   ;;  %p4166_p4 = scmp.ne.s32.totalorder %s4158_s15, 0 }
  0x3b   : > { %2841 = vsyncadd (%p4165_p1), [#allocation5], 4294967280  ;;  %s2568_s30 = sshll.u32 %s3000_s29, 3  ;;  %s147_s4 = scalar_lea.sflag [#allocation3], %s3000_s29 }
  0x3c   : > { %s150_s6 = scalar_lea.vmem [#allocation6], %s2568_s30 }
  0x3d   : > { %2843 = dma.done.wait (%p4166_p4), %s147_s4, 128  }
  0x3e   : > { %2845 = vsyncadd (%p4166_p4), %s147_s4, 4294967168 }
  0x3f   : > { %155 = sfence }
  0x40   : > { %s2574_s17 = sld [smem:[#allocation2 + $0xe]]  ;;  %v3008_v0 = vld [vmem:[%s150_s6] ss:$4 sm:$0x3]  ;;  %v4150_v1 = vlaneseq  ;;  %s2868_s5 = smov 96   ;;  %vm298_vm0 = vcmask 523264  }
  0x41   : > { %s2573_s3 = sld [smem:[#allocation2 + $0x7]]  ;;  %v3010_v2 = vld [vmem:[%s150_s6 + $0x1] ss:$4 sm:$0x3]  ;;  %s2869_s7 = smov 112   ;;  %vm321_vm1 = vcmask 392192  }
  0x42   : > { %v3012_v3 = vld [vmem:[%s150_s6 + $0x2] ss:$4 sm:$0x3]  ;;  %v3014_v4 = vld [vmem:[%s150_s6 + $0x3] ss:$4 sm:$0x3] }
  0x43   : > { %v177_v5 = vadd.f32 %v3012_v3, %v3008_v0  ;;  %v178_v6 = vmax.f32 %v3008_v0, %v3012_v3  ;;  %v181_v7 = vadd.f32 %v3014_v4, %v3010_v2  ;;  %v182_v8 = vmax.f32 %v3010_v2, %v3014_v4  ;;  %s2575_s15 = sld [smem:[#allocation2 + $0x15]]  ;;  %s2870_s19 = smov 80  }
  0x44   : > { %v3025_v9 = vshrl.u32 %v4150_v1, 7  ;;  %s2576_s8 = sld [smem:[#allocation2 + $0x1c]]  ;;  %s2871_s21 = smov 64   ;;  %vm344_vm2 = vcmask 261120   ;;  %vm229_vm3 = vcmask 916480   ;;  %vm252_vm4 = vcmask 785408  }
  0x45   : > { %v183_v10 = vadd.f32 %v181_v7, %v177_v5  ;;  %s2577_s14 = sld [smem:[#allocation2 + $0x23]]  ;;  %s2872_s23 = smov 48   ;;  %vm275_vm5 = vcmask 654336   ;;  %vm525_vm6 = vcmask 408576   ;;  %vm362_vm7 = vcmask 416768  }
  0x46   : > { %4167 = vst [vmem:[#allocation11_spill] sm:$0xff] %v3025_v9  ;;  %v239_v11 = vstv %s2574_s17  ;;  %v198_v12 = vsub.s32 1, %v3025_v9  ;;  %v194_v13 = vsub.s32 0, %v3025_v9  ;;  %s2578_s20 = sld [smem:[#allocation2 + $0x2a]]  ;;  %s2873_s27 = smov 32   ;;  %vm688_vm11 = vcmask 400384  }
  0x47   : > { %v240_v14 = vmul.f32 0.0, %v239_v11  ;;  %v216_v15 = vstv %s2573_s3  ;;  %v185_v16 = vmul.f32 0.25, %v183_v10  ;;  %s2580_s22 = sld [smem:[#allocation2 + $0x8]]  ;;  %vm1006_vm15 = vcmask 384000   ;;  %p4200_p8 = scmp.ne.s32.totalorder %s4161_s25, 0 }
  0x48   : > { %v217_v17 = vmul.f32 0.0, %v216_v15  ;;  %s2581_s26 = sld [smem:[#allocation2 + $0xf]] }
  0x49   : > { %246 = vrot.lane.b32.xlu1 %v240_v14, %s2868_s5  ;;  %v3032_v18 = vrot.slane %v185_v16, %v198_v12  ;;  %v3036_v19 = vrot.slane %v185_v16, %v194_v13  ;;  %v262_v24 = vstv %s2575_s15  ;;  %s2582_s28 = sld [smem:[#allocation2 + $0x16]] }
  0x4a   : > { %223 = vrot.lane.b32.xlu0 %v217_v17, %s2869_s7  ;;  %v263_v26 = vmul.f32 0.0, %v262_v24  ;;  %v285_v27 = vstv %s2576_s8  ;;  %s2583_s30 = sld [smem:[#allocation2 + $0x1d]] }
  0x4b   : > { %v219_v20 = vmul.f32 %v216_v15, %v3032_v18  ;;  %v218_v21 = vmul.f32 %v216_v15, %v3036_v19  ;;  %v242_v22 = vmul.f32 %v239_v11, %v3032_v18  ;;  %v241_v23 = vmul.f32 %v239_v11, %v3036_v19  ;;  %s2584_s4 = sld [smem:[#allocation2 + $0x24]] }
  0x4c   : > { %v264_v25 = vmul.f32 %v262_v24, %v3036_v19  ;;  %v286_v28 = vmul.f32 %v285_v27, %v3036_v19  ;;  %v265_v29 = vmul.f32 %v262_v24, %v3032_v18  ;;  %v288_v30 = vmul.f32 0.0, %v285_v27  ;;  %s2585_s6 = sld [smem:[#allocation2 + $0x2b]] }
  0x4d   : > { %227 = vrot.lane.b32.xlu1 %v219_v20, %s2869_s7  ;;  %v287_v31 = vmul.f32 %v285_v27, %v3032_v18  ;;  %v308_v32 = vstv %s2577_s14  ;;  %v331_v35 = vstv %s2578_s20  ;;  %v385_v40 = vstv %s2580_s22  ;;  %s2587_s17 = sld [smem:[#allocation2 + $0x9]] }
  0x4e   : > { %225 = vrot.lane.b32.xlu0 %v218_v21, %s2869_s7  ;;  %v310_v33 = vmul.f32 %v308_v32, %v3032_v18  ;;  %v309_v34 = vmul.f32 %v308_v32, %v3036_v19  ;;  %v332_v36 = vmul.f32 %v331_v35, %v3036_v19  ;;  %v311_v37 = vmul.f32 0.0, %v308_v32  ;;  %s2588_s3 = sld [smem:[#allocation2 + $0x10]] }
  0x4f   : > { %v334_v38 = vmul.f32 0.0, %v331_v35  ;;  %v333_v39 = vmul.f32 %v331_v35, %v3032_v18  ;;  %v386_v41 = vmul.f32 0.0, %v385_v40  ;;  %v387_v42 = vmul.f32 %v385_v40, %v3036_v19  ;;  %s2589_s15 = sld [smem:[#allocation2 + $0x17]] }
  0x50   : > { %v407_v43 = vstv %s2581_s26  ;;  %v388_v44 = vmul.f32 %v385_v40, %v3032_v18  ;;  %v429_v48 = vstv %s2582_s28  ;;  %v451_v51 = vstv %s2583_s30  ;;  %s2590_s8 = sld [smem:[#allocation2 + $0x1e]] }
  0x51   : > { %250 = vrot.lane.b32.xlu1 %v242_v22, %s2868_s5  ;;  %v408_v45 = vmul.f32 0.0, %v407_v43  ;;  %v409_v46 = vmul.f32 %v407_v43, %v3036_v19  ;;  %v410_v47 = vmul.f32 %v407_v43, %v3032_v18  ;;  %v430_v49 = vmul.f32 0.0, %v429_v48  ;;  %s2591_s14 = sld [smem:[#allocation2 + $0x25]] }
  0x52   : > { %248 = vrot.lane.b32.xlu0 %v241_v23, %s2868_s5  ;;  %v431_v50 = vmul.f32 %v429_v48, %v3036_v19  ;;  %v432_v52 = vmul.f32 %v429_v48, %v3032_v18  ;;  %v452_v53 = vmul.f32 %v451_v51, %v3036_v19  ;;  %v453_v54 = vmul.f32 %v451_v51, %v3032_v18  ;;  %s2592_s20 = sld [smem:[#allocation2 + $0x2c]] }
  0x53   : > { %v454_v55 = vmul.f32 0.0, %v451_v51  ;;  %v473_v56 = vstv %s2584_s4  ;;  %v495_v59 = vstv %s2585_s6  ;;  %v548_v5 = vstv %s2587_s17  ;;  %s2594_s22 = sld [smem:[#allocation2 + $0xa]]  ;;  %s2874_s4 = smov 51  }
  0x54   : > { %v474_v57 = vmul.f32 %v473_v56, %v3036_v19  ;;  %v475_v58 = vmul.f32 %v473_v56, %v3032_v18  ;;  %v476_v60 = vmul.f32 0.0, %v473_v56  ;;  %v496_v61 = vmul.f32 %v495_v59, %v3036_v19  ;;  %s2595_s26 = sld [smem:[#allocation2 + $0x11]]  ;;  %s2875_s17 = smov 50  }
  0x55   : > { %271 = vrot.lane.b32.xlu1 %v264_v25, %s2870_s19  ;;  %v497_v62 = vmul.f32 %v495_v59, %v3032_v18  ;;  %v498_v63 = vmul.f32 0.0, %v495_v59  ;;  %v550_v7 = vmul.f32 %v548_v5, %v3036_v19  ;;  %v549_v10 = vmul.f32 0.0, %v548_v5  ;;  %s3128_s28 = sld [smem:[#allocation2 + $0x18]] }
  0x56   : > { %269 = vrot.lane.b32.xlu0 %v263_v26, %s2870_s19  ;;  %v570_v11 = vstv %s2588_s3  ;;  %v551_v15 = vmul.f32 %v548_v5, %v3032_v18  ;;  %v592_v20 = vstv %s2589_s15  ;;  %v614_v23 = vstv %s2590_s8  ;;  %s210_s30 = sld [smem:[#allocation2]] }
  0x57   : > { %v571_v14 = vmul.f32 0.0, %v570_v11  ;;  %v573_v16 = vmul.f32 %v570_v11, %v3032_v18  ;;  %v572_v17 = vmul.f32 %v570_v11, %v3036_v19  ;;  %v594_v21 = vmul.f32 %v592_v20, %v3036_v19  ;;  %s2579_s6 = sld [smem:[#allocation2 + $0x1]] }
  0x58   : > { %v593_v22 = vmul.f32 0.0, %v592_v20  ;;  %v615_v24 = vmul.f32 %v614_v23, %v3036_v19  ;;  %v595_v25 = vmul.f32 %v592_v20, %v3032_v18  ;;  %v617_v26 = vmul.f32 0.0, %v614_v23  ;;  %s2586_s3 = sld [smem:[#allocation2 + $0x2]] }
  0x59   : > { %292 = vrot.lane.b32.xlu1 %v286_v28, %s2871_s21  ;;  %v616_v27 = vmul.f32 %v614_v23, %v3032_v18  ;;  %v636_v28 = vstv %s2591_s14  ;;  %s2597_s15 = sld [smem:[#allocation2 + $0x1f]]  ;;  %s2876_s14 = smov 49  }
  0x5a   : > { %273 = vrot.lane.b32.xlu0 %v265_v29, %s2870_s19  ;;  %v638_v29 = vmul.f32 %v636_v28, %v3032_v18  ;;  %s2598_s8 = sld [smem:[#allocation2 + $0x26]] }
  0x5c   : > { %v3158_v56 = vstv %s210_s30  ;;  %s2603_s30 = sld [smem:[#allocation2 + $0x19]] }
  0x5d   : > { %296 = vrot.lane.b32.xlu1 %v288_v30, %s2871_s21  ;;  %v637_v30 = vmul.f32 %v636_v28, %v3036_v19 }
  0x5e   : > { %294 = vrot.lane.b32.xlu0 %v287_v31, %s2871_s21  ;;  %v658_v31 = vstv %s2592_s20  ;;  %s2599_s20 = sld [smem:[#allocation2 + $0x2d]] }
  0x5f   : > { %v659_v32 = vmul.f32 %v658_v31, %v3036_v19  ;;  %v660_v35 = vmul.f32 %v658_v31, %v3032_v18 }
  0x61   : > { %317 = vrot.lane.b32.xlu1 %v310_v33, %s2872_s23  ;;  %v639_v33 = vmul.f32 0.0, %v636_v28 }
  0x62   : > { %315 = vrot.lane.b32.xlu0 %v309_v34, %s2872_s23  ;;  %v661_v34 = vmul.f32 0.0, %v658_v31 }
  0x65   : > { %338 = vrot.lane.b32.xlu1 %v332_v36, %s2873_s27  ;;  %v709_v36 = vstv %s2594_s22  ;;  %s2593_s22 = sld [smem:[#allocation2 + $0x3]] }
  0x66   : > { %319 = vrot.lane.b32.xlu0 %v311_v37, %s2872_s23  ;;  %v710_v37 = vmul.f32 0.0, %v709_v36  ;;  %v712_v40 = vmul.f32 %v709_v36, %v3032_v18 }
  0x69   : > { %342 = vrot.lane.b32.xlu1 %v334_v38, %s2873_s27  ;;  %v711_v38 = vmul.f32 %v709_v36, %v3036_v19 }
  0x6a   : > { %340 = vrot.lane.b32.xlu0 %v333_v39, %s2873_s27  ;;  %v731_v39 = vstv %s2595_s26  ;;  %s2601_s26 = sld [smem:[#allocation2 + $0xb]] }
  0x6b   : > { %v734_v43 = vmul.f32 %v731_v39, %v3032_v18 }
  0x6d   : > { %392 = vrot.lane.b32.xlu1 %v386_v41, %s2869_s7  ;;  %v732_v41 = vmul.f32 0.0, %v731_v39 }
  0x6e   : > { %394 = vrot.lane.b32.xlu0 %v387_v42, %s2869_s7  ;;  %v733_v42 = vmul.f32 %v731_v39, %v3036_v19 }
  0x71   : > { %396 = vrot.lane.b32.xlu1 %v388_v44, %s2869_s7  ;;  %v753_v44 = vstv %s3128_s28  ;;  %s2602_s28 = sld [smem:[#allocation2 + $0x12]] }
  0x72   : > { %414 = vrot.lane.b32.xlu0 %v408_v45, %s2868_s5 }
  0x75   : > { %416 = vrot.lane.b32.xlu1 %v409_v46, %s2868_s5 }
  0x76   : > { %418 = vrot.lane.b32.xlu0 %v410_v47, %s2868_s5  ;;  %v754_v47 = vmul.f32 %v753_v44, %v3036_v19 }
  0x79   : > { %436 = vrot.lane.b32.xlu1 %v430_v49, %s2870_s19 }
  0x7a   : > { %438 = vrot.lane.b32.xlu0 %v431_v50, %s2870_s19 }
  0x7d   : > { %440 = vrot.lane.b32.xlu1 %v432_v52, %s2870_s19 }
  0x7e   : > { %458 = vrot.lane.b32.xlu0 %v452_v53, %s2871_s21 }
  0x81   : > { %460 = vrot.lane.b32.xlu1 %v453_v54, %s2871_s21 }
  0x82   : > { %462 = vrot.lane.b32.xlu0 %v454_v55, %s2871_s21 }
  0x85   : > { %480 = vrot.lane.b32.xlu1 %v474_v57, %s2872_s23 }
  0x86   : > { %482 = vrot.lane.b32.xlu0 %v475_v58, %s2872_s23  ;;  %v214_v58 = vmul.f32 %v3158_v56, %v3032_v18 }
  0x89   : > { %484 = vrot.lane.b32.xlu1 %v476_v60, %s2872_s23 }
  0x8a   : > { %502 = vrot.lane.b32.xlu0 %v496_v61, %s2873_s27 }
  0x8d   : > { %504 = vrot.lane.b32.xlu1 %v497_v62, %s2873_s27 }
  0x8e   : > { %506 = vrot.lane.b32.xlu0 %v498_v63, %s2873_s27 }
  0x91   : > { %557 = vrot.lane.b32.xlu1 %v550_v7, %s2869_s7 }
  0x92   : > { %555 = vrot.lane.b32.xlu0 %v549_v10, %s2869_s7 }
  0x95   : > { %577 = vrot.lane.b32.xlu1 %v571_v14, %s2868_s5 }
  0x96   : > { %559 = vrot.lane.b32.xlu0 %v551_v15, %s2869_s7 }
  0x99   : > { %581 = vrot.lane.b32.xlu1 %v573_v16, %s2868_s5 }
  0x9a   : > { %579 = vrot.lane.b32.xlu0 %v572_v17, %s2868_s5 }
  0x9d   : > { %601 = vrot.lane.b32.xlu1 %v594_v21, %s2870_s19 }
  0x9e   : > { %599 = vrot.lane.b32.xlu0 %v593_v22, %s2870_s19 }
  0xa1   : > { %621 = vrot.lane.b32.xlu1 %v615_v24, %s2871_s21 }
  0xa2   : > { %603 = vrot.lane.b32.xlu0 %v595_v25, %s2870_s19 }
  0xa5   : > { %625 = vrot.lane.b32.xlu1 %v617_v26, %s2871_s21 }
  0xa6   : > { %623 = vrot.lane.b32.xlu0 %v616_v27, %s2871_s21 }
  0xa9   : > { %645 = vrot.lane.b32.xlu1 %v638_v29, %s2872_s23 }
  0xaa   : > { %643 = vrot.lane.b32.xlu0 %v637_v30, %s2872_s23 }
  0xad   : > { %665 = vrot.lane.b32.xlu1 %v659_v32, %s2873_s27 }
  0xae   : > { %647 = vrot.lane.b32.xlu0 %v639_v33, %s2872_s23  ;;  %v3187_v33 = vstv %s2579_s6  ;;  %s2604_s6 = sld [smem:[#allocation2 + $0x20]] }
  0xb1   : > { %669 = vrot.lane.b32.xlu1 %v661_v34, %s2873_s27 }
  0xb2   : > { %667 = vrot.lane.b32.xlu0 %v660_v35, %s2873_s27  ;;  %v383_v35 = vmul.f32 %v3187_v33, %v3032_v18 }
  0xb5   : > { %716 = vrot.lane.b32.xlu1 %v710_v37, %s2869_s7 }
  0xb6   : > { %718 = vrot.lane.b32.xlu0 %v711_v38, %s2869_s7  ;;  %v213_v38 = vmul.f32 %v3158_v56, %v3036_v19 }
  0xb9   : > { %720 = vrot.lane.b32.xlu1 %v712_v40, %s2869_s7 }
  0xba   : > { %738 = vrot.lane.b32.xlu0 %v732_v41, %s2868_s5 }
  0xbb   : > { %v3138_v45 = vpop.permute.xlu1 %246 }
  0xbc   : > { %v3140_v46 = vpop.permute.xlu0 %223 }
  0xbd   : > { %740 = vrot.lane.b32.xlu1 %v733_v42, %s2868_s5  ;;  %v381_v42 = vmul.f32 0.0, %v3187_v33 }
  0xbe   : > { %742 = vrot.lane.b32.xlu0 %v734_v43, %s2868_s5 }
  0xbf   : > { %v228_v48 = vpop.permute.xlu1 %227 }
  0xc0   : > { %v3147_v49 = vpop.permute.xlu0 %225  ;;  %v237_v61 = vadd.f32 %v228_v48, %v214_v58 }
  0xc1   : > { %758 = vrot.lane.b32.xlu1 %v754_v47, %s2870_s19  ;;  %v231_v41 = vsel %vm229_vm3, %v3147_v49, %v228_v48 }
  0xc3   : > { %v251_v50 = vpop.permute.xlu1 %250 }
  0xc4   : > { %v3150_v51 = vpop.permute.xlu0 %248  ;;  %v260_v63 = vadd.f32 %v251_v50, %v237_v61 }
  0xc5   : > { %v254_v47 = vsel %vm252_vm4, %v3150_v51, %v251_v50 }
  0xc7   : > { %v3152_v52 = vpop.permute.xlu1 %271 }
  0xc8   : > { %v3154_v53 = vpop.permute.xlu0 %269 }
  0xcb   : > { %v3156_v54 = vpop.permute.xlu1 %292 }
  0xcc   : > { %v274_v55 = vpop.permute.xlu0 %273 }
  0xcd   : > { %v283_v10 = vadd.f32 %v274_v55, %v260_v63  ;;  %v236_v63 = vadd.f32 %v231_v41, %v213_v38  ;;  %v277_v48 = vsel %vm275_vm5, %v3152_v52, %v274_v55 }
  0xcf   : > { %v297_v57 = vpop.permute.xlu1 %296 }
  0xd0   : > { %v295_v59 = vpop.permute.xlu0 %294 }
  0xd1   : > { %v300_v5 = vsel %vm298_vm0, %v295_v59, %v297_v57 }
  0xd2   : > { %v306_v15 = vadd.f32 %v300_v5, %v283_v10 }
  0xd3   : > { %v3162_v60 = vpop.permute.xlu1 %317 }
  0xd4   : > { %v3164_v62 = vpop.permute.xlu0 %315 }
  0xd7   : > { %v3167_v7 = vpop.permute.xlu1 %338 }
  0xd8   : > { %v320_v11 = vpop.permute.xlu0 %319 }
  0xd9   : > { %v323_v14 = vsel %vm321_vm1, %v3162_v60, %v320_v11 }
  0xda   : > { %v329_v17 = vadd.f32 %v323_v14, %v306_v15  ;;  %v259_v14 = vadd.f32 %v254_v47, %v236_v63 }
  0xdb   : > { %v343_v16 = vpop.permute.xlu1 %342 }
  0xdc   : > { %v341_v20 = vpop.permute.xlu0 %340 }
  0xdd   : > { %v346_v21 = vsel %vm344_vm2, %v341_v20, %v343_v16 }
  0xde   : > { %v352_v22 = vadd.f32 %v346_v21, %v329_v17  ;;  %v299_v17 = vsel %vm298_vm0, %v3156_v54, %v295_v59  ;;  %v345_v59 = vsel %vm344_vm2, %v3167_v7, %v341_v20 }
  0xdf   : > { %v393_v23 = vpop.permute.xlu1 %392 }
  0xe0   : > { %360 = vrot.lane.b32.xlu0 %v352_v22, %s2874_s4  ;;  %v3173_v24 = vpop.permute.xlu0 %394 }
  0xe1   : > { %v398_v57 = vsel %vm229_vm3, %v393_v23, %v3173_v24  ;;  %v282_v23 = vadd.f32 %v277_v48, %v259_v14 }
  0xe2   : > { %v403_v15 = vadd.f32 %v398_v57, %v381_v42 }
  0xe3   : > { %v3175_v25 = vpop.permute.xlu1 %396 }
  0xe4   : > { %v415_v26 = vpop.permute.xlu0 %414  ;;  %v405_v39 = vadd.f32 %v3175_v25, %v383_v35 }
  0xe7   : > { %v3177_v27 = vpop.permute.xlu1 %416 }
  0xe8   : > { %v3179_v28 = vpop.permute.xlu0 %418  ;;  %v420_v11 = vsel %vm252_vm4, %v415_v26, %v3177_v27  ;;  %v322_v26 = vsel %vm321_vm1, %v3164_v62, %v3162_v60 }
  0xe9   : > { %v427_v43 = vadd.f32 %v3179_v28, %v405_v39  ;;  %v425_v35 = vadd.f32 %v420_v11, %v403_v15  ;;  %v305_v39 = vadd.f32 %v299_v17, %v282_v23 }
  0xeb   : > { %v437_v29 = vpop.permute.xlu1 %436 }
  0xec   : > { %v3181_v30 = vpop.permute.xlu0 %438 }
  0xed   : > { %v442_v21 = vsel %vm275_vm5, %v437_v29, %v3181_v30 }
  0xee   : > { %v447_v41 = vadd.f32 %v442_v21, %v425_v35  ;;  %v212_v21 = vmul.f32 0.0, %v3158_v56 }
  0xef   : > { %v3183_v31 = vpop.permute.xlu1 %440 }
  0xf0   : > { %v3185_v32 = vpop.permute.xlu0 %458  ;;  %v449_v5 = vadd.f32 %v3183_v31, %v427_v43  ;;  %v328_v43 = vadd.f32 %v322_v26, %v305_v39 }
  0xf1   : > { %v469_v57 = vadd.f32 %v3185_v32, %v447_v41 }
  0xf3   : > { %v3189_v34 = vpop.permute.xlu1 %460 }
  0xf4   : > { %v463_v36 = vpop.permute.xlu0 %462 }
  0xf5   : > { %v465_v58 = vsel %vm298_vm0, %v3189_v34, %v463_v36 }
  0xf6   : > { %v471_v16 = vadd.f32 %v465_v58, %v449_v5  ;;  %v351_v58 = vadd.f32 %v345_v59, %v328_v43 }
  0xf7   : > { %v3193_v37 = vpop.permute.xlu1 %480 }
  0xf8   : > { %v3198_v40 = vpop.permute.xlu0 %482  ;;  %v491_v60 = vadd.f32 %v3193_v37, %v469_v57  ;;  %v276_v57 = vsel %vm275_vm5, %v3154_v53, %v3152_v52  ;;  %v399_v52 = vsel %vm229_vm3, %v3173_v24, %v3175_v25 }
  0xfb   : > { %v485_v61 = vpop.permute.xlu1 %484 }
  0xfc   : > { %v3211_v10 = vpop.permute.xlu0 %502  ;;  %v487_v50 = vsel %vm321_vm1, %v3198_v40, %v485_v61 }
  0xfd   : > { %v493_v55 = vadd.f32 %v487_v50, %v471_v16  ;;  %v513_v5 = vadd.f32 %v3211_v10, %v491_v60  ;;  %v543_v16 = vstv %s2586_s3  ;;  %s2605_s3 = sld [smem:[#allocation2 + $0x27]] }
  0xfe   : > { %v545_v23 = vmul.f32 %v543_v16, %v3036_v19  ;;  %v546_v35 = vmul.f32 %v543_v16, %v3032_v18 }
  0xff   : > { %v3223_v22 = vpop.permute.xlu1 %504 }
 0x100   : > { %v507_v36 = vpop.permute.xlu0 %506 }
 0x101   : > { %v509_v38 = vsel %vm344_vm2, %v3223_v22, %v507_v36  ;;  %v230_v36 = vsel %vm229_vm3, %v3140_v46, %v3147_v49 }
 0x102   : > { %v515_v42 = vadd.f32 %v509_v38, %v493_v55  ;;  %v253_v38 = vsel %vm252_vm4, %v3138_v45, %v3150_v51  ;;  %v235_v56 = vadd.f32 %v230_v36, %v212_v21  ;;  %v544_v36 = vmul.f32 0.0, %v543_v16 }
 0x103   : > { %v558_v29 = vpop.permute.xlu1 %557  ;;  %v443_v16 = vsel %vm275_vm5, %v3181_v30, %v3183_v31 }
 0x104   : > { %523 = vrot.lane.b32.xlu1 %v515_v42, %s2875_s17  ;;  %v556_v47 = vpop.permute.xlu0 %555  ;;  %v258_v49 = vadd.f32 %v253_v38, %v235_v56 }
 0x106   : > { %v281_v1 = vadd.f32 %v276_v57, %v258_v49 }
 0x107   : > { %v578_v61 = vpop.permute.xlu1 %577 }
 0x108   : > { %v560_v63 = vpop.permute.xlu0 %559  ;;  %358 = vrot.lane.b32.xlu1 %v351_v58, %s2874_s4 }
 0x109   : > { %v562_v26 = vsel %vm229_vm3, %v558_v29, %v560_v63  ;;  %v568_v59 = vadd.f32 %v560_v63, %v546_v35  ;;  %v382_v63 = vmul.f32 %v3187_v33, %v3036_v19  ;;  %v561_v33 = vsel %vm229_vm3, %v556_v47, %v558_v29 }
 0x10a   : > { %v567_v42 = vadd.f32 %v562_v26, %v545_v23  ;;  %v566_v29 = vadd.f32 %v561_v33, %v544_v36 }
 0x10b   : > { %v582_v48 = vpop.permute.xlu1 %581  ;;  %v404_v56 = vadd.f32 %v399_v52, %v382_v63 }
 0x10c   : > { %v580_v11 = vpop.permute.xlu0 %579  ;;  %519 = vrot.lane.b32.xlu1 %v513_v5, %s2875_s17  ;;  %v590_v58 = vadd.f32 %v582_v48, %v568_v59 }
 0x10d   : > { %v584_v39 = vsel %vm252_vm4, %v580_v11, %v582_v48 }
 0x10e   : > { %v589_v60 = vadd.f32 %v584_v39, %v567_v42  ;;  %v304_v39 = vadd.f32 %v3156_v54, %v281_v1  ;;  %v464_v1 = vsel %vm298_vm0, %v3185_v32, %v3189_v34 }
 0x10f   : > { %v602_v20 = vpop.permute.xlu1 %601 }
 0x110   : > { %v600_v50 = vpop.permute.xlu0 %599  ;;  %v327_v30 = vadd.f32 %v3164_v62, %v304_v39  ;;  %v508_v62 = vsel %vm344_vm2, %v3211_v10, %v3223_v22  ;;  %v755_v10 = vmul.f32 %v753_v44, %v3032_v18 }
 0x111   : > { %v605_v54 = vsel %vm275_vm5, %v600_v50, %v602_v20 }
 0x112   : > { %v350_v32 = vadd.f32 %v3167_v7, %v327_v30 }
 0x113   : > { %v3238_v14 = vpop.permute.xlu1 %621 }
 0x114   : > { %v604_v15 = vpop.permute.xlu0 %603 }
 0x115   : > { %v606_v46 = vsel %vm275_vm5, %v602_v20, %v604_v15  ;;  %v612_v23 = vadd.f32 %v604_v15, %v590_v58  ;;  %v770_v15 = vstv %s2597_s15  ;;  %v792_v58 = vstv %s2598_s8  ;;  %s2606_s15 = sld [smem:[#allocation2 + $0x2e]] }
 0x116   : > { %v611_v21 = vadd.f32 %v606_v46, %v589_v60  ;;  %v771_v46 = vmul.f32 %v770_v15, %v3036_v19  ;;  %v773_v49 = vmul.f32 0.0, %v770_v15  ;;  %v794_v7 = vmul.f32 %v792_v58, %v3032_v18  ;;  %s2600_s8 = sld [smem:[#allocation2 + $0x4]] }
 0x117   : > { %v626_v17 = vpop.permute.xlu1 %625  ;;  %v795_v44 = vmul.f32 0.0, %v792_v58 }
 0x118   : > { %v624_v55 = vpop.permute.xlu0 %623 }
 0x119   : > { %v627_v45 = vsel %vm298_vm0, %v3238_v14, %v624_v55  ;;  %v628_v51 = vsel %vm298_vm0, %v624_v55, %v626_v17  ;;  %v421_v17 = vsel %vm252_vm4, %v3177_v27, %v3179_v28 }
 0x11a   : > { %v633_v26 = vadd.f32 %v627_v45, %v611_v21  ;;  %v634_v38 = vadd.f32 %v628_v51, %v612_v23  ;;  %v426_v28 = vadd.f32 %v421_v17, %v404_v56  ;;  %v814_v45 = vstv %s2599_s20  ;;  %s2608_s20 = sld [smem:[#allocation2 + $0xc]] }
 0x11b   : > { %v646_v41 = vpop.permute.xlu1 %645  ;;  %v815_v22 = vmul.f32 %v814_v45, %v3036_v19  ;;  %v816_v63 = vmul.f32 %v814_v45, %v3032_v18  ;;  %v704_v56 = vstv %s2593_s22  ;;  %s2609_s22 = sld [smem:[#allocation2 + $0x13]] }
 0x11c   : > { %v644_v43 = vpop.permute.xlu0 %643  ;;  %v448_v31 = vadd.f32 %v443_v16, %v426_v28 }
 0x11d   : > { %v649_v53 = vsel %vm321_vm1, %v644_v43, %v646_v41 }
 0x11e   : > { %v655_v42 = vadd.f32 %v649_v53, %v633_v26  ;;  %v470_v34 = vadd.f32 %v464_v1, %v448_v31  ;;  %v707_v1 = vmul.f32 %v704_v56, %v3032_v18 }
 0x11f   : > { %v666_v5 = vpop.permute.xlu1 %665 }
 0x120   : > { %v648_v35 = vpop.permute.xlu0 %647 }
 0x121   : > { %v650_v48 = vsel %vm321_vm1, %v646_v41, %v648_v35  ;;  %v583_v41 = vsel %vm252_vm4, %v578_v61, %v580_v11  ;;  %v486_v11 = vsel %vm321_vm1, %v3193_v37, %v3198_v40 }
 0x122   : > { %v656_v24 = vadd.f32 %v650_v48, %v634_v38  ;;  %v588_v61 = vadd.f32 %v583_v41, %v566_v29  ;;  %v492_v50 = vadd.f32 %v486_v11, %v470_v34 }
 0x123   : > { %v670_v55 = vpop.permute.xlu1 %669 }
 0x124   : > { %v668_v25 = vpop.permute.xlu0 %667  ;;  %v610_v20 = vadd.f32 %v605_v54, %v588_v61  ;;  %v514_v37 = vadd.f32 %v508_v62, %v492_v50 }
 0x125   : > { %v671_v59 = vsel %vm344_vm2, %v666_v5, %v668_v25  ;;  %v672_v27 = vsel %vm344_vm2, %v668_v25, %v670_v55  ;;  %v705_v25 = vmul.f32 0.0, %v704_v56 }
 0x126   : > { %v678_v47 = vadd.f32 %v672_v27, %v656_v24  ;;  %v677_v57 = vadd.f32 %v671_v59, %v655_v42  ;;  %v632_v60 = vadd.f32 %v3238_v14, %v610_v20  ;;  %v772_v14 = vmul.f32 %v770_v15, %v3032_v18 }
 0x127   : > { %v717_v21 = vpop.permute.xlu1 %716 }
 0x128   : > { %686 = vrot.lane.b32.xlu0 %v678_v47, %s2876_s14  ;;  %684 = vrot.lane.b32.xlu1 %v677_v57, %s2876_s14  ;;  %v654_v40 = vadd.f32 %v644_v43, %v632_v60  ;;  %v817_v43 = vmul.f32 0.0, %v814_v45  ;;  %v719_v52 = vpop.permute.xlu0 %718  ;;  %v706_v57 = vmul.f32 %v704_v56, %v3036_v19 }
 0x129   : > { %v722_v16 = vsel %vm229_vm3, %v717_v21, %v719_v52 }
 0x12a   : > { %v676_v51 = vadd.f32 %v666_v5, %v654_v40  ;;  %v793_v5 = vmul.f32 %v792_v58, %v3036_v19  ;;  %v727_v27 = vadd.f32 %v722_v16, %v705_v25  ;;  %v888_v25 = vstv %s2602_s28  ;;  %s2610_s28 = sld [smem:[#allocation2 + $0x1a]] }
 0x12b   : > { %v721_v23 = vpop.permute.xlu1 %720 }
 0x12c   : > { %356 = vrot.lane.b32.xlu0 %v350_v32, %s2874_s4  ;;  %777 = vrot.lane.b32.xlu1 %v771_v46, %s2871_s21  ;;  %v739_v48 = vpop.permute.xlu0 %738  ;;  %v723_v46 = vsel %vm229_vm3, %v719_v52, %v721_v23  ;;  %v729_v11 = vadd.f32 %v721_v23, %v707_v1  ;;  %v932_v1 = vstv %s2604_s6  ;;  %s2612_s6 = sld [smem:[#allocation2 + $0x28]] }
 0x12d   : > { %v728_v61 = vadd.f32 %v723_v46, %v706_v57  ;;  %v933_v46 = vmul.f32 %v932_v1, %v3036_v19 }
 0x12f   : > { %v741_v35 = vpop.permute.xlu1 %740 }
 0x130   : > { %521 = vrot.lane.b32.xlu0 %v514_v37, %s2875_s17  ;;  %781 = vrot.lane.b32.xlu1 %v773_v49, %s2871_s21  ;;  %v743_v26 = vpop.permute.xlu0 %742  ;;  %v744_v28 = vsel %vm252_vm4, %v739_v48, %v741_v35 }
 0x131   : > { %v749_v47 = vadd.f32 %v744_v28, %v727_v27  ;;  %v745_v32 = vsel %vm252_vm4, %v741_v35, %v743_v26  ;;  %v751_v60 = vadd.f32 %v743_v26, %v729_v11  ;;  %v890_v27 = vmul.f32 %v888_v25, %v3036_v19 }
 0x132   : > { %v750_v58 = vadd.f32 %v745_v32, %v728_v61  ;;  %v891_v28 = vmul.f32 %v888_v25, %v3032_v18  ;;  %v954_v61 = vstv %s2605_s3  ;;  %s2613_s3 = sld [smem:[#allocation2 + $0x2f]] }
 0x133   : > { %v759_v53 = vpop.permute.xlu1 %758  ;;  %v955_v11 = vmul.f32 %v954_v61, %v3036_v19  ;;  %v956_v32 = vmul.f32 %v954_v61, %v3032_v18 }
 0x134   : > { %682 = vrot.lane.b32.xlu0 %v676_v51, %s2876_s14  ;;  %801 = vrot.lane.b32.xlu1 %v794_v7, %s2872_s23  ;;  %v766_v31 = vadd.f32 %v759_v53, %v749_v47 }
 0x138   : > { %760 = vrot.lane.b32.xlu0 %v755_v10, %s2870_s19  ;;  %821 = vrot.lane.b32.xlu1 %v815_v22, %s2873_s27 }
 0x13c   : > { %779 = vrot.lane.b32.xlu0 %v772_v14, %s2871_s21  ;;  %825 = vrot.lane.b32.xlu1 %v817_v43, %s2873_s27 }
 0x140   : > { %799 = vrot.lane.b32.xlu0 %v793_v5, %s2872_s23 }
 0x144   : > { %803 = vrot.lane.b32.xlu0 %v795_v44, %s2872_s23 }
 0x148   : > { %823 = vrot.lane.b32.xlu0 %v816_v63, %s2873_s27 }
 0x152   : > { %v3317_v17 = vpop.permute.xlu0 %360 }
 0x176   : > { %v3313_v36 = vpop.permute.xlu1 %523 }
 0x17a   : > { %v3315_v38 = vpop.permute.xlu1 %358 }
 0x17e   : > { %v3319_v33 = vpop.permute.xlu1 %519 }
 0x19a   : > { %v3321_v55 = vpop.permute.xlu0 %686  ;;  %v3323_v15 = vpop.permute.xlu1 %684 }
 0x19e   : > { %v3325_v39 = vpop.permute.xlu0 %356  ;;  %v778_v42 = vpop.permute.xlu1 %777 }
 0x19f   : > { %v788_v34 = vadd.f32 %v778_v42, %v766_v31  ;;  %v935_v31 = vmul.f32 0.0, %v932_v1 }
 0x1a2   : > { %v3327_v24 = vpop.permute.xlu0 %521  ;;  %v782_v59 = vpop.permute.xlu1 %781 }
 0x1a6   : > { %v3330_v41 = vpop.permute.xlu0 %682  ;;  %v802_v54 = vpop.permute.xlu1 %801 }
 0x1aa   : > { %v761_v29 = vpop.permute.xlu0 %760  ;;  %v822_v62 = vpop.permute.xlu1 %821 }
 0x1ab   : > { %v762_v50 = vsel %vm275_vm5, %v759_v53, %v761_v29  ;;  %v768_v51 = vadd.f32 %v761_v29, %v751_v60  ;;  %v866_v53 = vstv %s2601_s26  ;;  %v910_v29 = vstv %s2603_s30  ;;  %s2877_s26 = smov 47   ;;  %s2611_s30 = sld [smem:[#allocation2 + $0x21]] }
 0x1ac   : > { %v767_v45 = vadd.f32 %v762_v50, %v750_v58  ;;  %v867_v56 = vmul.f32 0.0, %v866_v53  ;;  %v869_v16 = vmul.f32 %v866_v53, %v3032_v18  ;;  %v911_v47 = vmul.f32 %v910_v29, %v3036_v19 }
 0x1ad   : > { %v912_v57 = vmul.f32 %v910_v29, %v3032_v18 }
 0x1ae   : > { %v780_v30 = vpop.permute.xlu0 %779  ;;  %v826_v44 = vpop.permute.xlu1 %825 }
 0x1af   : > { %v783_v37 = vsel %vm298_vm0, %v778_v42, %v780_v30  ;;  %v784_v40 = vsel %vm298_vm0, %v780_v30, %v782_v59  ;;  %v868_v42 = vmul.f32 %v866_v53, %v3036_v19  ;;  %v889_v59 = vmul.f32 0.0, %v888_v25 }
 0x1b0   : > { %v789_v43 = vadd.f32 %v783_v37, %v767_v45  ;;  %v790_v5 = vadd.f32 %v784_v40, %v768_v51  ;;  %v934_v30 = vmul.f32 %v932_v1, %v3032_v18 }
 0x1b2   : > { %v800_v20 = vpop.permute.xlu0 %799 }
 0x1b3   : > { %v810_v49 = vadd.f32 %v800_v20, %v788_v34  ;;  %v805_v22 = vsel %vm321_vm1, %v800_v20, %v802_v54  ;;  %v976_v34 = vstv %s2606_s15  ;;  %v957_v20 = vmul.f32 0.0, %v954_v61  ;;  %s2607_s15 = sld [smem:[#allocation2 + $0x5]] }
 0x1b4   : > { %v811_v63 = vadd.f32 %v805_v22, %v789_v43  ;;  %v978_v50 = vmul.f32 %v976_v34, %v3032_v18 }
 0x1b5   : > { %v832_v7 = vadd.f32 %v822_v62, %v810_v49  ;;  %v979_v49 = vmul.f32 0.0, %v976_v34 }
 0x1b6   : > { %v804_v10 = vpop.permute.xlu0 %803 }
 0x1b7   : > { %v806_v14 = vsel %vm321_vm1, %v802_v54, %v804_v10  ;;  %838 = vrot.lane.b32.xlu0 %v832_v7, %s2872_s23  ;;  %v913_v54 = vmul.f32 0.0, %v910_v29 }
 0x1b8   : > { %v812_v21 = vadd.f32 %v806_v14, %v790_v5  ;;  %v861_v14 = vstv %s2600_s8  ;;  %s2615_s8 = sld [smem:[#allocation2 + $0xd]] }
 0x1ba   : > { %v824_v23 = vpop.permute.xlu0 %823 }
 0x1bb   : > { %v827_v35 = vsel %vm344_vm2, %v822_v62, %v824_v23  ;;  %v828_v52 = vsel %vm344_vm2, %v824_v23, %v826_v44  ;;  %v977_v62 = vmul.f32 %v976_v34, %v3036_v19  ;;  %v862_v44 = vmul.f32 0.0, %v861_v14 }
 0x1bc   : > { %v834_v48 = vadd.f32 %v828_v52, %v812_v21  ;;  %v833_v26 = vadd.f32 %v827_v35, %v811_v63 }
 0x1be   : > { %840 = vrot.lane.b32.xlu1 %v833_v26, %s2872_s23  ;;  %842 = vrot.lane.b32.xlu0 %v834_v48, %s2872_s23  ;;  %v863_v48 = vmul.f32 %v861_v14, %v3036_v19  ;;  %v864_v26 = vmul.f32 %v861_v14, %v3032_v18 }
 0x1c2   : > { %873 = vrot.lane.b32.xlu1 %v867_v56, %s2869_s7  ;;  %875 = vrot.lane.b32.xlu0 %v868_v42, %s2869_s7 }
 0x1c6   : > { %877 = vrot.lane.b32.xlu1 %v869_v16, %s2869_s7  ;;  %895 = vrot.lane.b32.xlu0 %v889_v59, %s2868_s5 }
 0x1ca   : > { %897 = vrot.lane.b32.xlu1 %v890_v27, %s2868_s5  ;;  %899 = vrot.lane.b32.xlu0 %v891_v28, %s2868_s5 }
 0x1ce   : > { %917 = vrot.lane.b32.xlu1 %v911_v47, %s2870_s19  ;;  %919 = vrot.lane.b32.xlu0 %v912_v57, %s2870_s19 }
 0x1d2   : > { %921 = vrot.lane.b32.xlu1 %v913_v54, %s2870_s19  ;;  %939 = vrot.lane.b32.xlu0 %v933_v46, %s2871_s21 }
 0x1d6   : > { %941 = vrot.lane.b32.xlu1 %v934_v30, %s2871_s21  ;;  %943 = vrot.lane.b32.xlu0 %v935_v31, %s2871_s21 }
 0x1da   : > { %961 = vrot.lane.b32.xlu1 %v955_v11, %s2872_s23  ;;  %963 = vrot.lane.b32.xlu0 %v956_v32, %s2872_s23 }
 0x1de   : > { %965 = vrot.lane.b32.xlu1 %v957_v20, %s2872_s23  ;;  %983 = vrot.lane.b32.xlu0 %v977_v62, %s2873_s27 }
 0x1e2   : > { %985 = vrot.lane.b32.xlu1 %v978_v50, %s2873_s27  ;;  %987 = vrot.lane.b32.xlu0 %v979_v49, %s2873_s27 }
 0x229   : > { %v3377_v58 = vpop.permute.xlu0 %838 }
 0x230   : > { %v3379_v60 = vpop.permute.xlu0 %842  ;;  %v3381_v37 = vpop.permute.xlu1 %840 }
 0x234   : > { %v876_v40 = vpop.permute.xlu0 %875  ;;  %v874_v7 = vpop.permute.xlu1 %873 }
 0x235   : > { %v879_v63 = vsel %vm229_vm3, %v874_v7, %v876_v40 }
 0x236   : > { %v884_v52 = vadd.f32 %v879_v63, %v862_v44  ;;  %v1029_v44 = vstv %s2608_s20  ;;  %s2616_s20 = sld [smem:[#allocation2 + $0x14]] }
 0x238   : > { %v896_v45 = vpop.permute.xlu0 %895  ;;  %v878_v51 = vpop.permute.xlu1 %877 }
 0x239   : > { %v880_v25 = vsel %vm229_vm3, %v876_v40, %v878_v51  ;;  %v886_v28 = vadd.f32 %v878_v51, %v864_v26 }
 0x23a   : > { %v885_v27 = vadd.f32 %v880_v25, %v863_v48  ;;  %v1032_v48 = vmul.f32 %v1029_v44, %v3032_v18 }
 0x23c   : > { %v900_v10 = vpop.permute.xlu0 %899  ;;  %v898_v22 = vpop.permute.xlu1 %897 }
 0x23d   : > { %v901_v21 = vsel %vm252_vm4, %v896_v45, %v898_v22  ;;  %v902_v16 = vsel %vm252_vm4, %v898_v22, %v900_v10  ;;  %v908_v46 = vadd.f32 %v900_v10, %v886_v28 }
 0x23e   : > { %v906_v53 = vadd.f32 %v901_v21, %v884_v52  ;;  %v907_v30 = vadd.f32 %v902_v16, %v885_v27  ;;  %v1051_v52 = vstv %s2609_s22  ;;  %s2878_s22 = smov 46  }
 0x23f   : > { %v1054_v26 = vmul.f32 %v1051_v52, %v3032_v18 }
 0x240   : > { %v920_v43 = vpop.permute.xlu0 %919  ;;  %v918_v5 = vpop.permute.xlu1 %917 }
 0x241   : > { %v928_v59 = vadd.f32 %v918_v5, %v906_v53  ;;  %v923_v57 = vsel %vm275_vm5, %v918_v5, %v920_v43  ;;  %v1052_v53 = vmul.f32 0.0, %v1051_v52 }
 0x242   : > { %v929_v32 = vadd.f32 %v923_v57, %v907_v30  ;;  %v1117_v57 = vstv %s2612_s6  ;;  %s2619_s6 = sld [smem:[#allocation2 + $0x29]] }
 0x244   : > { %v940_v23 = vpop.permute.xlu0 %939  ;;  %v922_v35 = vpop.permute.xlu1 %921 }
 0x245   : > { %v950_v1 = vadd.f32 %v940_v23, %v928_v59  ;;  %v924_v54 = vsel %vm275_vm5, %v920_v43, %v922_v35  ;;  %v1030_v35 = vmul.f32 0.0, %v1029_v44  ;;  %v1095_v59 = vstv %s2611_s30  ;;  %s2618_s30 = sld [smem:[#allocation2 + $0x22]] }
 0x246   : > { %v930_v34 = vadd.f32 %v924_v54, %v908_v46  ;;  %v1096_v27 = vmul.f32 %v1095_v59, %v3036_v19  ;;  %v1118_v54 = vmul.f32 %v1117_v57, %v3036_v19  ;;  %v1139_v46 = vstv %s2613_s3  ;;  %s2620_s3 = sld [smem:[#allocation2 + $0x30]] }
 0x247   : > { %v1140_v30 = vmul.f32 %v1139_v46, %v3036_v19 }
 0x248   : > { %v944_v56 = vpop.permute.xlu0 %943  ;;  %v942_v42 = vpop.permute.xlu1 %941 }
 0x249   : > { %v945_v31 = vsel %vm298_vm0, %v940_v23, %v942_v42  ;;  %v946_v61 = vsel %vm298_vm0, %v942_v42, %v944_v56  ;;  %v1031_v23 = vmul.f32 %v1029_v44, %v3036_v19  ;;  %v1053_v56 = vmul.f32 %v1051_v52, %v3036_v19 }
 0x24a   : > { %v951_v7 = vadd.f32 %v945_v31, %v929_v32  ;;  %v952_v45 = vadd.f32 %v946_v61, %v930_v34  ;;  %v1073_v42 = vstv %s2610_s28  ;;  %v1120_v31 = vmul.f32 0.0, %v1117_v57  ;;  %s2617_s28 = sld [smem:[#allocation2 + $0x1b]] }
 0x24b   : > { %v1075_v25 = vmul.f32 %v1073_v42, %v3032_v18  ;;  %v1074_v16 = vmul.f32 %v1073_v42, %v3036_v19  ;;  %v1076_v28 = vmul.f32 0.0, %v1073_v42  ;;  %v1142_v61 = vmul.f32 0.0, %v1139_v46 }
 0x24c   : > { %v964_v29 = vpop.permute.xlu0 %963  ;;  %v962_v47 = vpop.permute.xlu1 %961 }
 0x24d   : > { %v972_v11 = vadd.f32 %v962_v47, %v950_v1  ;;  %v967_v50 = vsel %vm321_vm1, %v962_v47, %v964_v29  ;;  %v1097_v47 = vmul.f32 %v1095_v59, %v3032_v18  ;;  %v1119_v1 = vmul.f32 %v1117_v57, %v3032_v18 }
 0x24e   : > { %v973_v51 = vadd.f32 %v967_v50, %v951_v7 }
 0x250   : > { %v984_v20 = vpop.permute.xlu0 %983  ;;  %v966_v62 = vpop.permute.xlu1 %965 }
 0x251   : > { %v994_v49 = vadd.f32 %v984_v20, %v972_v11  ;;  %v968_v40 = vsel %vm321_vm1, %v964_v29, %v966_v62  ;;  %v1098_v29 = vmul.f32 0.0, %v1095_v59  ;;  %v1141_v11 = vmul.f32 %v1139_v46, %v3032_v18 }
 0x252   : > { %v974_v10 = vadd.f32 %v968_v40, %v952_v45 }
 0x253   : > { %1000 = vrot.lane.b32.xlu1 %v994_v49, %s2877_s26 }
 0x254   : > { %v988_v22 = vpop.permute.xlu0 %987  ;;  %v986_v14 = vpop.permute.xlu1 %985 }
 0x255   : > { %v989_v43 = vsel %vm344_vm2, %v984_v20, %v986_v14  ;;  %v990_v5 = vsel %vm344_vm2, %v986_v14, %v988_v22 }
 0x256   : > { %v995_v63 = vadd.f32 %v989_v43, %v973_v51  ;;  %v996_v21 = vadd.f32 %v990_v5, %v974_v10  ;;  %v1024_v51 = vstv %s2607_s15  ;;  %s2614_s15 = sld [smem:[#allocation2 + $0x6]] }
 0x257   : > { %v1025_v14 = vmul.f32 0.0, %v1024_v51  ;;  %v1027_v52 = vmul.f32 %v1024_v51, %v3032_v18 }
 0x258   : > { %1004 = vrot.lane.b32.xlu1 %v996_v21, %s2877_s26  ;;  %1002 = vrot.lane.b32.xlu0 %v995_v63, %s2877_s26 }
 0x25c   : > { %1038 = vrot.lane.b32.xlu1 %v1031_v23, %s2869_s7  ;;  %1036 = vrot.lane.b32.xlu0 %v1030_v35, %s2869_s7  ;;  %v1026_v35 = vmul.f32 %v1024_v51, %v3036_v19 }
 0x260   : > { %1058 = vrot.lane.b32.xlu1 %v1052_v53, %s2868_s5  ;;  %1040 = vrot.lane.b32.xlu0 %v1032_v48, %s2869_s7 }
 0x264   : > { %1062 = vrot.lane.b32.xlu1 %v1054_v26, %s2868_s5  ;;  %1060 = vrot.lane.b32.xlu0 %v1053_v56, %s2868_s5 }
 0x268   : > { %1082 = vrot.lane.b32.xlu1 %v1075_v25, %s2870_s19  ;;  %1080 = vrot.lane.b32.xlu0 %v1074_v16, %s2870_s19 }
 0x26c   : > { %1102 = vrot.lane.b32.xlu1 %v1096_v27, %s2871_s21  ;;  %1084 = vrot.lane.b32.xlu0 %v1076_v28, %s2870_s19 }
 0x270   : > { %1106 = vrot.lane.b32.xlu1 %v1098_v29, %s2871_s21  ;;  %1104 = vrot.lane.b32.xlu0 %v1097_v47, %s2871_s21 }
 0x274   : > { %1126 = vrot.lane.b32.xlu1 %v1119_v1, %s2872_s23  ;;  %1124 = vrot.lane.b32.xlu0 %v1118_v54, %s2872_s23 }
 0x278   : > { %1146 = vrot.lane.b32.xlu1 %v1140_v30, %s2873_s27  ;;  %1128 = vrot.lane.b32.xlu0 %v1120_v31, %s2872_s23 }
 0x27c   : > { %1150 = vrot.lane.b32.xlu1 %v1142_v61, %s2873_s27  ;;  %1148 = vrot.lane.b32.xlu0 %v1141_v11, %s2873_s27 }
 0x2c5   : > { %v3430_v32 = vpop.permute.xlu1 %1000 }
 0x2c6   : > { %4168 = vst [vmem:[#allocation12_spill] sm:$0xff] %v3430_v32 }
 0x2ca   : > { %v3432_v34 = vpop.permute.xlu0 %1002  ;;  %v3434_v20 = vpop.permute.xlu1 %1004 }
 0x2cb   : > { %4169 = vst [vmem:[#allocation13_spill] sm:$0xff] %v3432_v34  ;;  %4170 = vst [vmem:[#allocation14_spill] sm:$0xff] %v3434_v20 }
 0x2ce   : > { %v1037_v62 = vpop.permute.xlu0 %1036  ;;  %v1039_v50 = vpop.permute.xlu1 %1038 }
 0x2cf   : > { %v1042_v43 = vsel %vm229_vm3, %v1037_v62, %v1039_v50 }
 0x2d0   : > { %v1047_v21 = vadd.f32 %v1042_v43, %v1025_v14 }
 0x2d2   : > { %v1041_v49 = vpop.permute.xlu0 %1040  ;;  %v1059_v40 = vpop.permute.xlu1 %1058 }
 0x2d3   : > { %v1043_v26 = vsel %vm229_vm3, %v1039_v50, %v1041_v49  ;;  %v1049_v16 = vadd.f32 %v1041_v49, %v1027_v52  ;;  %v1214_v52 = vstv %s2616_s20  ;;  %s2623_s20 = sld [smem:[#allocation2 + $0x3f]] }
 0x2d4   : > { %v1048_v25 = vadd.f32 %v1043_v26, %v1026_v35  ;;  %v1216_v26 = vmul.f32 %v1214_v52, %v3036_v19 }
 0x2d6   : > { %v1061_v7 = vpop.permute.xlu0 %1060  ;;  %v1063_v45 = vpop.permute.xlu1 %1062 }
 0x2d7   : > { %v1064_v5 = vsel %vm252_vm4, %v1059_v40, %v1061_v7  ;;  %v1065_v56 = vsel %vm252_vm4, %v1061_v7, %v1063_v45  ;;  %v1071_v1 = vadd.f32 %v1063_v45, %v1049_v16 }
 0x2d8   : > { %v1069_v23 = vadd.f32 %v1064_v5, %v1047_v21  ;;  %v1070_v57 = vadd.f32 %v1065_v56, %v1048_v25  ;;  %v1217_v56 = vmul.f32 %v1214_v52, %v3032_v18 }
 0x2da   : > { %v1081_v10 = vpop.permute.xlu0 %1080  ;;  %v1083_v22 = vpop.permute.xlu1 %1082 }
 0x2db   : > { %v1091_v42 = vadd.f32 %v1081_v10, %v1069_v23  ;;  %v1086_v28 = vsel %vm275_vm5, %v1081_v10, %v1083_v22 }
 0x2dc   : > { %v1092_v31 = vadd.f32 %v1086_v28, %v1070_v57  ;;  %v1280_v57 = vstv %s2619_s6  ;;  %s2625_s6 = sld [smem:[#allocation2 + $0x4d]] }
 0x2de   : > { %v1085_v44 = vpop.permute.xlu0 %1084  ;;  %v1103_v63 = vpop.permute.xlu1 %1102 }
 0x2df   : > { %v1087_v29 = vsel %vm275_vm5, %v1083_v22, %v1085_v44  ;;  %v1113_v47 = vadd.f32 %v1103_v63, %v1091_v42  ;;  %v1192_v44 = vstv %s2615_s8  ;;  %v1236_v42 = vstv %s2617_s28  ;;  %s2622_s8 = sld [smem:[#allocation2 + $0x38]]  ;;  %s2879_s28 = smov 45  }
 0x2e0   : > { %v1093_v61 = vadd.f32 %v1087_v29, %v1071_v1  ;;  %v1193_v23 = vmul.f32 0.0, %v1192_v44  ;;  %v1194_v35 = vmul.f32 %v1192_v44, %v3036_v19  ;;  %v1237_v25 = vmul.f32 %v1236_v42, %v3036_v19 }
 0x2e1   : > { %v1238_v16 = vmul.f32 %v1236_v42, %v3032_v18  ;;  %v1281_v1 = vmul.f32 %v1280_v57, %v3036_v19 }
 0x2e2   : > { %v1105_v53 = vpop.permute.xlu0 %1104  ;;  %v1107_v48 = vpop.permute.xlu1 %1106 }
 0x2e3   : > { %v1108_v54 = vsel %vm298_vm0, %v1103_v63, %v1105_v53  ;;  %v1109_v46 = vsel %vm298_vm0, %v1105_v53, %v1107_v48  ;;  %v1195_v53 = vmul.f32 %v1192_v44, %v3032_v18  ;;  %v1215_v48 = vmul.f32 0.0, %v1214_v52 }
 0x2e4   : > { %v1114_v7 = vadd.f32 %v1108_v54, %v1092_v31  ;;  %v1115_v51 = vadd.f32 %v1109_v46, %v1093_v61  ;;  %v1282_v54 = vmul.f32 %v1280_v57, %v3032_v18  ;;  %v3481_v46 = vmax.f32 %v178_v6, %v182_v8 }
 0x2e5   : > { %v1283_v31 = vmul.f32 0.0, %v1280_v57 }
 0x2e6   : > { %v1125_v59 = vpop.permute.xlu0 %1124  ;;  %v1127_v27 = vpop.permute.xlu1 %1126 }
 0x2e7   : > { %v1135_v30 = vadd.f32 %v1125_v59, %v1113_v47  ;;  %v1130_v50 = vsel %vm321_vm1, %v1125_v59, %v1127_v27  ;;  %v1258_v59 = vstv %s2618_s30  ;;  %s2624_s30 = sld [smem:[#allocation2 + $0x46]] }
 0x2e8   : > { %v1136_v45 = vadd.f32 %v1130_v50, %v1114_v7  ;;  %v1259_v28 = vmul.f32 %v1258_v59, %v3036_v19  ;;  %v1260_v29 = vmul.f32 %v1258_v59, %v3032_v18  ;;  %v1261_v47 = vmul.f32 0.0, %v1258_v59 }
 0x2e9   : > { %v1187_v7 = vstv %s2614_s15  ;;  %s2627_s15 = sld [smem:[#allocation2 + $0x5b]] }
 0x2ea   : > { %v1129_v11 = vpop.permute.xlu0 %1128  ;;  %v1147_v62 = vpop.permute.xlu1 %1146 }
 0x2eb   : > { %v1131_v49 = vsel %vm321_vm1, %v1127_v27, %v1129_v11  ;;  %v1157_v40 = vadd.f32 %v1147_v62, %v1135_v30  ;;  %v1239_v27 = vmul.f32 0.0, %v1236_v42  ;;  %v1302_v30 = vstv %s2620_s3  ;;  %s2626_s3 = sld [smem:[#allocation2 + $0x54]] }
 0x2ec   : > { %v1137_v10 = vadd.f32 %v1131_v49, %v1115_v51  ;;  %v1303_v61 = vmul.f32 %v1302_v30, %v3036_v19  ;;  %v1304_v11 = vmul.f32 %v1302_v30, %v3032_v18  ;;  %v1305_v2 = vmul.f32 0.0, %v1302_v30 }
 0x2ed   : > { %1163 = vrot.lane.b32.xlu0 %v1157_v40, %s2878_s22 }
 0x2ee   : > { %v1149_v22 = vpop.permute.xlu0 %1148  ;;  %v1151_v14 = vpop.permute.xlu1 %1150 }
 0x2ef   : > { %v1152_v43 = vsel %vm344_vm2, %v1147_v62, %v1149_v22  ;;  %v1153_v5 = vsel %vm344_vm2, %v1149_v22, %v1151_v14 }
 0x2f0   : > { %v1158_v63 = vadd.f32 %v1152_v43, %v1136_v45  ;;  %v1159_v21 = vadd.f32 %v1153_v5, %v1137_v10  ;;  %v1188_v10 = vmul.f32 0.0, %v1187_v7 }
 0x2f2   : > { %1165 = vrot.lane.b32.xlu1 %v1158_v63, %s2878_s22  ;;  %1167 = vrot.lane.b32.xlu0 %v1159_v21, %s2878_s22  ;;  %v1189_v21 = vmul.f32 %v1187_v7, %v3036_v19 }
 0x2f6   : > { %1199 = vrot.lane.b32.xlu1 %v1193_v23, %s2869_s7  ;;  %1201 = vrot.lane.b32.xlu0 %v1194_v35, %s2869_s7  ;;  %v1190_v23 = vmul.f32 %v1187_v7, %v3032_v18  ;;  %v3513_v7 = vrot.slane %v3481_v46, %v194_v13  ;;  %v1380_v13 = vstv %s2623_s20  ;;  %s2629_s20 = sld [smem:[#allocation2 + $0x39]] }
 0x2fa   : > { %1203 = vrot.lane.b32.xlu1 %v1195_v53, %s2869_s7  ;;  %1221 = vrot.lane.b32.xlu0 %v1215_v48, %s2868_s5 }
 0x2fe   : > { %1223 = vrot.lane.b32.xlu1 %v1216_v26, %s2868_s5  ;;  %1225 = vrot.lane.b32.xlu0 %v1217_v56, %s2868_s5 }
 0x302   : > { %1243 = vrot.lane.b32.xlu1 %v1237_v25, %s2870_s19  ;;  %1245 = vrot.lane.b32.xlu0 %v1238_v16, %s2870_s19 }
 0x306   : > { %1247 = vrot.lane.b32.xlu1 %v1239_v27, %s2870_s19  ;;  %1265 = vrot.lane.b32.xlu0 %v1259_v28, %s2871_s21 }
 0x30a   : > { %1267 = vrot.lane.b32.xlu1 %v1260_v29, %s2871_s21  ;;  %1269 = vrot.lane.b32.xlu0 %v1261_v47, %s2871_s21 }
 0x30e   : > { %1287 = vrot.lane.b32.xlu1 %v1281_v1, %s2872_s23  ;;  %1289 = vrot.lane.b32.xlu0 %v1282_v54, %s2872_s23 }
 0x312   : > { %1291 = vrot.lane.b32.xlu1 %v1283_v31, %s2872_s23  ;;  %1309 = vrot.lane.b32.xlu0 %v1303_v61, %s2873_s27 }
 0x316   : > { %1311 = vrot.lane.b32.xlu1 %v1304_v11, %s2873_s27  ;;  %1313 = vrot.lane.b32.xlu0 %v1305_v2, %s2873_s27 }
 0x35f   : > { %v3491_v0 = vpop.permute.xlu0 %1163 }
 0x360   : > { %4171 = vst [vmem:[#allocation15_spill] sm:$0xff] %v3491_v0 }
 0x364   : > { %v3493_v3 = vpop.permute.xlu0 %1167  ;;  %v3495_v4 = vpop.permute.xlu1 %1165 }
 0x365   : > { %4172 = vst [vmem:[#allocation16_spill] sm:$0xff] %v3493_v3  ;;  %4173 = vst [vmem:[#allocation17_spill] sm:$0xff] %v3495_v4 }
 0x368   : > { %v1202_v6 = vpop.permute.xlu0 %1201  ;;  %v1200_v8 = vpop.permute.xlu1 %1199 }
 0x369   : > { %v1205_v22 = vsel %vm229_vm3, %v1200_v8, %v1202_v6 }
 0x36a   : > { %v1210_v44 = vadd.f32 %v1205_v22, %v1188_v10  ;;  %v1358_v10 = vstv %s2622_s8  ;;  %s2621_s8 = sld [smem:[#allocation2 + $0x31]] }
 0x36c   : > { %v1222_v62 = vpop.permute.xlu0 %1221  ;;  %v1204_v50 = vpop.permute.xlu1 %1203 }
 0x36d   : > { %v1206_v53 = vsel %vm229_vm3, %v1202_v6, %v1204_v50  ;;  %v1212_v42 = vadd.f32 %v1204_v50, %v1190_v23 }
 0x36e   : > { %v1211_v56 = vadd.f32 %v1206_v53, %v1189_v21  ;;  %v1424_v53 = vstv %s2625_s6  ;;  %s2631_s6 = sld [smem:[#allocation2 + $0x47]] }
 0x370   : > { %v1226_v49 = vpop.permute.xlu0 %1225  ;;  %v1224_v40 = vpop.permute.xlu1 %1223 }
 0x371   : > { %v1227_v14 = vsel %vm252_vm4, %v1222_v62, %v1224_v40  ;;  %v1228_v48 = vsel %vm252_vm4, %v1224_v40, %v1226_v49  ;;  %v1234_v19 = vadd.f32 %v1226_v49, %v1212_v42 }
 0x372   : > { %v1232_v63 = vadd.f32 %v1227_v14, %v1210_v44  ;;  %v1233_v29 = vadd.f32 %v1228_v48, %v1211_v56  ;;  %v3523_v44 = vrot.slane %v3481_v46, %v198_v12  ;;  %v1402_v12 = vstv %s2624_s30  ;;  %s2630_s30 = sld [smem:[#allocation2 + $0x40]] }
 0x373   : > { %v1404_v46 = vmul.f32 %v1402_v12, %v3513_v7  ;;  %v1425_v48 = vmul.f32 %v1424_v53, %v3513_v7  ;;  %v1427_v56 = vmul.f32 0.0, %v1424_v53 }
 0x374   : > { %v1246_v51 = vpop.permute.xlu0 %1245  ;;  %v1244_v45 = vpop.permute.xlu1 %1243  ;;  %v1361_v21 = vmul.f32 %v1358_v10, %v3523_v44  ;;  %v1383_v23 = vmul.f32 %v1380_v13, %v3523_v44  ;;  %v1426_v42 = vmul.f32 %v1424_v53, %v3523_v44 }
 0x375   : > { %v1254_v26 = vadd.f32 %v1244_v45, %v1232_v63  ;;  %v1249_v59 = vsel %vm275_vm5, %v1244_v45, %v1246_v51  ;;  %v1381_v63 = vmul.f32 0.0, %v1380_v13 }
 0x376   : > { %v1255_v1 = vadd.f32 %v1249_v59, %v1233_v29 }
 0x378   : > { %v1266_v43 = vpop.permute.xlu0 %1265  ;;  %v1248_v5 = vpop.permute.xlu1 %1247 }
 0x379   : > { %v1276_v27 = vadd.f32 %v1266_v43, %v1254_v26  ;;  %v1250_v28 = vsel %vm275_vm5, %v1246_v51, %v1248_v5  ;;  %v1359_v5 = vmul.f32 0.0, %v1358_v10  ;;  %v1405_v26 = vmul.f32 %v1402_v12, %v3523_v44 }
 0x37a   : > { %v1256_v54 = vadd.f32 %v1250_v28, %v1234_v19 }
 0x37c   : > { %v1270_v35 = vpop.permute.xlu0 %1269  ;;  %v1268_v52 = vpop.permute.xlu1 %1267 }
 0x37d   : > { %v1271_v18 = vsel %vm298_vm0, %v1266_v43, %v1268_v52  ;;  %v1272_v47 = vsel %vm298_vm0, %v1268_v52, %v1270_v35  ;;  %v1360_v43 = vmul.f32 %v1358_v10, %v3513_v7  ;;  %v1382_v35 = vmul.f32 %v1380_v13, %v3513_v7 }
 0x37e   : > { %v1277_v6 = vadd.f32 %v1271_v18, %v1255_v1  ;;  %v1278_v8 = vadd.f32 %v1272_v47, %v1256_v54  ;;  %v1403_v52 = vmul.f32 0.0, %v1402_v12 }
 0x380   : > { %v1290_v25 = vpop.permute.xlu0 %1289  ;;  %v1288_v16 = vpop.permute.xlu1 %1287 }
 0x381   : > { %v1298_v57 = vadd.f32 %v1288_v16, %v1276_v27  ;;  %v1293_v61 = vsel %vm321_vm1, %v1288_v16, %v1290_v25  ;;  %v1468_v27 = vstv %s2627_s15  ;;  %s2634_s15 = sld [smem:[#allocation2 + $0x5c]] }
 0x382   : > { %v1299_v62 = vadd.f32 %v1293_v61, %v1277_v6  ;;  %v1469_v28 = vmul.f32 %v1468_v27, %v3513_v7  ;;  %v1471_v29 = vmul.f32 0.0, %v1468_v27  ;;  %v1470_v18 = vmul.f32 %v1468_v27, %v3523_v44 }
 0x383   : > { %v1353_v6 = vstv %s2621_s8  ;;  %s2628_s8 = sld [smem:[#allocation2 + $0x32]] }
 0x384   : > { %v1310_v30 = vpop.permute.xlu0 %1309  ;;  %v1292_v31 = vpop.permute.xlu1 %1291 }
 0x385   : > { %v1320_v11 = vadd.f32 %v1310_v30, %v1298_v57  ;;  %v1294_v2 = vsel %vm321_vm1, %v1290_v25, %v1292_v31  ;;  %v1446_v25 = vstv %s2626_s3  ;;  %s2632_s3 = sld [smem:[#allocation2 + $0x4e]] }
 0x386   : > { %v1300_v50 = vadd.f32 %v1294_v2, %v1278_v8  ;;  %v1448_v16 = vmul.f32 %v1446_v25, %v3523_v44  ;;  %v1447_v59 = vmul.f32 %v1446_v25, %v3513_v7  ;;  %v1449_v19 = vmul.f32 0.0, %v1446_v25 }
 0x387   : > { %1326 = vrot.lane.b32.xlu1 %v1320_v11, %s2879_s28 }
 0x388   : > { %v1314_v49 = vpop.permute.xlu0 %1313  ;;  %v1312_v40 = vpop.permute.xlu1 %1311 }
 0x389   : > { %v1315_v51 = vsel %vm344_vm2, %v1310_v30, %v1312_v40  ;;  %v1316_v45 = vsel %vm344_vm2, %v1312_v40, %v1314_v49 }
 0x38a   : > { %v1321_v22 = vadd.f32 %v1315_v51, %v1299_v62  ;;  %v1322_v14 = vadd.f32 %v1316_v45, %v1300_v50  ;;  %v1354_v50 = vmul.f32 0.0, %v1353_v6 }
 0x38c   : > { %1330 = vrot.lane.b32.xlu1 %v1322_v14, %s2879_s28  ;;  %1328 = vrot.lane.b32.xlu0 %v1321_v22, %s2879_s28 }
 0x390   : > { %1367 = vrot.lane.b32.xlu1 %v1360_v43, %s2869_s7  ;;  %1365 = vrot.lane.b32.xlu0 %v1359_v5, %s2869_s7  ;;  %v1355_v43 = vmul.f32 %v1353_v6, %v3513_v7  ;;  %v1356_v5 = vmul.f32 %v1353_v6, %v3523_v44 }
 0x394   : > { %1387 = vrot.lane.b32.xlu1 %v1381_v63, %s2868_s5  ;;  %1369 = vrot.lane.b32.xlu0 %v1361_v21, %s2869_s7 }
 0x398   : > { %1391 = vrot.lane.b32.xlu1 %v1383_v23, %s2868_s5  ;;  %1389 = vrot.lane.b32.xlu0 %v1382_v35, %s2868_s5 }
 0x39c   : > { %1411 = vrot.lane.b32.xlu1 %v1404_v46, %s2870_s19  ;;  %1409 = vrot.lane.b32.xlu0 %v1403_v52, %s2870_s19 }
 0x3a0   : > { %1431 = vrot.lane.b32.xlu1 %v1425_v48, %s2871_s21  ;;  %1413 = vrot.lane.b32.xlu0 %v1405_v26, %s2870_s19 }
 0x3a4   : > { %1435 = vrot.lane.b32.xlu1 %v1427_v56, %s2871_s21  ;;  %1433 = vrot.lane.b32.xlu0 %v1426_v42, %s2871_s21 }
 0x3a8   : > { %1455 = vrot.lane.b32.xlu1 %v1448_v16, %s2872_s23  ;;  %1453 = vrot.lane.b32.xlu0 %v1447_v59, %s2872_s23 }
 0x3ac   : > { %1475 = vrot.lane.b32.xlu1 %v1469_v28, %s2873_s27  ;;  %1457 = vrot.lane.b32.xlu0 %v1449_v19, %s2872_s23 }
 0x3b0   : > { %1479 = vrot.lane.b32.xlu1 %v1471_v29, %s2873_s27  ;;  %1477 = vrot.lane.b32.xlu0 %v1470_v18, %s2873_s27 }
 0x3f9   : > { %v3554_v47 = vpop.permute.xlu1 %1326 }
 0x3fa   : > { %4174 = vst [vmem:[#allocation18_spill] sm:$0xff] %v3554_v47 }
 0x3fe   : > { %v3556_v57 = vpop.permute.xlu0 %1328  ;;  %v3558_v1 = vpop.permute.xlu1 %1330 }
 0x3ff   : > { %4175 = vst [vmem:[#allocation19_spill] sm:$0xff] %v3556_v57  ;;  %4176 = vst [vmem:[#allocation20_spill] sm:$0xff] %v3558_v1 }
 0x402   : > { %v1366_v54 = vpop.permute.xlu0 %1365  ;;  %v1368_v30 = vpop.permute.xlu1 %1367 }
 0x403   : > { %v1371_v49 = vsel %vm229_vm3, %v1366_v54, %v1368_v30 }
 0x404   : > { %v1376_v10 = vadd.f32 %v1371_v49, %v1354_v50  ;;  %v1512_v49 = vstv %s2629_s20  ;;  %s2636_s20 = sld [smem:[#allocation2 + $0x3a]] }
 0x406   : > { %v1370_v31 = vpop.permute.xlu0 %1369  ;;  %v1388_v61 = vpop.permute.xlu1 %1387 }
 0x407   : > { %v1372_v21 = vsel %vm229_vm3, %v1368_v30, %v1370_v31  ;;  %v1378_v46 = vadd.f32 %v1370_v31, %v1356_v5 }
 0x408   : > { %v1377_v12 = vadd.f32 %v1372_v21, %v1355_v43 }
 0x40a   : > { %v1390_v11 = vpop.permute.xlu0 %1389  ;;  %v1392_v2 = vpop.permute.xlu1 %1391 }
 0x40b   : > { %v1393_v40 = vsel %vm252_vm4, %v1388_v61, %v1390_v11  ;;  %v1394_v35 = vsel %vm252_vm4, %v1390_v11, %v1392_v2  ;;  %v1400_v42 = vadd.f32 %v1392_v2, %v1378_v46 }
 0x40c   : > { %v1398_v14 = vadd.f32 %v1393_v40, %v1376_v10  ;;  %v1399_v56 = vadd.f32 %v1394_v35, %v1377_v12  ;;  %v1514_v10 = vmul.f32 %v1512_v49, %v3513_v7  ;;  %v1578_v35 = vstv %s2632_s3  ;;  %s2639_s3 = sld [smem:[#allocation2 + $0x4f]] }
 0x40d   : > { %v1579_v46 = vmul.f32 %v1578_v35, %v3513_v7 }
 0x40e   : > { %v1410_v8 = vpop.permute.xlu0 %1409  ;;  %v1412_v62 = vpop.permute.xlu1 %1411 }
 0x40f   : > { %v1415_v22 = vsel %vm275_vm5, %v1410_v8, %v1412_v62 }
 0x410   : > { %v1420_v23 = vadd.f32 %v1415_v22, %v1398_v14  ;;  %v1534_v22 = vstv %s2630_s30  ;;  %v1515_v14 = vmul.f32 %v1512_v49, %v3523_v44  ;;  %s2637_s30 = sld [smem:[#allocation2 + $0x41]] }
 0x411   : > { %v1535_v43 = vmul.f32 0.0, %v1534_v22  ;;  %v1536_v5 = vmul.f32 %v1534_v22, %v3513_v7 }
 0x412   : > { %v1414_v51 = vpop.permute.xlu0 %1413  ;;  %v1432_v45 = vpop.permute.xlu1 %1431 }
 0x413   : > { %v1416_v48 = vsel %vm275_vm5, %v1412_v62, %v1414_v51  ;;  %v1442_v26 = vadd.f32 %v1432_v45, %v1420_v23  ;;  %v1422_v28 = vadd.f32 %v1414_v51, %v1400_v42  ;;  %v1622_v42 = vstv %s2634_s15  ;;  %s2650_s15 = sld [smem:[#allocation2 + $0x3c]] }
 0x414   : > { %v1421_v27 = vadd.f32 %v1416_v48, %v1399_v56 }
 0x416   : > { %v1434_v13 = vpop.permute.xlu0 %1433  ;;  %v1436_v63 = vpop.permute.xlu1 %1435 }
 0x417   : > { %v1437_v25 = vsel %vm298_vm0, %v1432_v45, %v1434_v13  ;;  %v1438_v16 = vsel %vm298_vm0, %v1434_v13, %v1436_v63  ;;  %v1513_v45 = vmul.f32 0.0, %v1512_v49  ;;  %v1537_v13 = vmul.f32 %v1534_v22, %v3523_v44 }
 0x418   : > { %v1443_v31 = vadd.f32 %v1437_v25, %v1421_v27  ;;  %v1444_v61 = vadd.f32 %v1438_v16, %v1422_v28  ;;  %v1556_v63 = vstv %s2631_s6  ;;  %v1623_v16 = vmul.f32 %v1622_v42, %v3513_v7  ;;  %s2638_s6 = sld [smem:[#allocation2 + $0x48]] }
 0x419   : > { %v1557_v21 = vmul.f32 0.0, %v1556_v63  ;;  %v1558_v23 = vmul.f32 %v1556_v63, %v3513_v7  ;;  %v1559_v12 = vmul.f32 %v1556_v63, %v3523_v44  ;;  %v1625_v27 = vmul.f32 0.0, %v1622_v42 }
 0x41a   : > { %v1454_v52 = vpop.permute.xlu0 %1453  ;;  %v1456_v53 = vpop.permute.xlu1 %1455 }
 0x41b   : > { %v1464_v59 = vadd.f32 %v1454_v52, %v1442_v26  ;;  %v1459_v18 = vsel %vm321_vm1, %v1454_v52, %v1456_v53  ;;  %v1580_v52 = vmul.f32 %v1578_v35, %v3523_v44 }
 0x41c   : > { %v1465_v11 = vadd.f32 %v1459_v18, %v1443_v31 }
 0x41e   : > { %v1458_v19 = vpop.permute.xlu0 %1457  ;;  %v1476_v29 = vpop.permute.xlu1 %1475 }
 0x41f   : > { %v1460_v54 = vsel %vm321_vm1, %v1456_v53, %v1458_v19  ;;  %v1486_v30 = vadd.f32 %v1476_v29, %v1464_v59  ;;  %v1581_v53 = vmul.f32 0.0, %v1578_v35  ;;  %v1624_v59 = vmul.f32 %v1622_v42, %v3523_v44 }
 0x420   : > { %v1466_v2 = vadd.f32 %v1460_v54, %v1444_v61 }
 0x421   : > { %1492 = vrot.lane.b32.xlu0 %v1486_v30, %s2874_s4 }
 0x422   : > { %v1478_v6 = vpop.permute.xlu0 %1477  ;;  %v1480_v8 = vpop.permute.xlu1 %1479 }
 0x423   : > { %v1481_v62 = vsel %vm344_vm2, %v1476_v29, %v1478_v6  ;;  %v1482_v50 = vsel %vm344_vm2, %v1478_v6, %v1480_v8 }
 0x424   : > { %v1487_v40 = vadd.f32 %v1481_v62, %v1465_v11  ;;  %v1488_v51 = vadd.f32 %v1482_v50, %v1466_v2  ;;  %v1507_v2 = vstv %s2628_s8  ;;  %s2644_s8 = sld [smem:[#allocation2 + $0x42]] }
 0x425   : > { %v1508_v62 = vmul.f32 0.0, %v1507_v2 }
 0x426   : > { %1494 = vrot.lane.b32.xlu1 %v1487_v40, %s2874_s4  ;;  %1496 = vrot.lane.b32.xlu0 %v1488_v51, %s2874_s4  ;;  %s2633_s4 = sld [smem:[#allocation2 + $0x55]] }
 0x42a   : > { %1519 = vrot.lane.b32.xlu1 %v1513_v45, %s2869_s7  ;;  %1521 = vrot.lane.b32.xlu0 %v1514_v10, %s2869_s7 }
 0x42c   : > { %v1600_v48 = vstv %s2633_s4  ;;  %s2643_s4 = sld [smem:[#allocation2 + $0x3b]] }
 0x42d   : > { %v1601_v26 = vmul.f32 %v1600_v48, %v3513_v7  ;;  %v1602_v56 = vmul.f32 %v1600_v48, %v3523_v44  ;;  %v1603_v25 = vmul.f32 0.0, %v1600_v48 }
 0x42e   : > { %1523 = vrot.lane.b32.xlu1 %v1515_v14, %s2869_s7  ;;  %1541 = vrot.lane.b32.xlu0 %v1535_v43, %s2868_s5  ;;  %v1509_v14 = vmul.f32 %v1507_v2, %v3513_v7  ;;  %v1510_v43 = vmul.f32 %v1507_v2, %v3523_v44 }
 0x432   : > { %1543 = vrot.lane.b32.xlu1 %v1536_v5, %s2868_s5  ;;  %1545 = vrot.lane.b32.xlu0 %v1537_v13, %s2868_s5 }
 0x436   : > { %1563 = vrot.lane.b32.xlu1 %v1557_v21, %s2870_s19  ;;  %1565 = vrot.lane.b32.xlu0 %v1558_v23, %s2870_s19 }
 0x43a   : > { %1567 = vrot.lane.b32.xlu1 %v1559_v12, %s2870_s19  ;;  %1585 = vrot.lane.b32.xlu0 %v1579_v46, %s2871_s21 }
 0x43e   : > { %1587 = vrot.lane.b32.xlu1 %v1580_v52, %s2871_s21  ;;  %1589 = vrot.lane.b32.xlu0 %v1581_v53, %s2871_s21 }
 0x442   : > { %1607 = vrot.lane.b32.xlu1 %v1601_v26, %s2872_s23  ;;  %1609 = vrot.lane.b32.xlu0 %v1602_v56, %s2872_s23 }
 0x446   : > { %1611 = vrot.lane.b32.xlu1 %v1603_v25, %s2872_s23  ;;  %1629 = vrot.lane.b32.xlu0 %v1623_v16, %s2873_s27 }
 0x44a   : > { %1631 = vrot.lane.b32.xlu1 %v1624_v59, %s2873_s27  ;;  %1633 = vrot.lane.b32.xlu0 %v1625_v27, %s2873_s27 }
 0x493   : > { %v3607_v28 = vpop.permute.xlu0 %1492 }
 0x494   : > { %4177 = vst [vmem:[#allocation21_spill] sm:$0xff] %v3607_v28 }
 0x498   : > { %v3609_v19 = vpop.permute.xlu0 %1496  ;;  %v3611_v29 = vpop.permute.xlu1 %1494 }
 0x499   : > { %4178 = vst [vmem:[#allocation22_spill] sm:$0xff] %v3609_v19  ;;  %4179 = vst [vmem:[#allocation23_spill] sm:$0xff] %v3611_v29 }
 0x49c   : > { %v1522_v18 = vpop.permute.xlu0 %1521  ;;  %v1520_v54 = vpop.permute.xlu1 %1519 }
 0x49d   : > { %v1525_v50 = vsel %vm229_vm3, %v1520_v54, %v1522_v18 }
 0x49e   : > { %v1530_v45 = vadd.f32 %v1525_v50, %v1508_v62 }
 0x4a0   : > { %v1542_v30 = vpop.permute.xlu0 %1541  ;;  %v1524_v31 = vpop.permute.xlu1 %1523 }
 0x4a1   : > { %v1526_v63 = vsel %vm229_vm3, %v1522_v18, %v1524_v31  ;;  %v1532_v12 = vadd.f32 %v1524_v31, %v1510_v43  ;;  %v1688_v43 = vstv %s2637_s30  ;;  %s2657_s30 = sld [smem:[#allocation2 + $0x3d]] }
 0x4a2   : > { %v1531_v35 = vadd.f32 %v1526_v63, %v1509_v14  ;;  %v1691_v63 = vmul.f32 %v1688_v43, %v3523_v44 }
 0x4a4   : > { %v1546_v61 = vpop.permute.xlu0 %1545  ;;  %v1544_v11 = vpop.permute.xlu1 %1543 }
 0x4a5   : > { %v1547_v49 = vsel %vm252_vm4, %v1542_v30, %v1544_v11  ;;  %v1548_v23 = vsel %vm252_vm4, %v1544_v11, %v1546_v61  ;;  %v1554_v26 = vadd.f32 %v1546_v61, %v1532_v12 }
 0x4a6   : > { %v1552_v22 = vadd.f32 %v1547_v49, %v1530_v45  ;;  %v1553_v56 = vadd.f32 %v1548_v23, %v1531_v35  ;;  %v1710_v23 = vstv %s2638_s6  ;;  %s2645_s6 = sld [smem:[#allocation2 + $0x49]] }
 0x4a7   : > { %v1712_v35 = vmul.f32 %v1710_v23, %v3513_v7  ;;  %v1711_v12 = vmul.f32 0.0, %v1710_v23 }
 0x4a8   : > { %v1566_v6 = vpop.permute.xlu0 %1565  ;;  %v1564_v8 = vpop.permute.xlu1 %1563 }
 0x4a9   : > { %v1569_v10 = vsel %vm275_vm5, %v1564_v8, %v1566_v6 }
 0x4aa   : > { %v1574_v21 = vadd.f32 %v1569_v10, %v1552_v22 }
 0x4ac   : > { %v1586_v40 = vpop.permute.xlu0 %1585  ;;  %v1568_v51 = vpop.permute.xlu1 %1567 }
 0x4ad   : > { %v1596_v53 = vadd.f32 %v1586_v40, %v1574_v21  ;;  %v1570_v48 = vsel %vm275_vm5, %v1566_v6, %v1568_v51  ;;  %v1576_v27 = vadd.f32 %v1568_v51, %v1554_v26  ;;  %v1666_v51 = vstv %s2636_s20  ;;  %s2651_s20 = sld [smem:[#allocation2 + $0x43]] }
 0x4ae   : > { %v1575_v59 = vadd.f32 %v1570_v48, %v1553_v56  ;;  %v1668_v22 = vmul.f32 %v1666_v51, %v3513_v7  ;;  %v1667_v14 = vmul.f32 0.0, %v1666_v51  ;;  %v1690_v21 = vmul.f32 %v1688_v43, %v3513_v7 }
 0x4b0   : > { %v1590_v5 = vpop.permute.xlu0 %1589  ;;  %v1588_v13 = vpop.permute.xlu1 %1587 }
 0x4b1   : > { %v1591_v42 = vsel %vm298_vm0, %v1586_v40, %v1588_v13  ;;  %v1592_v25 = vsel %vm298_vm0, %v1588_v13, %v1590_v5  ;;  %v1689_v5 = vmul.f32 0.0, %v1688_v43  ;;  %v1669_v13 = vmul.f32 %v1666_v51, %v3523_v44 }
 0x4b2   : > { %v1597_v2 = vadd.f32 %v1591_v42, %v1575_v59  ;;  %v1598_v6 = vadd.f32 %v1592_v25, %v1576_v27  ;;  %v2123_v51 = vstv %s2657_s30  ;;  %v1864_v43 = vstv %s2645_s6  ;;  %s2659_s30 = sld [smem:[#allocation2 + $0x4b]] }
 0x4b3   : > { %s2647_s6 = sld [smem:[#allocation2 + $0x57]] }
 0x4b4   : > { %v1610_v46 = vpop.permute.xlu0 %1609  ;;  %v1608_v52 = vpop.permute.xlu1 %1607 }
 0x4b5   : > { %v1618_v16 = vadd.f32 %v1608_v52, %v1596_v53  ;;  %v1613_v30 = vsel %vm321_vm1, %v1608_v52, %v1610_v46  ;;  %v1713_v53 = vmul.f32 %v1710_v23, %v3523_v44 }
 0x4b6   : > { %v1619_v61 = vadd.f32 %v1613_v30, %v1597_v2  ;;  %v1969_v30 = vstv %s2650_s15  ;;  %v1842_v2 = vstv %s2644_s8  ;;  %s2646_s15 = sld [smem:[#allocation2 + $0x50]] }
 0x4b7   : > { %s2641_s8 = sld [smem:[#allocation2 + $0x5d]] }
 0x4b8   : > { %v1630_v18 = vpop.permute.xlu0 %1629  ;;  %v1612_v54 = vpop.permute.xlu1 %1611 }
 0x4b9   : > { %v1640_v31 = vadd.f32 %v1630_v18, %v1618_v16  ;;  %v1614_v11 = vsel %vm321_vm1, %v1610_v46, %v1612_v54  ;;  %v1732_v46 = vstv %s2639_s3  ;;  %v1820_v16 = vstv %s2643_s4  ;;  %s2652_s3 = sld [smem:[#allocation2 + $0x4a]] }
 0x4ba   : > { %v1620_v8 = vadd.f32 %v1614_v11, %v1598_v6  ;;  %v1733_v52 = vmul.f32 %v1732_v46, %v3513_v7  ;;  %v1735_v48 = vmul.f32 0.0, %v1732_v46  ;;  %v1734_v26 = vmul.f32 %v1732_v46, %v3523_v44  ;;  %s2664_s4 = sld [smem:[#allocation2 + $0x3e]] }
 0x4bb   : > { %1646 = vrot.lane.b32.xlu1 %v1640_v31, %s2875_s17  ;;  %v1821_v59 = vmul.f32 0.0, %v1820_v16  ;;  %v1822_v54 = vmul.f32 %v1820_v16, %v3513_v7  ;;  %v1971_v31 = vmul.f32 %v1969_v30, %v3513_v7  ;;  %v1970_v11 = vmul.f32 0.0, %v1969_v30 }
 0x4bc   : > { %v1634_v62 = vpop.permute.xlu0 %1633  ;;  %v1632_v50 = vpop.permute.xlu1 %1631  ;;  %v1843_v6 = vmul.f32 0.0, %v1842_v2 }
 0x4bd   : > { %v1635_v49 = vsel %vm344_vm2, %v1630_v18, %v1632_v50  ;;  %v1636_v40 = vsel %vm344_vm2, %v1632_v50, %v1634_v62  ;;  %v1823_v18 = vmul.f32 %v1820_v16, %v3523_v44  ;;  %v1844_v62 = vmul.f32 %v1842_v2, %v3513_v7 }
 0x4be   : > { %v1641_v45 = vadd.f32 %v1635_v49, %v1619_v61  ;;  %v1642_v10 = vadd.f32 %v1636_v40, %v1620_v8  ;;  %v1972_v61 = vmul.f32 %v1969_v30, %v3523_v44  ;;  %v1845_v8 = vmul.f32 %v1842_v2, %v3523_v44 }
 0x4bf   : > { %v1991_v50 = vstv %s2651_s20  ;;  %s2653_s20 = sld [smem:[#allocation2 + $0x51]] }
 0x4c0   : > { %1650 = vrot.lane.b32.xlu1 %v1642_v10, %s2875_s17  ;;  %1648 = vrot.lane.b32.xlu0 %v1641_v45, %s2875_s17  ;;  %s2640_s17 = sld [smem:[#allocation2 + $0x56]]  ;;  %v1993_v49 = vmul.f32 %v1991_v50, %v3513_v7  ;;  %v1992_v40 = vmul.f32 0.0, %v1991_v50  ;;  %v2124_v45 = vmul.f32 0.0, %v2123_v51  ;;  %v1994_v10 = vmul.f32 %v1991_v50, %v3523_v44 }
 0x4c4   : > { %1675 = vrot.lane.b32.xlu1 %v1668_v22, %s2869_s7  ;;  %1673 = vrot.lane.b32.xlu0 %v1667_v14, %s2869_s7  ;;  %v2126_v22 = vmul.f32 %v2123_v51, %v3523_v44  ;;  %v2125_v14 = vmul.f32 %v2123_v51, %v3513_v7 }
 0x4c6   : > { %v1754_v56 = vstv %s2640_s17  ;;  %s2658_s17 = sld [smem:[#allocation2 + $0x44]] }
 0x4c7   : > { %v1756_v42 = vmul.f32 %v1754_v56, %v3523_v44  ;;  %v1755_v25 = vmul.f32 %v1754_v56, %v3513_v7  ;;  %v1757_v27 = vmul.f32 0.0, %v1754_v56 }
 0x4c8   : > { %1695 = vrot.lane.b32.xlu1 %v1689_v5, %s2868_s5  ;;  %1677 = vrot.lane.b32.xlu0 %v1669_v13, %s2869_s7  ;;  %v1866_v5 = vmul.f32 %v1864_v43, %v3523_v44  ;;  %v1865_v13 = vmul.f32 %v1864_v43, %v3513_v7 }
 0x4cc   : > { %1699 = vrot.lane.b32.xlu1 %v1691_v63, %s2868_s5  ;;  %1697 = vrot.lane.b32.xlu0 %v1690_v21, %s2868_s5  ;;  %v2013_v63 = vstv %s2652_s3  ;;  %s2654_s3 = sld [smem:[#allocation2 + $0x58]] }
 0x4cd   : > { %v2015_v21 = vmul.f32 %v2013_v63, %v3523_v44  ;;  %v2014_v23 = vmul.f32 %v2013_v63, %v3513_v7  ;;  %v2016_v46 = vmul.f32 0.0, %v2013_v63 }
 0x4d0   : > { %1719 = vrot.lane.b32.xlu1 %v1712_v35, %s2870_s19  ;;  %1717 = vrot.lane.b32.xlu0 %v1711_v12, %s2870_s19  ;;  %v2145_v35 = vstv %s2658_s17  ;;  %s2635_s17 = sld [smem:[#allocation2 + $0x33]] }
 0x4d1   : > { %v2146_v12 = vmul.f32 0.0, %v2145_v35 }
 0x4d4   : > { %1739 = vrot.lane.b32.xlu1 %v1733_v52, %s2871_s21  ;;  %1721 = vrot.lane.b32.xlu0 %v1713_v53, %s2870_s19  ;;  %v2148_v52 = vmul.f32 %v2145_v35, %v3523_v44  ;;  %v2147_v53 = vmul.f32 %v2145_v35, %v3513_v7 }
 0x4d8   : > { %1743 = vrot.lane.b32.xlu1 %v1735_v48, %s2871_s21  ;;  %1741 = vrot.lane.b32.xlu0 %v1734_v26, %s2871_s21  ;;  %v2277_v48 = vstv %s2664_s4  ;;  %s2660_s4 = sld [smem:[#allocation2 + $0x52]] }
 0x4d9   : > { %v2279_v26 = vmul.f32 %v2277_v48, %v3513_v7  ;;  %v2278_v56 = vmul.f32 0.0, %v2277_v48  ;;  %v2280_v16 = vmul.f32 %v2277_v48, %v3523_v44  ;;  %v1661_v48 = vstv %s2635_s17  ;;  %s2669_s17 = sld [smem:[#allocation2 + $0x61]] }
 0x4dc   : > { %1763 = vrot.lane.b32.xlu1 %v1756_v42, %s2872_s23  ;;  %1761 = vrot.lane.b32.xlu0 %v1755_v25, %s2872_s23  ;;  %v1881_v42 = vstv %s2646_s15  ;;  %s2666_s15 = sld [smem:[#allocation2 + $0x4c]] }
 0x4dd   : > { %v1882_v25 = vmul.f32 %v1881_v42, %v3513_v7 }
 0x4e0   : > { %1827 = vrot.lane.b32.xlu1 %v1821_v59, %s2869_s7  ;;  %1765 = vrot.lane.b32.xlu0 %v1757_v27, %s2872_s23  ;;  %v1884_v59 = vmul.f32 0.0, %v1881_v42  ;;  %v1883_v27 = vmul.f32 %v1881_v42, %v3523_v44 }
 0x4e4   : > { %1831 = vrot.lane.b32.xlu1 %v1823_v18, %s2869_s7  ;;  %1829 = vrot.lane.b32.xlu0 %v1822_v54, %s2869_s7  ;;  %v1776_v18 = vstv %s2641_s8  ;;  %s2655_s8 = sld [smem:[#allocation2 + $0x5f]] }
 0x4e5   : > { %v1778_v54 = vmul.f32 %v1776_v18, %v3523_v44  ;;  %v1777_v30 = vmul.f32 %v1776_v18, %v3513_v7  ;;  %v1779_v2 = vmul.f32 0.0, %v1776_v18  ;;  %v2321_v18 = vstv %s2666_s15 }
 0x4e8   : > { %1978 = vrot.lane.b32.xlu1 %v1971_v31, %s2869_s7  ;;  %1976 = vrot.lane.b32.xlu0 %v1970_v11, %s2869_s7  ;;  %v2035_v31 = vstv %s2653_s20  ;;  %s2661_s20 = sld [smem:[#allocation2 + $0x59]] }
 0x4e9   : > { %v2036_v11 = vmul.f32 %v2035_v31, %v3513_v7 }
 0x4ec   : > { %1849 = vrot.lane.b32.xlu1 %v1843_v6, %s2868_s5  ;;  %1980 = vrot.lane.b32.xlu0 %v1972_v61, %s2869_s7  ;;  %v2038_v6 = vmul.f32 0.0, %v2035_v31  ;;  %v2037_v61 = vmul.f32 %v2035_v31, %v3523_v44 }
 0x4f0   : > { %1853 = vrot.lane.b32.xlu1 %v1845_v8, %s2868_s5  ;;  %1851 = vrot.lane.b32.xlu0 %v1844_v62, %s2868_s5  ;;  %v2167_v8 = vstv %s2659_s30  ;;  %s2642_s30 = sld [smem:[#allocation2 + $0x34]] }
 0x4f1   : > { %v2169_v62 = vmul.f32 %v2167_v8, %v3523_v44  ;;  %v2168_v50 = vmul.f32 %v2167_v8, %v3513_v7  ;;  %v2170_v51 = vmul.f32 0.0, %v2167_v8  ;;  %v1664_v8 = vmul.f32 %v1661_v48, %v3523_v44 }
 0x4f4   : > { %2000 = vrot.lane.b32.xlu1 %v1993_v49, %s2868_s5  ;;  %1998 = vrot.lane.b32.xlu0 %v1992_v40, %s2868_s5 }
 0x4f8   : > { %2130 = vrot.lane.b32.xlu1 %v2124_v45, %s2869_s7  ;;  %2002 = vrot.lane.b32.xlu0 %v1994_v10, %s2868_s5 }
 0x4fc   : > { %2134 = vrot.lane.b32.xlu1 %v2126_v22, %s2869_s7  ;;  %2132 = vrot.lane.b32.xlu0 %v2125_v14, %s2869_s7  ;;  %v1903_v14 = vstv %s2647_s6  ;;  %s2649_s6 = sld [smem:[#allocation2 + $0x35]] }
 0x4fd   : > { %v1905_v43 = vmul.f32 %v1903_v14, %v3523_v44  ;;  %v1906_v35 = vmul.f32 0.0, %v1903_v14 }
 0x500   : > { %1871 = vrot.lane.b32.xlu1 %v1866_v5, %s2870_s19  ;;  %1869 = vrot.lane.b32.xlu0 %v1865_v13, %s2870_s19  ;;  %v1904_v5 = vmul.f32 %v1903_v14, %v3513_v7  ;;  %v2057_v13 = vstv %s2654_s3  ;;  %v2323_v14 = vmul.f32 %v2321_v18, %v3523_v44  ;;  %s2668_s3 = sld [smem:[#allocation2 + $0x5a]] }
 0x504   : > { %2022 = vrot.lane.b32.xlu1 %v2015_v21, %s2870_s19  ;;  %2020 = vrot.lane.b32.xlu0 %v2014_v23, %s2870_s19  ;;  %v2058_v23 = vmul.f32 %v2057_v13, %v3513_v7 }
 0x508   : > { %2152 = vrot.lane.b32.xlu1 %v2146_v12, %s2868_s5  ;;  %2024 = vrot.lane.b32.xlu0 %v2016_v46, %s2870_s19 }
 0x50c   : > { %2156 = vrot.lane.b32.xlu1 %v2148_v52, %s2868_s5  ;;  %2154 = vrot.lane.b32.xlu0 %v2147_v53, %s2868_s5  ;;  %v2060_v52 = vmul.f32 0.0, %v2057_v13  ;;  %v2059_v53 = vmul.f32 %v2057_v13, %v3523_v44 }
 0x510   : > { %2286 = vrot.lane.b32.xlu1 %v2279_v26, %s2869_s7  ;;  %2284 = vrot.lane.b32.xlu0 %v2278_v56, %s2869_s7  ;;  %v2189_v26 = vstv %s2660_s4 }
 0x514   : > { %1888 = vrot.lane.b32.xlu1 %v1882_v25, %s2871_s21  ;;  %2288 = vrot.lane.b32.xlu0 %v2280_v16, %s2869_s7  ;;  %s2665_s7 = sld [smem:[#allocation2 + $0x45]]  ;;  %v1662_v25 = vmul.f32 0.0, %v1661_v48  ;;  %v2191_v16 = vmul.f32 %v2189_v26, %v3523_v44 }
 0x518   : > { %1892 = vrot.lane.b32.xlu1 %v1884_v59, %s2871_s21  ;;  %1890 = vrot.lane.b32.xlu0 %v1883_v27, %s2871_s21  ;;  %v2190_v59 = vmul.f32 %v2189_v26, %v3513_v7 }
 0x51a   : > { %v2299_v49 = vstv %s2665_s7  ;;  %s2662_s7 = sld [smem:[#allocation2 + $0x60]] }
 0x51b   : > { %v2300_v40 = vmul.f32 0.0, %v2299_v49  ;;  %v2302_v45 = vmul.f32 %v2299_v49, %v3523_v44  ;;  %v2301_v10 = vmul.f32 %v2299_v49, %v3513_v7 }
 0x51c   : > { %1785 = vrot.lane.b32.xlu1 %v1778_v54, %s2873_s27  ;;  %1783 = vrot.lane.b32.xlu0 %v1777_v30, %s2873_s27 }
 0x520   : > { %2042 = vrot.lane.b32.xlu1 %v2036_v11, %s2871_s21  ;;  %1787 = vrot.lane.b32.xlu0 %v1779_v2, %s2873_s27  ;;  %v2322_v2 = vmul.f32 %v2321_v18, %v3513_v7 }
 0x524   : > { %2046 = vrot.lane.b32.xlu1 %v2038_v6, %s2871_s21  ;;  %2044 = vrot.lane.b32.xlu0 %v2037_v61, %s2871_s21  ;;  %v2192_v6 = vmul.f32 0.0, %v2189_v26  ;;  %v1663_v61 = vmul.f32 %v1661_v48, %v3513_v7 }
 0x528   : > { %2176 = vrot.lane.b32.xlu1 %v2169_v62, %s2870_s19  ;;  %2174 = vrot.lane.b32.xlu0 %v2168_v50, %s2870_s19 }
 0x52c   : > { %2306 = vrot.lane.b32.xlu1 %v2300_v40, %s2868_s5  ;;  %2178 = vrot.lane.b32.xlu0 %v2170_v51, %s2870_s19 }
 0x52d   : > { %v3722_v22 = vpop.permute.xlu1 %1646 }
 0x52e   : > { %4180 = vst [vmem:[#allocation24_spill] sm:$0xff] %v3722_v22 }
 0x530   : > { %2310 = vrot.lane.b32.xlu1 %v2302_v45, %s2868_s5  ;;  %2308 = vrot.lane.b32.xlu0 %v2301_v10, %s2868_s5  ;;  %s2648_s5 = sld [smem:[#allocation2 + $0x5e]]  ;;  %v2324_v10 = vmul.f32 0.0, %v2321_v18 }
 0x532   : > { %v3728_v63 = vpop.permute.xlu0 %1648  ;;  %v3730_v21 = vpop.permute.xlu1 %1650 }
 0x533   : > { %4181 = vst [vmem:[#allocation25_spill] sm:$0xff] %v3728_v63  ;;  %4182 = vst [vmem:[#allocation26_spill] sm:$0xff] %v3730_v21 }
 0x534   : > { %1912 = vrot.lane.b32.xlu1 %v1905_v43, %s2872_s23  ;;  %1910 = vrot.lane.b32.xlu0 %v1904_v5, %s2872_s23 }
 0x536   : > { %v1674_v12 = vpop.permute.xlu0 %1673  ;;  %v1676_v46 = vpop.permute.xlu1 %1675  ;;  %v1925_v43 = vstv %s2648_s5  ;;  %s2463_s5 = scalar_lea.sflag [#allocation4], %s3000_s29 }
 0x537   : > { %v1679_v27 = vsel %vm229_vm3, %v1674_v12, %v1676_v46 }
 0x538   : > { %2064 = vrot.lane.b32.xlu1 %v2058_v23, %s2872_s23  ;;  %1914 = vrot.lane.b32.xlu0 %v1906_v35, %s2872_s23  ;;  %v1684_v11 = vadd.f32 %v1679_v27, %v1662_v25  ;;  %v2079_v25 = vstv %s2655_s8 }
 0x53a   : > { %v1678_v56 = vpop.permute.xlu0 %1677  ;;  %v1696_v42 = vpop.permute.xlu1 %1695 }
 0x53b   : > { %v1680_v40 = vsel %vm229_vm3, %v1676_v46, %v1678_v56  ;;  %v1686_v23 = vadd.f32 %v1678_v56, %v1664_v8  ;;  %v2082_v8 = vmul.f32 0.0, %v2079_v25 }
 0x53c   : > { %2068 = vrot.lane.b32.xlu1 %v2060_v52, %s2872_s23  ;;  %2066 = vrot.lane.b32.xlu0 %v2059_v53, %s2872_s23  ;;  %v1685_v13 = vadd.f32 %v1680_v40, %v1663_v61  ;;  %v1927_v53 = vmul.f32 %v1925_v43, %v3523_v44 }
 0x53e   : > { %v1698_v54 = vpop.permute.xlu0 %1697  ;;  %v1700_v30 = vpop.permute.xlu1 %1699 }
 0x53f   : > { %v1701_v31 = vsel %vm252_vm4, %v1696_v42, %v1698_v54  ;;  %v1702_v5 = vsel %vm252_vm4, %v1698_v54, %v1700_v30  ;;  %v1708_v26 = vadd.f32 %v1700_v30, %v1686_v23  ;;  %v1926_v42 = vmul.f32 %v1925_v43, %v3513_v7 }
 0x540   : > { %2198 = vrot.lane.b32.xlu1 %v2191_v16, %s2871_s21  ;;  %2196 = vrot.lane.b32.xlu0 %v2190_v59, %s2871_s21  ;;  %v1706_v62 = vadd.f32 %v1701_v31, %v1684_v11  ;;  %v1707_v48 = vadd.f32 %v1702_v5, %v1685_v13  ;;  %v2080_v30 = vmul.f32 %v2079_v25, %v3513_v7 }
 0x542   : > { %v1718_v50 = vpop.permute.xlu0 %1717  ;;  %v1720_v49 = vpop.permute.xlu1 %1719 }
 0x543   : > { %v1723_v51 = vsel %vm275_vm5, %v1718_v50, %v1720_v49  ;;  %v2211_v50 = vstv %s2661_s20  ;;  %s2881_s20 = smov [#allocation7]  }
 0x544   : > { %v1728_v45 = vadd.f32 %v1723_v51, %v1706_v62  ;;  %2328 = vrot.lane.b32.xlu1 %v2322_v2, %s2870_s19  ;;  %2200 = vrot.lane.b32.xlu0 %v2192_v6, %s2871_s21  ;;  %v1928_v2 = vmul.f32 0.0, %v1925_v43  ;;  %v2081_v62 = vmul.f32 %v2079_v25, %v3523_v44 }
 0x546   : > { %v1722_v35 = vpop.permute.xlu0 %1721  ;;  %v1740_v12 = vpop.permute.xlu1 %1739 }
 0x547   : > { %v1724_v52 = vsel %vm275_vm5, %v1720_v49, %v1722_v35  ;;  %v3756_v46 = vadd.f32 %v1740_v12, %v1728_v45  ;;  %v1730_v56 = vadd.f32 %v1722_v35, %v1708_v26  ;;  %v1815_v26 = vstv %s2642_s30 }
 0x548   : > { %2332 = vrot.lane.b32.xlu1 %v2324_v10, %s2870_s19  ;;  %2330 = vrot.lane.b32.xlu0 %v2323_v14, %s2870_s19  ;;  %v1729_v16 = vadd.f32 %v1724_v52, %v1707_v48  ;;  %s2667_s19 = sld [smem:[#allocation2 + $0x53]]  ;;  %v2213_v10 = vmul.f32 %v2211_v50, %v3523_v44  ;;  %v2212_v14 = vmul.f32 %v2211_v50, %v3513_v7  ;;  %v2214_v52 = vmul.f32 0.0, %v2211_v50 }
 0x54a   : > { %v1742_v59 = vpop.permute.xlu0 %1741  ;;  %v1744_v27 = vpop.permute.xlu1 %1743 }
 0x54b   : > { %v1745_v18 = vsel %vm298_vm0, %v1740_v12, %v1742_v59  ;;  %v1746_v54 = vsel %vm298_vm0, %v1742_v59, %v1744_v27  ;;  %v2233_v59 = vstv %s2662_s7  ;;  %v1816_v27 = vmul.f32 0.0, %v1815_v26 }
 0x54c   : > { %v3764_v31 = vadd.f32 %v1745_v18, %v1729_v16  ;;  %v1752_v11 = vadd.f32 %v1746_v54, %v1730_v56  ;;  %1934 = vrot.lane.b32.xlu1 %v1927_v53, %s2873_s27  ;;  %1932 = vrot.lane.b32.xlu0 %v1926_v42, %s2873_s27  ;;  %v1818_v56 = vmul.f32 %v1815_v26, %v3523_v44 }
 0x54d   : > { %v1817_v18 = vmul.f32 %v1815_v26, %v3513_v7  ;;  %v2236_v26 = vmul.f32 0.0, %v2233_v59 }
 0x54e   : > { %v3769_v6 = vpop.permute.xlu0 %1761  ;;  %v3771_v61 = vpop.permute.xlu1 %1763  ;;  %v2343_v43 = vstv %s2667_s19 }
 0x54f   : > { %v2344_v12 = vmul.f32 %v2343_v43, %v3513_v7  ;;  %v2346_v25 = vmul.f32 0.0, %v2343_v43  ;;  %v2345_v16 = vmul.f32 %v2343_v43, %v3523_v44 }
 0x550   : > { %2086 = vrot.lane.b32.xlu1 %v2080_v30, %s2873_s27  ;;  %1936 = vrot.lane.b32.xlu0 %v1928_v2, %s2873_s27  ;;  %v1964_v30 = vstv %s2649_s6 }
 0x552   : > { %v1766_v49 = vpop.permute.xlu0 %1765  ;;  %v1828_v40 = vpop.permute.xlu1 %1827 }
 0x553   : > { %v1768_v51 = vsel %vm321_vm1, %v3771_v61, %v1766_v49  ;;  %v2365_v49 = vstv %s2668_s3 }
 0x554   : > { %v3778_v45 = vadd.f32 %v1768_v51, %v1752_v11  ;;  %2090 = vrot.lane.b32.xlu1 %v2082_v8, %s2873_s27  ;;  %2088 = vrot.lane.b32.xlu0 %v2081_v62, %s2873_s27  ;;  %v2235_v8 = vmul.f32 %v2233_v59, %v3523_v44  ;;  %v2234_v62 = vmul.f32 %v2233_v59, %v3513_v7 }
 0x556   : > { %v1830_v5 = vpop.permute.xlu0 %1829  ;;  %v1832_v13 = vpop.permute.xlu1 %1831 }
 0x557   : > { %v1833_v23 = vsel %vm229_vm3, %v1828_v40, %v1830_v5  ;;  %v1834_v35 = vsel %vm229_vm3, %v1830_v5, %v1832_v13  ;;  %v1840_v50 = vadd.f32 %v1832_v13, %v1818_v56  ;;  %v2366_v13 = vmul.f32 %v2365_v49, %v3513_v7 }
 0x558   : > { %2220 = vrot.lane.b32.xlu1 %v2213_v10, %s2872_s23  ;;  %2218 = vrot.lane.b32.xlu0 %v2212_v14, %s2872_s23  ;;  %v1838_v40 = vadd.f32 %v1833_v23, %v1816_v27  ;;  %v1839_v51 = vadd.f32 %v1834_v35, %v1817_v18  ;;  %v1965_v10 = vmul.f32 0.0, %v1964_v30  ;;  %v1967_v23 = vmul.f32 %v1964_v30, %v3523_v44 }
 0x55a   : > { %v1977_v53 = vpop.permute.xlu0 %1976  ;;  %v1979_v48 = vpop.permute.xlu1 %1978 }
 0x55b   : > { %v1982_v42 = vsel %vm229_vm3, %v1977_v53, %v1979_v48 }
 0x55c   : > { %2350 = vrot.lane.b32.xlu1 %v2344_v12, %s2871_s21  ;;  %2222 = vrot.lane.b32.xlu0 %v2214_v52, %s2872_s23  ;;  %v1987_v35 = vadd.f32 %v1982_v42, %v1965_v10 }
 0x55e   : > { %v1981_v54 = vpop.permute.xlu0 %1980  ;;  %v1850_v11 = vpop.permute.xlu1 %1849 }
 0x55f   : > { %v1983_v2 = vsel %vm229_vm3, %v1979_v48, %v1981_v54 }
 0x560   : > { %2354 = vrot.lane.b32.xlu1 %v2346_v25, %s2871_s21  ;;  %2352 = vrot.lane.b32.xlu0 %v2345_v16, %s2871_s21  ;;  %v1966_v25 = vmul.f32 %v1964_v30, %v3513_v7  ;;  %s2656_s21 = sld [smem:[#allocation2 + $0x36]] }
 0x562   : > { %v1852_v14 = vpop.permute.xlu0 %1851  ;;  %v1854_v43 = vpop.permute.xlu1 %1853  ;;  %v1988_v59 = vadd.f32 %v1983_v2, %v1966_v25 }
 0x563   : > { %v1855_v5 = vsel %vm252_vm4, %v1850_v11, %v1852_v14  ;;  %v1856_v12 = vsel %vm252_vm4, %v1852_v14, %v1854_v43  ;;  %v1862_v52 = vadd.f32 %v1854_v43, %v1840_v50  ;;  %v2368_v11 = vmul.f32 0.0, %v2365_v49 }
 0x564   : > { %v1860_v53 = vadd.f32 %v1855_v5, %v1838_v40  ;;  %v1861_v48 = vadd.f32 %v1856_v12, %v1839_v51  ;;  %2242 = vrot.lane.b32.xlu1 %v2235_v8, %s2873_s27  ;;  %2240 = vrot.lane.b32.xlu0 %v2234_v62, %s2873_s27  ;;  %v2367_v8 = vmul.f32 %v2365_v49, %v3523_v44  ;;  %v2387_v50 = vstv %s2669_s17 }
 0x565   : > { %v1989_v62 = vadd.f32 %v1981_v54, %v1967_v23  ;;  %v2389_v14 = vmul.f32 %v2387_v50, %v3523_v44  ;;  %v2388_v43 = vmul.f32 %v2387_v50, %v3513_v7  ;;  %v2390_v49 = vmul.f32 0.0, %v2387_v50 }
 0x566   : > { %v1999_v16 = vpop.permute.xlu0 %1998  ;;  %v2001_v56 = vpop.permute.xlu1 %2000 }
 0x567   : > { %v2004_v27 = vsel %vm252_vm4, %v1999_v16, %v2001_v56 }
 0x568   : > { %v2009_v18 = vadd.f32 %v2004_v27, %v1987_v35  ;;  %2372 = vrot.lane.b32.xlu1 %v2366_v13, %s2872_s23  ;;  %2244 = vrot.lane.b32.xlu0 %v2236_v26, %s2873_s27 }
 0x56a   : > { %v2003_v40 = vpop.permute.xlu0 %2002  ;;  %v2131_v51 = vpop.permute.xlu1 %2130 }
 0x56b   : > { %v2005_v42 = vsel %vm252_vm4, %v2001_v56, %v2003_v40  ;;  %v2011_v30 = vadd.f32 %v2003_v40, %v1989_v62 }
 0x56c   : > { %v2010_v10 = vadd.f32 %v2005_v42, %v1988_v59  ;;  %2376 = vrot.lane.b32.xlu1 %v2368_v11, %s2872_s23  ;;  %2374 = vrot.lane.b32.xlu0 %v2367_v8, %s2872_s23  ;;  %v2118_v11 = vstv %s2656_s21 }
 0x56d   : > { %v2119_v59 = vmul.f32 0.0, %v2118_v11  ;;  %v2120_v40 = vmul.f32 %v2118_v11, %v3513_v7 }
 0x56e   : > { %v2133_v5 = vpop.permute.xlu0 %2132  ;;  %v2135_v12 = vpop.permute.xlu1 %2134 }
 0x56f   : > { %v2136_v54 = vsel %vm229_vm3, %v2131_v51, %v2133_v5  ;;  %v2137_v2 = vsel %vm229_vm3, %v2133_v5, %v2135_v12 }
 0x570   : > { %2396 = vrot.lane.b32.xlu1 %v2389_v14, %s2873_s27  ;;  %2394 = vrot.lane.b32.xlu0 %v2388_v43, %s2873_s27  ;;  %v2141_v43 = vadd.f32 %v2136_v54, %v2119_v59  ;;  %v2142_v5 = vadd.f32 %v2137_v2, %v2120_v40  ;;  %v1767_v59 = vsel %vm321_vm1, %v3769_v6, %v3771_v61 }
 0x571   : > { %v1772_v40 = vadd.f32 %v3769_v6, %v3756_v46 }
 0x572   : > { %v1870_v13 = vpop.permute.xlu0 %1869  ;;  %v1872_v26 = vpop.permute.xlu1 %1871 }
 0x573   : > { %v3820_v23 = vadd.f32 %v1870_v13, %v1860_v53  ;;  %v1873_v35 = vsel %vm275_vm5, %v1870_v13, %v1872_v26  ;;  %v3823_v25 = vadd.f32 %v1872_v26, %v1862_v52  ;;  %v2121_v53 = vmul.f32 %v2118_v11, %v3523_v44 }
 0x574   : > { %v3825_v16 = vadd.f32 %v1873_v35, %v1861_v48  ;;  %2398 = vrot.lane.b32.xlu0 %v2390_v49, %s2873_s27  ;;  %s2663_s27 = sld [smem:[#allocation2 + $0x37]] }
 0x575   : > { %v2143_v14 = vadd.f32 %v2135_v12, %v2121_v53 }
 0x576   : > { %v2021_v56 = vpop.permute.xlu0 %2020  ;;  %v2023_v27 = vpop.permute.xlu1 %2022 }
 0x577   : > { %v3828_v8 = vadd.f32 %v2021_v56, %v2009_v18  ;;  %v2026_v62 = vsel %vm275_vm5, %v2021_v56, %v2023_v27 }
 0x578   : > { %v3831_v50 = vadd.f32 %v2026_v62, %v2010_v10 }
 0x57a   : > { %v2025_v52 = vpop.permute.xlu0 %2024  ;;  %v2153_v51 = vpop.permute.xlu1 %2152 }
 0x57b   : > { %v2027_v48 = vsel %vm275_vm5, %v2023_v27, %v2025_v52  ;;  %v1773_v52 = vadd.f32 %v1767_v59, %v3764_v31 }
 0x57c   : > { %v3836_v42 = vadd.f32 %v2027_v48, %v2011_v30 }
 0x57e   : > { %v2155_v18 = vpop.permute.xlu0 %2154  ;;  %v2157_v49 = vpop.permute.xlu1 %2156 }
 0x57f   : > { %v2158_v13 = vsel %vm252_vm4, %v2153_v51, %v2155_v18  ;;  %v2159_v10 = vsel %vm252_vm4, %v2155_v18, %v2157_v49  ;;  %v3840_v26 = vadd.f32 %v2157_v49, %v2143_v14 }
 0x580   : > { %v3842_v35 = vadd.f32 %v2158_v13, %v2141_v43  ;;  %v3844_v56 = vadd.f32 %v2159_v10, %v2142_v5 }
 0x582   : > { %v2285_v11 = vpop.permute.xlu0 %2284  ;;  %v2287_v62 = vpop.permute.xlu1 %2286 }
 0x583   : > { %v3847_v30 = vsel %vm229_vm3, %v2285_v11, %v2287_v62 }
 0x586   : > { %v3849_v12 = vpop.permute.xlu0 %2288  ;;  %v1889_v54 = vpop.permute.xlu1 %1888 }
 0x587   : > { %v3853_v2 = vsel %vm229_vm3, %v2287_v62, %v3849_v12  ;;  %v1899_v47 = vadd.f32 %v1889_v54, %v3820_v23  ;;  %vm1169_vm3 = vcmask 375808  }
 0x58a   : > { %v1891_v27 = vpop.permute.xlu0 %1890  ;;  %v1893_v53 = vpop.permute.xlu1 %1892 }
 0x58b   : > { %v1894_v9 = vsel %vm298_vm0, %v1889_v54, %v1891_v27  ;;  %v1895_v0 = vsel %vm298_vm0, %v1891_v27, %v1893_v53 }
 0x58c   : > { %v1900_v19 = vadd.f32 %v1894_v9, %v3825_v16  ;;  %v1901_v63 = vadd.f32 %v1895_v0, %v3823_v25 }
 0x58e   : > { %v1784_v51 = vpop.permute.xlu0 %1783  ;;  %v1786_v48 = vpop.permute.xlu1 %1785 }
 0x58f   : > { %v1794_v14 = vadd.f32 %v1784_v51, %v1772_v40  ;;  %v1789_v43 = vsel %vm344_vm2, %v1784_v51, %v1786_v48 }
 0x590   : > { %v1795_v5 = vadd.f32 %v1789_v43, %v1773_v52 }
 0x591   : > { %1800 = vrot.lane.b32.xlu1 %v1794_v14, %s2876_s14 }
 0x592   : > { %v1788_v18 = vpop.permute.xlu0 %1787  ;;  %1802 = vrot.lane.b32.xlu0 %v1795_v5, %s2876_s14  ;;  %v2043_v49 = vpop.permute.xlu1 %2042 }
 0x593   : > { %v1790_v13 = vsel %vm344_vm2, %v1786_v48, %v1788_v18  ;;  %v2053_v20 = vadd.f32 %v2043_v49, %v3828_v8 }
 0x594   : > { %v1796_v61 = vadd.f32 %v1790_v13, %v3778_v45 }
 0x596   : > { %v2045_v10 = vpop.permute.xlu0 %2044  ;;  %1804 = vrot.lane.b32.xlu1 %v1796_v61, %s2876_s14  ;;  %v2047_v46 = vpop.permute.xlu1 %2046  ;;  %s2678_s14 = sshll.u32 %s2918_s13, 5  ;;  %s2800_s13 = sshll.u32 %s2881_s20, 4  ;;  %s2801_s13 = int_to_ptr.vmem [resolvable:$false] %s2800_s13 }
 0x597   : > { %v2048_v54 = vsel %vm298_vm0, %v2043_v49, %v2045_v10  ;;  %v2049_v9 = vsel %vm298_vm0, %v2045_v10, %v2047_v46  ;;  %s2475_s15 = scalar_lea.hbm %s4145_s2, %s2678_s14  ;;  %s2802_s19 = scalar_lea.vmem %s2801_s13, 64 }
 0x59a   : > { %v3867_v31 = vpop.permute.xlu0 %2174  ;;  %v3869_v6 = vpop.permute.xlu1 %2176 }
 0x59e   : > { %v3871_v11 = vpop.permute.xlu0 %2178  ;;  %v3873_v62 = vpop.permute.xlu1 %2306 }
 0x5a2   : > { %v3875_v59 = vpop.permute.xlu0 %2308  ;;  %v3877_v40 = vpop.permute.xlu1 %2310 }
 0x5a6   : > { %v1911_v52 = vpop.permute.xlu0 %1910  ;;  %v1913_v51 = vpop.permute.xlu1 %1912 }
 0x5a7   : > { %v1916_v57 = vsel %vm321_vm1, %v1911_v52, %v1913_v51  ;;  %v1921_v4 = vadd.f32 %v1911_v52, %v1899_v47  ;;  %v2180_v52 = vsel %vm275_vm5, %v3867_v31, %v3869_v6 }
 0x5a8   : > { %v1922_v21 = vadd.f32 %v1916_v57, %v1900_v19 }
 0x5aa   : > { %v1915_v48 = vpop.permute.xlu0 %1914  ;;  %v2065_v45 = vpop.permute.xlu1 %2064 }
 0x5ab   : > { %v1917_v32 = vsel %vm321_vm1, %v1913_v51, %v1915_v48  ;;  %v2075_v16 = vadd.f32 %v2065_v45, %v2053_v20  ;;  %v2185_v51 = vadd.f32 %v3867_v31, %v3842_v35 }
 0x5ac   : > { %v1923_v47 = vadd.f32 %v1917_v32, %v1901_v63 }
 0x5ae   : > { %v2067_v14 = vpop.permute.xlu0 %2066  ;;  %v2069_v43 = vpop.permute.xlu1 %2068 }
 0x5af   : > { %v2070_v8 = vsel %vm321_vm1, %v2065_v45, %v2067_v14  ;;  %v2272_v45 = vstv %s2663_s27 }
 0x5b2   : > { %v2197_v5 = vpop.permute.xlu0 %2196  ;;  %v3879_v18 = vpop.permute.xlu1 %2198 }
 0x5b3   : > { %v2202_v48 = vsel %vm298_vm0, %v2197_v5, %v3879_v18 }
 0x5b6   : > { %v3881_v13 = vpop.permute.xlu0 %2200  ;;  %v3883_v61 = vpop.permute.xlu1 %2328 }
 0x5b7   : > { %v2203_v35 = vsel %vm298_vm0, %v3879_v18, %v3881_v13 }
 0x5ba   : > { %v3886_v1 = vpop.permute.xlu0 %2330  ;;  %v3888_v3 = vpop.permute.xlu1 %2332 }
 0x5be   : > { %v1933_v28 = vpop.permute.xlu0 %1932  ;;  %v1935_v29 = vpop.permute.xlu1 %1934 }
 0x5bf   : > { %v1943_v34 = vadd.f32 %v1933_v28, %v1921_v4  ;;  %v1938_v22 = vsel %vm344_vm2, %v1933_v28, %v1935_v29  ;;  %v2071_v4 = vsel %vm321_vm1, %v2067_v14, %v2069_v43  ;;  %v2186_v14 = vadd.f32 %v2180_v52, %v3844_v56 }
 0x5c0   : > { %v1944_v23 = vadd.f32 %v1938_v22, %v1922_v21  ;;  %v2054_v22 = vadd.f32 %v2048_v54, %v3831_v50  ;;  %v2055_v21 = vadd.f32 %v2049_v9, %v3836_v42  ;;  %v2181_v54 = vsel %vm275_vm5, %v3869_v6, %v3871_v11 }
 0x5c1   : > { %1949 = vrot.lane.b32.xlu0 %v1943_v34, %s2872_s23  ;;  %v2207_v9 = vadd.f32 %v2197_v5, %v2185_v51  ;;  %v2187_v56 = vadd.f32 %v2181_v54, %v3840_v26  ;;  %v2312_v5 = vsel %vm252_vm4, %v3873_v62, %v3875_v59  ;;  %v2275_v26 = vmul.f32 %v2272_v45, %v3523_v44 }
 0x5c2   : > { %v1937_v57 = vpop.permute.xlu0 %1936  ;;  %1951 = vrot.lane.b32.xlu1 %v1944_v23, %s2872_s23  ;;  %v2087_v19 = vpop.permute.xlu1 %2086  ;;  %v2076_v20 = vadd.f32 %v2070_v8, %v2054_v22  ;;  %v2077_v27 = vadd.f32 %v2071_v4, %v2055_v21 }
 0x5c3   : > { %v1939_v28 = vsel %vm344_vm2, %v1935_v29, %v1937_v57  ;;  %v2097_v0 = vadd.f32 %v2087_v19, %v2075_v16  ;;  %v2273_v57 = vmul.f32 0.0, %v2272_v45  ;;  %v2209_v22 = vadd.f32 %v2203_v35, %v2187_v56 }
 0x5c4   : > { %v1945_v25 = vadd.f32 %v1939_v28, %v1923_v47  ;;  %v2208_v47 = vadd.f32 %v2202_v48, %v2186_v14 }
 0x5c5   : > { %v2295_v18 = vadd.f32 %v3847_v30, %v2273_v57  ;;  %v2334_v30 = vsel %vm275_vm5, %v3883_v61, %v3886_v1 }
 0x5c6   : > { %v2089_v34 = vpop.permute.xlu0 %2088  ;;  %1953 = vrot.lane.b32.xlu0 %v1945_v25, %s2872_s23  ;;  %2103 = vrot.lane.b32.xlu1 %v2097_v0, %s2877_s26  ;;  %v2091_v32 = vpop.permute.xlu1 %2090  ;;  %s2569_s23 = sshll.u32 %s3000_s29, 1 }
 0x5c7   : > { %v2092_v63 = vsel %vm344_vm2, %v2087_v19, %v2089_v34  ;;  %v2093_v53 = vsel %vm344_vm2, %v2089_v34, %v2091_v32  ;;  %v2274_v19 = vmul.f32 %v2272_v45, %v3513_v7  ;;  %v2313_v7 = vsel %vm252_vm4, %v3875_v59, %v3877_v40 }
 0x5c8   : > { %v2098_v49 = vadd.f32 %v2092_v63, %v2076_v20  ;;  %v2099_v29 = vadd.f32 %v2093_v53, %v2077_v27  ;;  %v2317_v62 = vadd.f32 %v2312_v5, %v2295_v18 }
 0x5c9   : > { %v2296_v13 = vadd.f32 %v3853_v2, %v2274_v19  ;;  %v2297_v2 = vadd.f32 %v3849_v12, %v2275_v26  ;;  %v364_v26 = vsel %vm362_vm7, %v3315_v38, %v3317_v17  ;;  %v689_v17 = vsel %vm688_vm11, %v3330_v41, %v3323_v15 }
 0x5ca   : > { %v2219_v10 = vpop.permute.xlu0 %2218  ;;  %2105 = vrot.lane.b32.xlu0 %v2098_v49, %s2877_s26  ;;  %2107 = vrot.lane.b32.xlu1 %v2099_v29, %s2877_s26  ;;  %v2221_v50 = vpop.permute.xlu1 %2220  ;;  %v2339_v63 = vadd.f32 %v3883_v61, %v2317_v62  ;;  %v690_v62 = vsel %vm688_vm11, %v3323_v15, %v3321_v55  ;;  %s171_s26 = scalar_lea.vmem [#allocation7], %s2569_s23 }
 0x5cb   : > { %v2224_v16 = vsel %vm321_vm1, %v2219_v10, %v2221_v50  ;;  %v2229_v31 = vadd.f32 %v2219_v10, %v2207_v9  ;;  %v2318_v32 = vadd.f32 %v2313_v7, %v2296_v13  ;;  %v2335_v10 = vsel %vm275_vm5, %v3886_v1, %v3888_v3 }
 0x5cc   : > { %v2230_v8 = vadd.f32 %v2224_v16, %v2208_v47  ;;  %v2319_v52 = vadd.f32 %v3877_v40, %v2297_v2  ;;  %v526_v13 = vsel %vm525_vm6, %v3319_v33, %v3327_v24  ;;  %v844_v2 = vsel %vm321_vm1, %v3377_v58, %v3381_v37 }
 0x5cd   : > { %v2340_v53 = vadd.f32 %v2334_v30, %v2318_v32  ;;  %vm1332_vm5 = vcmask 367616  }
 0x5ce   : > { %v2223_v42 = vpop.permute.xlu0 %2222  ;;  %v2351_v46 = vpop.permute.xlu1 %2350  ;;  %v2341_v45 = vadd.f32 %v2335_v10, %v2319_v52  ;;  %v4187_v52 = vld [vmem:[#allocation12_spill] sm:$0xff] }
 0x5cf   : > { %v2225_v0 = vsel %vm321_vm1, %v2221_v50, %v2223_v42  ;;  %v2361_v50 = vadd.f32 %v2351_v46, %v2339_v63 }
 0x5d0   : > { %v2231_v25 = vadd.f32 %v2225_v0, %v2209_v22 }
 0x5d2   : > { %v2353_v43 = vpop.permute.xlu0 %2352  ;;  %v2355_v23 = vpop.permute.xlu1 %2354 }
 0x5d3   : > { %v2356_v44 = vsel %vm298_vm0, %v2351_v46, %v2353_v43  ;;  %v2357_v61 = vsel %vm298_vm0, %v2353_v43, %v2355_v23  ;;  %v4183_v23 = vlaneseq }
 0x5d4   : > { %v2362_v51 = vadd.f32 %v2356_v44, %v2340_v53  ;;  %v2363_v57 = vadd.f32 %v2357_v61, %v2341_v45  ;;  %v845_v53 = vsel %vm321_vm1, %v3381_v37, %v3379_v60  ;;  %v4188_v61 = vld [vmem:[#allocation14_spill] sm:$0xff]  ;;  %v4189_v60 = vld [vmem:[#allocation23_spill] sm:$0xff]  ;;  %v4190_v37 = vld [vmem:[#allocation21_spill] sm:$0xff] }
 0x5d5   : > { %v187_v35 = vand.u32 127, %v4183_v23  ;;  %v1498_v45 = vsel %vm362_vm7, %v4190_v37, %v4189_v60 }
 0x5d6   : > { %v2241_v4 = vpop.permute.xlu0 %2240  ;;  %v2243_v28 = vpop.permute.xlu1 %2242 }
 0x5d7   : > { %v2251_v6 = vadd.f32 %v2241_v4, %v2229_v31  ;;  %v2246_v11 = vsel %vm344_vm2, %v2241_v4, %v2243_v28  ;;  %v188_v31 = vadd.s32 128, %v187_v35  ;;  %v3968_v4 = vand.u32 15, %v187_v35 }
 0x5d8   : > { %v2252_v21 = vadd.f32 %v2246_v11, %v2230_v8 }
 0x5d9   : > { %2257 = vrot.lane.b32.xlu0 %v2251_v6, %s2878_s22  ;;  %v3964_v56 = vand.u32 15, %v188_v31  ;;  %v371_v11 = vadd.s32 4294967294, %v3968_v4  ;;  %v202_v22 = vadd.s32 4294967293, %v3968_v4  ;;  %v534_v18 = vadd.s32 4294967295, %v3968_v4 }
 0x5da   : > { %v2245_v20 = vpop.permute.xlu0 %2244  ;;  %2259 = vrot.lane.b32.xlu1 %v2252_v21, %s2878_s22  ;;  %v2373_v27 = vpop.permute.xlu1 %2372  ;;  %v527_v21 = vsel %vm525_vm6, %v3327_v24, %v3313_v36 }
 0x5db   : > { %v2247_v34 = vsel %vm344_vm2, %v2243_v28, %v2245_v20  ;;  %v2383_v48 = vadd.f32 %v2373_v27, %v2361_v50  ;;  %v3971_v28 = vadd.s32 4294967294, %v3964_v56  ;;  %v3976_v6 = vadd.s32 4294967293, %v3964_v56 }
 0x5dc   : > { %v2253_v59 = vadd.f32 %v2247_v34, %v2231_v25  ;;  %vm373_vm10 = vcmp.ge.s32.totalorder %v371_v11, 0  ;;  %v3997_v25 = vadd.s32 4294967295, %v3964_v56  ;;  %vm204_vm12 = vcmp.ge.s32.totalorder %v202_v22, 0 }
 0x5dd   : > { %vm374_vm8 = vcmp.ge.s32.totalorder %v3971_v28, 0  ;;  %vm205_vm9 = vcmp.ge.s32.totalorder %v3976_v6, 0  ;;  %v363_v20 = vsel %vm362_vm7, %v3325_v39, %v3315_v38  ;;  %vm536_vm13 = vcmp.ge.s32.totalorder %v534_v18, 0 }
 0x5de   : > { %v2375_v49 = vpop.permute.xlu0 %2374  ;;  %2261 = vrot.lane.b32.xlu0 %v2253_v59, %s2878_s22  ;;  %v2377_v29 = vpop.permute.xlu1 %2376  ;;  %v531_v36 = vsel %vm374_vm8, %v527_v21, 0.0  ;;  %v368_v33 = vsel %vm205_vm9, %v364_v26, 0.0  ;;  %v530_v24 = vsel %vm373_vm10, %v526_v13, 0.0  ;;  %vm537_vm14 = vcmp.ge.s32.totalorder %v3997_v25, 0  ;;  %v4194_v21 = vld [vmem:[#allocation22_spill] sm:$0xff]  ;;  %s2477_s22 = sshll.u32 %s171_s26, 4  ;;  %s2478_s22 = int_to_ptr.vmem [resolvable:$true] %s2477_s22 }
 0x5df   : > { %v2378_v42 = vsel %vm321_vm1, %v2373_v27, %v2375_v49  ;;  %v2379_v9 = vsel %vm321_vm1, %v2375_v49, %v2377_v29  ;;  %v533_v30 = vadd.f32 %v531_v36, %v368_v33  ;;  %v367_v39 = vsel %vm204_vm12, %v363_v20, 0.0  ;;  %v4184_v49 = vld [vmem:[#allocation25_spill] sm:$0xff]  ;;  %v4185_v29 = vld [vmem:[#allocation24_spill] sm:$0xff]  ;;  %s2796_s8 = scalar_lea.vmem %s2478_s22, 32  ;;  %p2803_p11 = scmp.lt.s32.totalorder %s2478_s22, %s2801_s13 }
 0x5e0   : > { %v2384_v12 = vadd.f32 %v2378_v42, %v2362_v51  ;;  %v2385_v1 = vadd.f32 %v2379_v9, %v2363_v57  ;;  %v693_v34 = vsel %vm536_vm13, %v689_v17, 0.0  ;;  %v532_v41 = vadd.f32 %v530_v24, %v367_v39  ;;  %v4186_v42 = vld [vmem:[#allocation13_spill] sm:$0xff]  ;;  %v4191_v57 = vld [vmem:[#allocation26_spill] sm:$0xff]  ;;  %p2797_p6 = scmp.ne.s32.totalorder %s2478_s22, %s2796_s8  ;;  %p2804_p0 = scmp.lt.s32.totalorder %s2802_s19, %s2796_s8 }
 0x5e1   : > { %v4019_v32 = vadd.s32 1, %v3964_v56  ;;  %v852_v59 = vadd.s32 1, %v3968_v4  ;;  %v694_v63 = vsel %vm537_vm14, %v690_v62, 0.0  ;;  %v1652_v10 = vsel %vm525_vm6, %v4185_v29, %v4184_v49  ;;  %v4196_v39 = vld [vmem:[#allocation18_spill] sm:$0xff] }
 0x5e2   : > { %v2395_v14 = vpop.permute.xlu0 %2394  ;;  %v2397_v54 = vpop.permute.xlu1 %2396  ;;  %v695_v44 = vadd.f32 %v693_v34, %v532_v41  ;;  %v696_v55 = vadd.f32 %v694_v63, %v533_v30  ;;  %v1015_v50 = vadd.s32 2, %v3968_v4  ;;  %v1007_v51 = vsel %vm1006_vm15, %v4187_v52, %v4186_v42  ;;  %p2798_p7 = pnand %p2797_p6, %p4200_p8  ;;  %p2805_p3 = por %p2804_p0, %p2803_p11 }
 0x5e3   : > { %v2405_v16 = vadd.f32 %v2395_v14, %v2383_v48  ;;  %v2400_v47 = vsel %vm344_vm2, %v2395_v14, %v2397_v54  ;;  %vm857_vm0 = vcmp.lt.s32.totalorder %v4019_v32, 16  ;;  %v1008_v58 = vsel %vm1006_vm15, %v4186_v42, %v4188_v61 }
 0x5e4   : > { %v2406_v3 = vadd.f32 %v2400_v47, %v2384_v12  ;;  %v850_v14 = vadd.f32 %v844_v2, %v695_v44  ;;  %v1656_v9 = vsel %vm373_vm10, %v1652_v10, 0.0  ;;  %v1012_v47 = vsel %vm857_vm0, %v1008_v58, 0.0  ;;  %p2799_p10 = pneg %p2798_p7 }
 0x5e5   : > { %2411 = vrot.lane.b32.xlu1 %v2405_v16, %s2879_s28  ;;  %vm1019_vm4 = vcmp.lt.s32.totalorder %v1015_v50, 16  ;;  %v1502_v35 = vsel %vm204_vm12, %v1498_v45, 0.0  ;;  %v1178_v11 = vadd.s32 3, %v3968_v4  ;;  %v1499_v26 = vsel %vm362_vm7, %v4189_v60, %v4194_v21 }
 0x5e6   : > { %v2399_v46 = vpop.permute.xlu0 %2398  ;;  %2413 = vrot.lane.b32.xlu0 %v2406_v3, %s2879_s28  ;;  %v1653_v3 = vsel %vm525_vm6, %v4184_v49, %v4191_v57  ;;  %v1658_v13 = vadd.f32 %v1656_v9, %v1502_v35  ;;  %v1016_v22 = vadd.s32 2, %v3964_v56  ;;  %v1179_v17 = vadd.s32 3, %v3964_v56  ;;  %p2806_p5 = pnand %p2805_p3, %p2799_p10 }
 0x5e7   : > { %v2401_v40 = vsel %vm344_vm2, %v2397_v54, %v2399_v46  ;;  %vm856_vm2 = vcmp.lt.s32.totalorder %v852_v59, 16  ;;  %v851_v54 = vadd.f32 %v845_v53, %v696_v55  ;;  %v4192_v46 = vld [vmem:[#allocation17_spill] sm:$0xff]  ;;  %v1657_v18 = vsel %vm374_vm8, %v1653_v3, 0.0  ;;  %v4197_v59 = vld [vmem:[#allocation16_spill] sm:$0xff] }
 0x5e8   : > { %v2407_v43 = vadd.f32 %v2401_v40, %v2385_v1  ;;  %v1011_v1 = vsel %vm856_vm2, %v1007_v51, 0.0  ;;  %v4193_v40 = vld [vmem:[#allocation15_spill] sm:$0xff]  ;;  %vm1182_vm6 = vcmp.lt.s32.totalorder %v1178_v11, 16  ;;  %vm1020_vm7 = vcmp.lt.s32.totalorder %v1016_v22, 16 }
 0x5e9   : > { %v1013_v63 = vadd.f32 %v1011_v1, %v850_v14  ;;  %v1171_v44 = vsel %vm1169_vm3, %v4192_v46, %v4197_v59  ;;  %vm1183_vm8 = vcmp.lt.s32.totalorder %v1179_v17, 16  ;;  %v1014_v32 = vadd.f32 %v1012_v47, %v851_v54 }
 0x5ea   : > { %2415 = vrot.lane.b32.xlu1 %v2407_v43, %s2879_s28  ;;  %v1170_v43 = vsel %vm1169_vm3, %v4193_v40, %v4192_v46  ;;  %v1175_v61 = vsel %vm1020_vm7, %v1171_v44, 0.0  ;;  %v2880_v21 = vmov 1966171168  }
 0x5eb   : > { %v1174_v24 = vsel %vm1019_vm4, %v1170_v43, 0.0  ;;  %v1177_v9 = vadd.f32 %v1175_v61, %v1014_v32 }
 0x5ec   : > { %v1176_v29 = vadd.f32 %v1174_v24, %v1013_v63 }
 0x603   : > { %v1801_v19 = vpop.permute.xlu1 %1800 }
 0x604   : > { %v3966_v8 = vpop.permute.xlu0 %1802 }
 0x605   : > { %v1806_v12 = vsel %vm688_vm11, %v1801_v19, %v3966_v8 }
 0x606   : > { %v1810_v31 = vsel %vm536_vm13, %v1806_v12, 0.0 }
 0x607   : > { %v1812_v33 = vadd.f32 %v1810_v31, %v1658_v13 }
 0x608   : > { %v3973_v0 = vpop.permute.xlu1 %1804 }
 0x609   : > { %v1807_v36 = vsel %vm688_vm11, %v3966_v8, %v3973_v0  ;;  %v1503_v8 = vsel %vm205_vm9, %v1499_v26, 0.0  ;;  %v2443_v26 = vunpack.c.l.s4 %v2880_v21 }
 0x60a   : > { %v1811_v0 = vsel %vm537_vm14, %v1807_v36, 0.0  ;;  %v1659_v56 = vadd.f32 %v1657_v18, %v1503_v8 }
 0x60b   : > { %v2444_v13 = vunpack.c.0.s8 %v2443_v26 }
 0x60c   : > { %v1813_v55 = vadd.f32 %v1811_v0, %v1659_v56 }
 0x633   : > { %v3979_v5 = vpop.permute.xlu0 %1949 }
 0x634   : > { %v3987_v7 = vpop.permute.xlu1 %1951 }
 0x635   : > { %v1955_v4 = vsel %vm321_vm1, %v3979_v5, %v3987_v7 }
 0x636   : > { %v1961_v34 = vadd.f32 %v1955_v4, %v1812_v33 }
 0x638   : > { %v4007_v27 = vpop.permute.xlu0 %1953  ;;  %v2104_v38 = vpop.permute.xlu1 %2103 }
 0x639   : > { %v1956_v6 = vsel %vm321_vm1, %v3987_v7, %v4007_v27  ;;  %v4198_v27 = vld [vmem:[#allocation20_spill] sm:$0xff]  ;;  %vm2459_vm1 = vcmp.lt.s32.totalorder %v4183_v23, 256 }
 0x63a   : > { %v1962_v42 = vadd.f32 %v1956_v6, %v1813_v55 }
 0x63c   : > { %v2106_v15 = vpop.permute.xlu0 %2105  ;;  %v2108_v48 = vpop.permute.xlu1 %2107 }
 0x63d   : > { %v2109_v20 = vsel %vm1006_vm15, %v2104_v38, %v2106_v15  ;;  %v4195_v38 = vld [vmem:[#allocation19_spill] sm:$0xff]  ;;  %v2110_v41 = vsel %vm1006_vm15, %v2106_v15, %v2108_v48 }
 0x63e   : > { %v2113_v28 = vsel %vm856_vm2, %v2109_v20, 0.0  ;;  %v1333_v5 = vsel %vm1332_vm5, %v4196_v39, %v4195_v38  ;;  %v2114_v15 = vsel %vm857_vm0, %v2110_v41, 0.0  ;;  %v1334_v50 = vsel %vm1332_vm5, %v4195_v38, %v4198_v27  ;;  %v4199_v20 = vld [vmem:[#allocation11_spill] sm:$0xff] }
 0x63f   : > { %v2115_v2 = vadd.f32 %v2113_v28, %v1961_v34  ;;  %v1337_v10 = vsel %vm1182_vm6, %v1333_v5, 0.0  ;;  %v2116_v60 = vadd.f32 %v2114_v15, %v1962_v42  ;;  %v1338_v12 = vsel %vm1183_vm8, %v1334_v50, 0.0 }
 0x640   : > { %v1339_v37 = vadd.f32 %v1337_v10, %v1176_v29  ;;  %v1340_v46 = vadd.f32 %v1338_v12, %v1177_v9  ;;  %v2447_v22 = vsub.s32 %v2444_v13, %v4199_v20 }
 0x64b   : > { %v2258_v16 = vpop.permute.xlu0 %2257 }
 0x64c   : > { %v2260_v19 = vpop.permute.xlu1 %2259 }
 0x64d   : > { %v2263_v62 = vsel %vm1169_vm3, %v2258_v16, %v2260_v19 }
 0x64e   : > { %v2267_v25 = vsel %vm1019_vm4, %v2263_v62, 0.0 }
 0x64f   : > { %v2269_v52 = vadd.f32 %v2267_v25, %v2115_v2 }
 0x650   : > { %v2262_v30 = vpop.permute.xlu0 %2261 }
 0x651   : > { %v2264_v53 = vsel %vm1169_vm3, %v2260_v19, %v2262_v30 }
 0x652   : > { %v2268_v58 = vsel %vm1020_vm7, %v2264_v53, 0.0 }
 0x653   : > { %v2270_v16 = vadd.f32 %v2268_v58, %v2116_v60 }
 0x657   : > { %v2412_v49 = vpop.permute.xlu1 %2411 }
 0x658   : > { %v2414_v7 = vpop.permute.xlu0 %2413 }
 0x659   : > { %v2417_v51 = vsel %vm1332_vm5, %v2412_v49, %v2414_v7 }
 0x65a   : > { %v2421_v48 = vsel %vm1182_vm6, %v2417_v51, 0.0 }
 0x65b   : > { %v2423_v45 = vadd.f32 %v2421_v48, %v2269_v52 }
 0x65c   : > { %v2416_v14 = vpop.permute.xlu1 %2415 }
 0x65d   : > { %v2425_v57 = vadd.f32 %v2423_v45, %v1339_v37  ;;  %v2418_v3 = vsel %vm1332_vm5, %v2414_v7, %v2416_v14 }
 0x65e   : > { %v2422_v1 = vsel %vm1183_vm8, %v2418_v3, 0.0 }
 0x65f   : > { %v2670_v40 = vmul.f32 -1.442695, %v2425_v57  ;;  %v2424_v43 = vadd.f32 %v2422_v1, %v2270_v16 }
 0x661   : > { %2749 = vpow2.f32 %v2670_v40  ;;  %v2426_v35 = vadd.f32 %v2424_v43, %v1340_v46 }
 0x663   : > { %v2671_v54 = vmul.f32 -1.442695, %v2426_v35 }
 0x665   : > { %2751 = vpow2.f32 %v2671_v54 }
 0x66e   : > { %v2750_v47 = vpop.eup %2749 }
 0x66f   : > { %v2433_v31 = vadd.f32 1.0, %v2750_v47 }
 0x671   : > { %2753 = vrcp.f32 %v2433_v31 }
 0x672   : > { %v2752_v19 = vpop.eup %2751 }
 0x673   : > { %v2434_v11 = vadd.f32 1.0, %v2752_v19 }
 0x675   : > { %2755 = vrcp.f32 %v2434_v11 }
 0x67e   : > { %v2754_v36 = vpop.eup %2753 }
 0x682   : > { %v2756_v18 = vpop.eup %2755 }
 0x683   : > { %v2441_v4 = vcombine.low %v2754_v36, %v2756_v18 }
 0x685   : > { %v2448_v17 = vrot.slane %v2441_v4, %v2447_v22 }
 0x687   : > { %v2455_v33 = vrot.slane %v2448_v17, %v2447_v22 }
 0x689   : > { %2461 = vst.msk [vmem:[%s171_s26] sm:$0x3] %vm2459_vm1, %v2455_v33 }
 0x68a   : > { %2809 = shalt.err (!%p2806_p5)
}
 0x68b   : > { %s2810_s30 = scalar_lea.hbm %s2475_s15, 32  ;;  %s2814_s6 = scalar_lea.hbm %s4145_s2, 64 }
 0x68c   : > { %p2811_p2 = scmp.ne.s32.totalorder %s2475_s15, %s2810_s30  ;;  %p2815_p9 = scmp.lt.s32.totalorder %s2475_s15, %s4145_s2 }
 0x68d   : > { %p2816_p1 = scmp.lt.s32.totalorder %s2814_s6, %s2810_s30 }
 0x68e   : > { %p2812_p12 = pnand %p2811_p2, %p4200_p8 }
 0x68f   : > { %p2817_p4 = por %p2816_p1, %p2815_p9 }
 0x690   : > { %p2813_p13 = pneg %p2812_p12 }
 0x692   : > { %p2818_p6 = pnand %p2817_p4, %p2813_p13 }
 0x694   : > { %2821 = shalt.err (!%p2818_p6)
}
 0x695   : > { %2685 = dma.vmem_to_hbm [thread:$0]  (%p4200_p8), %s2478_s22, 32, %s2475_s15, %s2463_s5  }
 0x696 PF: > { %s2489_s21 = sand.u32 1, %s2852_s9   ;;  %p4201_p7 = scmp.ne.s32.totalorder %s4159_s16, 0 }
 0x697   : > { %p4202_p10 = scmp.ge.s32.totalorder %s2864_s12, 2  ;;  %s2490_s27 = scalar_lea.sflag [#allocation4], %s2489_s21 }
 0x699   : > { %p2696_p11 = pnand %p4202_p10, %p4201_p7 }
 0x69b   : > { %p2697_p0 = pneg %p2696_p11 }
 0x69d   : > { %2847 = dma.done.wait (%p2697_p0), %s2490_s27, 32  }
 0x69e   : > { %2849 = vsyncadd (%p2697_p0), %s2490_s27, 4294967264  ;;  %p16_p3 = scmp.ge.s32.totalorder %s2943_s18, 4   ;;  %s4203_s9 = smov %s2856_s10 }
 0x69f   : > { %s4204_s10 = smov %s2860_s11  ;;  %s4205_s11 = smov %s2960_s24 }
 0x6a0   : > { %s4206_s12 = smov %s2943_s18  ;;  %18 = sbr.rel (!%p16_p3) target bundleno = 6 (0x6), region = 81 }
 0x6a5   :  { %2495 = vsyncpa [#allocation3], 1 }
 0x6a6   :  { %2497 = vsyncpa [#allocation3 + $0x1], 1 }
 0x6a7   :  { %2498 = vsyncpa [#allocation4], 1 }
 0x6a8   :  { %2500 = vsyncpa [#allocation4 + $0x1], 1 }
 0x6a9   :  { %2501 = vsyncpa [#allocation5], 1 }
 0x6aa   :  { %2503 = vsyncpa [#allocation5 + $0x1], 1 }

</bundles_post_ra>
